<compile_context>
chip_gen: v7x
topology: tpu7x:2x2x1
jax: 0.10.0
libtpu: 0.0.40
codegen_flags: <defaults>
</compile_context>

<pallas_src>
import functools

import jax
import jax.numpy as jnp
from jax.experimental import pallas as pl
from jax.experimental.pallas import tpu as pltpu


# ----------------------------------------------------------------------------
# helpers
# ----------------------------------------------------------------------------
def _full_spec(shape):
    n = len(shape)
    return pl.BlockSpec(shape, lambda *args, _n=n: (0,) * _n)


def _padded_out_width(n_actions):
    # probs (n_actions) + value (1), padded up to a lane-dense multiple of 128
    return max(128, ((n_actions + 1 + 127) // 128) * 128)


# ----------------------------------------------------------------------------
# forward pass
# ----------------------------------------------------------------------------
def actor_critic_forward(x_nchw, params, n_actions):
    """Full ActorCritic.forward. Input follows the PyTorch NCHW convention.

    Returns (action_probs (N, n_actions), state_value (N, 1))."""
    w1k, p1k, w2k, p2k = params["cnn"]
    w1cat, b1cat, w2pack, b2pack = params["head"]

    N, Cin, H, W = x_nchw.shape
    C1 = w1k.shape[2]
    C2 = w2k.shape[2]
    F = H * W * C2
    OUT_W = w2pack.shape[1]

    # NCHW -> NHWC and spatial zero-padding (tiny tensor; done once in XLA).
    x = jnp.transpose(x_nchw, (0, 2, 3, 1)).astype(jnp.float32)
    xp = jnp.pad(x, ((0, 0), (1, 1), (1, 1), (0, 0)))          # (N, H+2, W+2, Cin)

    # ---------------- fused CNN base kernel ----------------
    def cnn_kernel(xp_ref, w1_ref, p1_ref, w2_ref, p2_ref, o_ref, h1pad_ref):
        # ---- conv1: 9 shifted matmuls (in-kernel im2col) ----
        xpv = xp_ref[...]                                       # (N, H+2, W+2, Cin) f32
        acc1 = jnp.zeros((N * H * W, C1), jnp.float32)
        for k in range(9):
            ky, kx = k // 3, k % 3
            lhs = xpv[:, ky:ky + H, kx:kx + W, :].reshape(N * H * W, Cin)
            acc1 = acc1 + jnp.dot(lhs.astype(jnp.bfloat16), w1_ref[k],
                                  preferred_element_type=jnp.float32)
        # bias -> ReLU -> folded BatchNorm (scale/shift), all f32 on the VPU
        a1 = (jnp.maximum(acc1 + p1_ref[0:1, :], 0.0)
              * p1_ref[1:2, :] + p1_ref[2:3, :])                # (N*H*W, C1)

        # ---- stage conv1 output into a zero-padded VMEM scratch ----
        h1pad_ref[...] = jnp.zeros((N, H + 2, W + 2, C1), jnp.float32)
        h1pad_ref[:, 1:H + 1, 1:W + 1, :] = a1.reshape(N, H, W, C1)

        # ---- conv2: 9 shifted matmuls reading the padded scratch ----
        h1v = h1pad_ref[...]                                    # (N, H+2, W+2, C1)
        acc2 = jnp.zeros((N * H * W, C2), jnp.float32)
        for k in range(9):
            ky, kx = k // 3, k % 3
            lhs = h1v[:, ky:ky + H, kx:kx + W, :].reshape(N * H * W, C1)
            acc2 = acc2 + jnp.dot(lhs.astype(jnp.bfloat16), w2_ref[k],
                                  preferred_element_type=jnp.float32)
        a2 = (jnp.maximum(acc2 + p2_ref[0:1, :], 0.0)
              * p2_ref[1:2, :] + p2_ref[2:3, :])                # (N*H*W, C2)
        o_ref[...] = a2.astype(o_ref.dtype)

    conv_out = pl.pallas_call(
        cnn_kernel,
        out_shape=jax.ShapeDtypeStruct((N * H * W, C2), jnp.bfloat16),
        grid=(1,),
        in_specs=[
            _full_spec(xp.shape),
            _full_spec(w1k.shape), _full_spec(p1k.shape),
            _full_spec(w2k.shape), _full_spec(p2k.shape),
        ],
        out_specs=_full_spec((N * H * W, C2)),
        scratch_shapes=[pltpu.VMEM((N, H + 2, W + 2, C1), jnp.float32)],
        compiler_params=pltpu.CompilerParams(dimension_semantics=("arbitrary",)),
    )(xp, w1k, p1k, w2k, p2k)

    # rows of conv_out are ordered (n, h, w) with channels on lanes, so this
    # reshape is a free row-major view -> (N, H*W*C2). The head weights were
    # row-permuted at prep time to consume exactly this (NHWC) flatten order,
    # replicating torch's NCHW x.view(N, -1) semantics with zero runtime cost.
    feats = conv_out.reshape(N, F)

    # ---------------- fused actor/critic head kernel ----------------
    def head_kernel(f_ref, w1_ref, b1_ref, w2_ref, b2_ref, o_ref):
        f = f_ref[...]                                           # (N, F) bf16
        # layer 1: actor & critic concatenated -> one MXU pass
        h = jnp.dot(f, w1_ref[...], preferred_element_type=jnp.float32) + b1_ref[...]
        h = jnp.maximum(h, 0.0).astype(jnp.bfloat16)             # (N, 2*hidden)
        # layer 2: packed block weights -> lane-dense (N, OUT_W) pre-activation
        #   cols [0, A): actor logits, col A: state value, cols > A: zero.
        z = jnp.dot(h, w2_ref[...], preferred_element_type=jnp.float32) + b2_ref[...]

        lane = jax.lax.broadcasted_iota(jnp.int32, z.shape, 1)
        is_logit = lane < n_actions
        m = jnp.max(jnp.where(is_logit, z, -1e30), axis=-1, keepdims=True)
        e = jnp.exp(jnp.where(is_logit, z - m, -1e30))           # masked lanes -> 0
        denom = jnp.sum(e, axis=-1, keepdims=True)
        probs = e * pl.reciprocal(denom)                         # exact reciprocal
        # single un-masked, lane-dense store: probs in [0, A), value at col A
        o_ref[...] = jnp.where(lane == n_actions, z, probs)

    packed = pl.pallas_call(
        head_kernel,
        out_shape=jax.ShapeDtypeStruct((N, OUT_W), jnp.float32),
        grid=(1,),
        in_specs=[
            _full_spec((N, F)),
            _full_spec(w1cat.shape), _full_spec(b1cat.shape),
            _full_spec(w2pack.shape), _full_spec(b2pack.shape),
        ],
        out_specs=_full_spec((N, OUT_W)),
        compiler_params=pltpu.CompilerParams(dimension_semantics=("arbitrary",)),
    )(feats, w1cat, b1cat, w2pack, b2pack)

    action_probs = packed[:, :n_actions]
    state_value = packed[:, n_actions:n_actions + 1]
    return action_probs, state_value


# ----------------------------------------------------------------------------
# parameter construction (torch-layout) and static prep/folding
# ----------------------------------------------------------------------------
def init_params(key, input_channels, grid_size, n_actions, hidden_size,
                cnn_channels=(32, 64)):
    """Random parameters in PyTorch layouts (Conv2d OIHW, Linear (out, in))."""
    def conv_p(k, cin, cout):
        kw, kb, kg, kbe, km = jax.random.split(k, 5)
        w = jax.random.normal(kw, (cout, cin, 3, 3), jnp.float32) * (1.0 / (3.0 * cin ** 0.5))
        b = 0.1 * jax.random.normal(kb, (cout,), jnp.float32)
        gamma = 1.0 + 0.1 * jax.random.normal(kg, (cout,), jnp.float32)
        beta = 0.1 * jax.random.normal(kbe, (cout,), jnp.float32)
        mean = 0.1 * jax.random.normal(km, (cout,), jnp.float32)
        var = jnp.ones((cout,), jnp.float32)
        return (w, b, gamma, beta, mean, var)

    def lin_p(k, fin, fout):
        kw, kb = jax.random.split(k)
        w = jax.random.normal(kw, (fout, fin), jnp.float32) * (1.0 / fin ** 0.5)
        b = 0.05 * jax.random.normal(kb, (fout,), jnp.float32)
        return (w, b)

    c1, c2 = cnn_channels
    feat = c2 * grid_size * grid_size
    keys = jax.random.split(key, 6)
    return {
        "conv1": conv_p(keys[0], input_channels, c1),
        "conv2": conv_p(keys[1], c1, c2),
        "actor": lin_p(keys[2], feat, hidden_size) + lin_p(keys[3], hidden_size, n_actions),
        "critic": lin_p(keys[4], feat, hidden_size) + lin_p(keys[5], hidden_size, 1),
    }


def prepare_params(raw, grid_size, n_actions, hidden_size, cnn_channels=(32, 64)):
    """One-time static folding: conv weight re-layout, BN scale/shift fold,
    head-weight row permutation (NCHW->NHWC flatten order), actor/critic
    packing, bf16 casts for all matmul operands."""
    H = W = grid_size
    c1, c2 = cnn_channels
    eps = 1e-5

    def conv_prep(p):
        w, b, gamma, beta, mean, var = p                         # w: (Cout, Cin, 3, 3)
        cout, cin = w.shape[0], w.shape[1]
        # (Cout, Cin, kH, kW) -> (kH, kW, Cin, Cout) -> (9, Cin, Cout)
        wk = jnp.transpose(w, (2, 3, 1, 0)).reshape(9, cin, cout).astype(jnp.bfloat16)
        scale = gamma * jax.lax.rsqrt(var + eps)
        shift = beta - mean * scale
        pk = jnp.stack([b, scale, shift], axis=0).astype(jnp.float32)  # (3, Cout)
        return wk, pk

    w1k, p1k = conv_prep(raw["conv1"])
    w2k, p2k = conv_prep(raw["conv2"])

    wa1, ba1, wa2, ba2 = raw["actor"]                            # wa1: (hid, F), wa2: (A, hid)
    wc1, bc1, wc2, bc2 = raw["critic"]
    F = c2 * H * W

    # permutation mapping NHWC-flat feature index -> torch NCHW-flat index
    perm = jnp.transpose(jnp.arange(F).reshape(c2, H, W), (1, 2, 0)).reshape(F)
    wa1_r = jnp.take(wa1.T, perm, axis=0)                        # (F, hid), NHWC rows
    wc1_r = jnp.take(wc1.T, perm, axis=0)
    w1cat = jnp.concatenate([wa1_r, wc1_r], axis=1).astype(jnp.bfloat16)   # (F, 2*hid)
    b1cat = jnp.concatenate([ba1, bc1])[None, :].astype(jnp.float32)       # (1, 2*hid)

    out_w = _padded_out_width(n_actions)
    w2pack = jnp.zeros((2 * hidden_size, out_w), jnp.float32)
    w2pack = w2pack.at[:hidden_size, :n_actions].set(wa2.T)      # actor logits block
    w2pack = w2pack.at[hidden_size:, n_actions].set(wc2[0])      # critic value column
    w2pack = w2pack.astype(jnp.bfloat16)
    b2pack = jnp.zeros((out_w,), jnp.float32)
    b2pack = b2pack.at[:n_actions].set(ba2).at[n_actions].set(bc2[0])[None, :]

    return {
        "cnn": (w1k, p1k, w2k, p2k),
        "head": (w1cat, b1cat, w2pack, b2pack),
    }


# ----------------------------------------------------------------------------
if __name__ == "__main__":
    # small shapes: batch=2, input_channels=4, grid_size=8, n_actions=6, hidden=32
    N, C_IN, G, N_ACT, HID = 2, 4, 8, 6, 32

    key = jax.random.PRNGKey(0)
    k_x, k_p = jax.random.split(key)
    x = jax.random.normal(k_x, (N, C_IN, G, G), jnp.float32)     # NCHW, like PyTorch

    raw_params = init_params(k_p, C_IN, G, N_ACT, HID)
    params = prepare_params(raw_params, G, N_ACT, HID)

    fwd = jax.jit(functools.partial(actor_critic_forward, params=params, n_actions=N_ACT))
    action_probs, state_value = fwd(x)
    jax.block_until_ready((action_probs, state_value))

    assert action_probs.shape == (N, N_ACT)
    assert state_value.shape == (N, 1)
    assert bool(jnp.all(jnp.isfinite(action_probs)))
    assert bool(jnp.all(jnp.isfinite(state_value)))
    assert bool(jnp.all(jnp.abs(jnp.sum(action_probs, axis=-1) - 1.0) < 1e-5))

    print("KERNEL_OK")
</pallas_src>

<mosaic_0001>
module attributes {stable_mosaic.version = 11 : i64} {
  func.func @cnn_kernel(%arg0: i32, %arg1: memref<2x10x10x4xf32, #tpu.memory_space<vmem>>, %arg2: memref<9x4x32xbf16, #tpu.memory_space<vmem>>, %arg3: memref<3x32xf32, #tpu.memory_space<vmem>>, %arg4: memref<9x32x64xbf16, #tpu.memory_space<vmem>>, %arg5: memref<3x64xf32, #tpu.memory_space<vmem>>, %arg6: memref<128x64xbf16, #tpu.memory_space<vmem>>, %arg7: memref<2x10x10x32xf32, #tpu.memory_space<vmem>>) attributes {dimension_semantics = [#tpu.dimension_semantics<arbitrary>], iteration_bounds = array<i64: 1>, scalar_prefetch = 0 : i64, scratch_operands = 1 : i64, tpu.core_type = #tpu.core_type<tc>, window_params = [{pipeline_mode = #tpu.pipeline_mode<synchronous>, transform_indices = @transform_0, window_bounds = array<i64: 2, 10, 10, 4>}, {pipeline_mode = #tpu.pipeline_mode<synchronous>, transform_indices = @transform_1, window_bounds = array<i64: 9, 4, 32>}, {pipeline_mode = #tpu.pipeline_mode<synchronous>, transform_indices = @transform_2, window_bounds = array<i64: 3, 32>}, {pipeline_mode = #tpu.pipeline_mode<synchronous>, transform_indices = @transform_3, window_bounds = array<i64: 9, 32, 64>}, {pipeline_mode = #tpu.pipeline_mode<synchronous>, transform_indices = @transform_4, window_bounds = array<i64: 3, 64>}, {pipeline_mode = #tpu.pipeline_mode<synchronous>, transform_indices = @transform_5, window_bounds = array<i64: 128, 64>}]} {
    %c0 = arith.constant 0 : index
    %c0_0 = arith.constant 0 : index
    %c0_1 = arith.constant 0 : index
    %c0_2 = arith.constant 0 : index
    %0 = vector.load %arg1[%c0, %c0_0, %c0_1, %c0_2] : memref<2x10x10x4xf32, #tpu.memory_space<vmem>>, vector<2x10x10x4xf32>
    %cst = arith.constant 0.000000e+00 : f32
    %1 = vector.broadcast %cst : f32 to vector<128x32xf32>
    %2 = vector.extract_strided_slice %0 {offsets = [0, 0, 0, 0], sizes = [2, 8, 8, 4], strides = [1, 1, 1, 1]} : vector<2x10x10x4xf32> to vector<2x8x8x4xf32>
    %3 = vector.shape_cast %2 : vector<2x8x8x4xf32> to vector<128x4xf32>
    %4 = arith.truncf %3 : vector<128x4xf32> to vector<128x4xbf16>
    %c0_3 = arith.constant 0 : index
    %c0_4 = arith.constant 0 : index
    %c0_5 = arith.constant 0 : index
    %5 = vector.load %arg2[%c0_3, %c0_4, %c0_5] : memref<9x4x32xbf16, #tpu.memory_space<vmem>>, vector<1x4x32xbf16>
    %6 = vector.shape_cast %5 : vector<1x4x32xbf16> to vector<4x32xbf16>
    %cst_6 = arith.constant dense<0.000000e+00> : vector<128x32xf32>
    %7 = tpu.matmul %4, %6, %cst_6 {dimension_numbers = #tpu.dot_dimension_numbers<[1], [0], [0], [1], [0, 0, 1, 1], [], []>} : vector<128x4xbf16>, vector<4x32xbf16>, vector<128x32xf32> -> vector<128x32xf32>
    %8 = arith.addf %1, %7 : vector<128x32xf32>
    %9 = vector.extract_strided_slice %0 {offsets = [0, 0, 1, 0], sizes = [2, 8, 8, 4], strides = [1, 1, 1, 1]} : vector<2x10x10x4xf32> to vector<2x8x8x4xf32>
    %10 = vector.shape_cast %9 : vector<2x8x8x4xf32> to vector<128x4xf32>
    %11 = arith.truncf %10 : vector<128x4xf32> to vector<128x4xbf16>
    %c1 = arith.constant 1 : index
    %c0_7 = arith.constant 0 : index
    %c0_8 = arith.constant 0 : index
    %12 = vector.load %arg2[%c1, %c0_7, %c0_8] : memref<9x4x32xbf16, #tpu.memory_space<vmem>>, vector<1x4x32xbf16>
    %13 = vector.shape_cast %12 : vector<1x4x32xbf16> to vector<4x32xbf16>
    %cst_9 = arith.constant dense<0.000000e+00> : vector<128x32xf32>
    %14 = tpu.matmul %11, %13, %cst_9 {dimension_numbers = #tpu.dot_dimension_numbers<[1], [0], [0], [1], [0, 0, 1, 1], [], []>} : vector<128x4xbf16>, vector<4x32xbf16>, vector<128x32xf32> -> vector<128x32xf32>
    %15 = arith.addf %8, %14 : vector<128x32xf32>
    %16 = vector.extract_strided_slice %0 {offsets = [0, 0, 2, 0], sizes = [2, 8, 8, 4], strides = [1, 1, 1, 1]} : vector<2x10x10x4xf32> to vector<2x8x8x4xf32>
    %17 = vector.shape_cast %16 : vector<2x8x8x4xf32> to vector<128x4xf32>
    %18 = arith.truncf %17 : vector<128x4xf32> to vector<128x4xbf16>
    %c2 = arith.constant 2 : index
    %c0_10 = arith.constant 0 : index
    %c0_11 = arith.constant 0 : index
    %19 = vector.load %arg2[%c2, %c0_10, %c0_11] : memref<9x4x32xbf16, #tpu.memory_space<vmem>>, vector<1x4x32xbf16>
    %20 = vector.shape_cast %19 : vector<1x4x32xbf16> to vector<4x32xbf16>
    %cst_12 = arith.constant dense<0.000000e+00> : vector<128x32xf32>
    %21 = tpu.matmul %18, %20, %cst_12 {dimension_numbers = #tpu.dot_dimension_numbers<[1], [0], [0], [1], [0, 0, 1, 1], [], []>} : vector<128x4xbf16>, vector<4x32xbf16>, vector<128x32xf32> -> vector<128x32xf32>
    %22 = arith.addf %15, %21 : vector<128x32xf32>
    %23 = vector.extract_strided_slice %0 {offsets = [0, 1, 0, 0], sizes = [2, 8, 8, 4], strides = [1, 1, 1, 1]} : vector<2x10x10x4xf32> to vector<2x8x8x4xf32>
    %24 = vector.shape_cast %23 : vector<2x8x8x4xf32> to vector<128x4xf32>
    %25 = arith.truncf %24 : vector<128x4xf32> to vector<128x4xbf16>
    %c3 = arith.constant 3 : index
    %c0_13 = arith.constant 0 : index
    %c0_14 = arith.constant 0 : index
    %26 = vector.load %arg2[%c3, %c0_13, %c0_14] : memref<9x4x32xbf16, #tpu.memory_space<vmem>>, vector<1x4x32xbf16>
    %27 = vector.shape_cast %26 : vector<1x4x32xbf16> to vector<4x32xbf16>
    %cst_15 = arith.constant dense<0.000000e+00> : vector<128x32xf32>
    %28 = tpu.matmul %25, %27, %cst_15 {dimension_numbers = #tpu.dot_dimension_numbers<[1], [0], [0], [1], [0, 0, 1, 1], [], []>} : vector<128x4xbf16>, vector<4x32xbf16>, vector<128x32xf32> -> vector<128x32xf32>
    %29 = arith.addf %22, %28 : vector<128x32xf32>
    %30 = vector.extract_strided_slice %0 {offsets = [0, 1, 1, 0], sizes = [2, 8, 8, 4], strides = [1, 1, 1, 1]} : vector<2x10x10x4xf32> to vector<2x8x8x4xf32>
    %31 = vector.shape_cast %30 : vector<2x8x8x4xf32> to vector<128x4xf32>
    %32 = arith.truncf %31 : vector<128x4xf32> to vector<128x4xbf16>
    %c4 = arith.constant 4 : index
    %c0_16 = arith.constant 0 : index
    %c0_17 = arith.constant 0 : index
    %33 = vector.load %arg2[%c4, %c0_16, %c0_17] : memref<9x4x32xbf16, #tpu.memory_space<vmem>>, vector<1x4x32xbf16>
    %34 = vector.shape_cast %33 : vector<1x4x32xbf16> to vector<4x32xbf16>
    %cst_18 = arith.constant dense<0.000000e+00> : vector<128x32xf32>
    %35 = tpu.matmul %32, %34, %cst_18 {dimension_numbers = #tpu.dot_dimension_numbers<[1], [0], [0], [1], [0, 0, 1, 1], [], []>} : vector<128x4xbf16>, vector<4x32xbf16>, vector<128x32xf32> -> vector<128x32xf32>
    %36 = arith.addf %29, %35 : vector<128x32xf32>
    %37 = vector.extract_strided_slice %0 {offsets = [0, 1, 2, 0], sizes = [2, 8, 8, 4], strides = [1, 1, 1, 1]} : vector<2x10x10x4xf32> to vector<2x8x8x4xf32>
    %38 = vector.shape_cast %37 : vector<2x8x8x4xf32> to vector<128x4xf32>
    %39 = arith.truncf %38 : vector<128x4xf32> to vector<128x4xbf16>
    %c5 = arith.constant 5 : index
    %c0_19 = arith.constant 0 : index
    %c0_20 = arith.constant 0 : index
    %40 = vector.load %arg2[%c5, %c0_19, %c0_20] : memref<9x4x32xbf16, #tpu.memory_space<vmem>>, vector<1x4x32xbf16>
    %41 = vector.shape_cast %40 : vector<1x4x32xbf16> to vector<4x32xbf16>
    %cst_21 = arith.constant dense<0.000000e+00> : vector<128x32xf32>
    %42 = tpu.matmul %39, %41, %cst_21 {dimension_numbers = #tpu.dot_dimension_numbers<[1], [0], [0], [1], [0, 0, 1, 1], [], []>} : vector<128x4xbf16>, vector<4x32xbf16>, vector<128x32xf32> -> vector<128x32xf32>
    %43 = arith.addf %36, %42 : vector<128x32xf32>
    %44 = vector.extract_strided_slice %0 {offsets = [0, 2, 0, 0], sizes = [2, 8, 8, 4], strides = [1, 1, 1, 1]} : vector<2x10x10x4xf32> to vector<2x8x8x4xf32>
    %45 = vector.shape_cast %44 : vector<2x8x8x4xf32> to vector<128x4xf32>
    %46 = arith.truncf %45 : vector<128x4xf32> to vector<128x4xbf16>
    %c6 = arith.constant 6 : index
    %c0_22 = arith.constant 0 : index
    %c0_23 = arith.constant 0 : index
    %47 = vector.load %arg2[%c6, %c0_22, %c0_23] : memref<9x4x32xbf16, #tpu.memory_space<vmem>>, vector<1x4x32xbf16>
    %48 = vector.shape_cast %47 : vector<1x4x32xbf16> to vector<4x32xbf16>
    %cst_24 = arith.constant dense<0.000000e+00> : vector<128x32xf32>
    %49 = tpu.matmul %46, %48, %cst_24 {dimension_numbers = #tpu.dot_dimension_numbers<[1], [0], [0], [1], [0, 0, 1, 1], [], []>} : vector<128x4xbf16>, vector<4x32xbf16>, vector<128x32xf32> -> vector<128x32xf32>
    %50 = arith.addf %43, %49 : vector<128x32xf32>
    %51 = vector.extract_strided_slice %0 {offsets = [0, 2, 1, 0], sizes = [2, 8, 8, 4], strides = [1, 1, 1, 1]} : vector<2x10x10x4xf32> to vector<2x8x8x4xf32>
    %52 = vector.shape_cast %51 : vector<2x8x8x4xf32> to vector<128x4xf32>
    %53 = arith.truncf %52 : vector<128x4xf32> to vector<128x4xbf16>
    %c7 = arith.constant 7 : index
    %c0_25 = arith.constant 0 : index
    %c0_26 = arith.constant 0 : index
    %54 = vector.load %arg2[%c7, %c0_25, %c0_26] : memref<9x4x32xbf16, #tpu.memory_space<vmem>>, vector<1x4x32xbf16>
    %55 = vector.shape_cast %54 : vector<1x4x32xbf16> to vector<4x32xbf16>
    %cst_27 = arith.constant dense<0.000000e+00> : vector<128x32xf32>
    %56 = tpu.matmul %53, %55, %cst_27 {dimension_numbers = #tpu.dot_dimension_numbers<[1], [0], [0], [1], [0, 0, 1, 1], [], []>} : vector<128x4xbf16>, vector<4x32xbf16>, vector<128x32xf32> -> vector<128x32xf32>
    %57 = arith.addf %50, %56 : vector<128x32xf32>
    %58 = vector.extract_strided_slice %0 {offsets = [0, 2, 2, 0], sizes = [2, 8, 8, 4], strides = [1, 1, 1, 1]} : vector<2x10x10x4xf32> to vector<2x8x8x4xf32>
    %59 = vector.shape_cast %58 : vector<2x8x8x4xf32> to vector<128x4xf32>
    %60 = arith.truncf %59 : vector<128x4xf32> to vector<128x4xbf16>
    %c8 = arith.constant 8 : index
    %c0_28 = arith.constant 0 : index
    %c0_29 = arith.constant 0 : index
    %61 = vector.load %arg2[%c8, %c0_28, %c0_29] : memref<9x4x32xbf16, #tpu.memory_space<vmem>>, vector<1x4x32xbf16>
    %62 = vector.shape_cast %61 : vector<1x4x32xbf16> to vector<4x32xbf16>
    %cst_30 = arith.constant dense<0.000000e+00> : vector<128x32xf32>
    %63 = tpu.matmul %60, %62, %cst_30 {dimension_numbers = #tpu.dot_dimension_numbers<[1], [0], [0], [1], [0, 0, 1, 1], [], []>} : vector<128x4xbf16>, vector<4x32xbf16>, vector<128x32xf32> -> vector<128x32xf32>
    %64 = arith.addf %57, %63 : vector<128x32xf32>
    %c0_31 = arith.constant 0 : index
    %c0_32 = arith.constant 0 : index
    %65 = vector.load %arg3[%c0_31, %c0_32] : memref<3x32xf32, #tpu.memory_space<vmem>>, vector<1x32xf32>
    %66 = vector.broadcast %65 : vector<1x32xf32> to vector<128x32xf32>
    %67 = arith.addf %64, %66 : vector<128x32xf32>
    %cst_33 = arith.constant 0.000000e+00 : f32
    %68 = vector.broadcast %cst_33 : f32 to vector<128x32xf32>
    %69 = arith.maximumf %67, %68 : vector<128x32xf32>
    %c1_34 = arith.constant 1 : index
    %c0_35 = arith.constant 0 : index
    %70 = vector.load %arg3[%c1_34, %c0_35] : memref<3x32xf32, #tpu.memory_space<vmem>>, vector<1x32xf32>
    %71 = vector.broadcast %70 : vector<1x32xf32> to vector<128x32xf32>
    %72 = arith.mulf %69, %71 : vector<128x32xf32>
    %c2_36 = arith.constant 2 : index
    %c0_37 = arith.constant 0 : index
    %73 = vector.load %arg3[%c2_36, %c0_37] : memref<3x32xf32, #tpu.memory_space<vmem>>, vector<1x32xf32>
    %74 = vector.broadcast %73 : vector<1x32xf32> to vector<128x32xf32>
    %75 = arith.addf %72, %74 : vector<128x32xf32>
    %cst_38 = arith.constant 0.000000e+00 : f32
    %76 = vector.broadcast %cst_38 : f32 to vector<2x10x10x32xf32>
    %c0_39 = arith.constant 0 : index
    %c0_40 = arith.constant 0 : index
    %c0_41 = arith.constant 0 : index
    %c0_42 = arith.constant 0 : index
    %77 = vector.load %arg7[%c0_39, %c0_40, %c0_41, %c0_42] : memref<2x10x10x32xf32, #tpu.memory_space<vmem>>, vector<2x10x10x32xf32>
    tpu.vector_store %arg7[%c0_39, %c0_40, %c0_41, %c0_42], %76 {strides = array<i32>} : memref<2x10x10x32xf32, #tpu.memory_space<vmem>>, vector<2x10x10x32xf32>,
    %78 = vector.shape_cast %75 : vector<128x32xf32> to vector<2x8x8x32xf32>
    %c0_43 = arith.constant 0 : index
    %c1_44 = arith.constant 1 : index
    %c1_45 = arith.constant 1 : index
    %c0_46 = arith.constant 0 : index
    %79 = vector.load %arg7[%c0_43, %c1_44, %c1_45, %c0_46] : memref<2x10x10x32xf32, #tpu.memory_space<vmem>>, vector<2x8x8x32xf32>
    tpu.vector_store %arg7[%c0_43, %c1_44, %c1_45, %c0_46], %78 {strides = array<i32>} : memref<2x10x10x32xf32, #tpu.memory_space<vmem>>, vector<2x8x8x32xf32>,
    %c0_47 = arith.constant 0 : index
    %c0_48 = arith.constant 0 : index
    %c0_49 = arith.constant 0 : index
    %c0_50 = arith.constant 0 : index
    %80 = vector.load %arg7[%c0_47, %c0_48, %c0_49, %c0_50] : memref<2x10x10x32xf32, #tpu.memory_space<vmem>>, vector<2x10x10x32xf32>
    %cst_51 = arith.constant 0.000000e+00 : f32
    %81 = vector.broadcast %cst_51 : f32 to vector<128x64xf32>
    %82 = vector.extract_strided_slice %80 {offsets = [0, 0, 0, 0], sizes = [2, 8, 8, 32], strides = [1, 1, 1, 1]} : vector<2x10x10x32xf32> to vector<2x8x8x32xf32>
    %83 = vector.shape_cast %82 : vector<2x8x8x32xf32> to vector<128x32xf32>
    %84 = arith.truncf %83 : vector<128x32xf32> to vector<128x32xbf16>
    %c0_52 = arith.constant 0 : index
    %c0_53 = arith.constant 0 : index
    %c0_54 = arith.constant 0 : index
    %85 = vector.load %arg4[%c0_52, %c0_53, %c0_54] : memref<9x32x64xbf16, #tpu.memory_space<vmem>>, vector<1x32x64xbf16>
    %86 = vector.shape_cast %85 : vector<1x32x64xbf16> to vector<32x64xbf16>
    %cst_55 = arith.constant dense<0.000000e+00> : vector<128x64xf32>
    %87 = tpu.matmul %84, %86, %cst_55 {dimension_numbers = #tpu.dot_dimension_numbers<[1], [0], [0], [1], [0, 0, 1, 1], [], []>} : vector<128x32xbf16>, vector<32x64xbf16>, vector<128x64xf32> -> vector<128x64xf32>
    %88 = arith.addf %81, %87 : vector<128x64xf32>
    %89 = vector.extract_strided_slice %80 {offsets = [0, 0, 1, 0], sizes = [2, 8, 8, 32], strides = [1, 1, 1, 1]} : vector<2x10x10x32xf32> to vector<2x8x8x32xf32>
    %90 = vector.shape_cast %89 : vector<2x8x8x32xf32> to vector<128x32xf32>
    %91 = arith.truncf %90 : vector<128x32xf32> to vector<128x32xbf16>
    %c1_56 = arith.constant 1 : index
    %c0_57 = arith.constant 0 : index
    %c0_58 = arith.constant 0 : index
    %92 = vector.load %arg4[%c1_56, %c0_57, %c0_58] : memref<9x32x64xbf16, #tpu.memory_space<vmem>>, vector<1x32x64xbf16>
    %93 = vector.shape_cast %92 : vector<1x32x64xbf16> to vector<32x64xbf16>
    %cst_59 = arith.constant dense<0.000000e+00> : vector<128x64xf32>
    %94 = tpu.matmul %91, %93, %cst_59 {dimension_numbers = #tpu.dot_dimension_numbers<[1], [0], [0], [1], [0, 0, 1, 1], [], []>} : vector<128x32xbf16>, vector<32x64xbf16>, vector<128x64xf32> -> vector<128x64xf32>
    %95 = arith.addf %88, %94 : vector<128x64xf32>
    %96 = vector.extract_strided_slice %80 {offsets = [0, 0, 2, 0], sizes = [2, 8, 8, 32], strides = [1, 1, 1, 1]} : vector<2x10x10x32xf32> to vector<2x8x8x32xf32>
    %97 = vector.shape_cast %96 : vector<2x8x8x32xf32> to vector<128x32xf32>
    %98 = arith.truncf %97 : vector<128x32xf32> to vector<128x32xbf16>
    %c2_60 = arith.constant 2 : index
    %c0_61 = arith.constant 0 : index
    %c0_62 = arith.constant 0 : index
    %99 = vector.load %arg4[%c2_60, %c0_61, %c0_62] : memref<9x32x64xbf16, #tpu.memory_space<vmem>>, vector<1x32x64xbf16>
    %100 = vector.shape_cast %99 : vector<1x32x64xbf16> to vector<32x64xbf16>
    %cst_63 = arith.constant dense<0.000000e+00> : vector<128x64xf32>
    %101 = tpu.matmul %98, %100, %cst_63 {dimension_numbers = #tpu.dot_dimension_numbers<[1], [0], [0], [1], [0, 0, 1, 1], [], []>} : vector<128x32xbf16>, vector<32x64xbf16>, vector<128x64xf32> -> vector<128x64xf32>
    %102 = arith.addf %95, %101 : vector<128x64xf32>
    %103 = vector.extract_strided_slice %80 {offsets = [0, 1, 0, 0], sizes = [2, 8, 8, 32], strides = [1, 1, 1, 1]} : vector<2x10x10x32xf32> to vector<2x8x8x32xf32>
    %104 = vector.shape_cast %103 : vector<2x8x8x32xf32> to vector<128x32xf32>
    %105 = arith.truncf %104 : vector<128x32xf32> to vector<128x32xbf16>
    %c3_64 = arith.constant 3 : index
    %c0_65 = arith.constant 0 : index
    %c0_66 = arith.constant 0 : index
    %106 = vector.load %arg4[%c3_64, %c0_65, %c0_66] : memref<9x32x64xbf16, #tpu.memory_space<vmem>>, vector<1x32x64xbf16>
    %107 = vector.shape_cast %106 : vector<1x32x64xbf16> to vector<32x64xbf16>
    %cst_67 = arith.constant dense<0.000000e+00> : vector<128x64xf32>
    %108 = tpu.matmul %105, %107, %cst_67 {dimension_numbers = #tpu.dot_dimension_numbers<[1], [0], [0], [1], [0, 0, 1, 1], [], []>} : vector<128x32xbf16>, vector<32x64xbf16>, vector<128x64xf32> -> vector<128x64xf32>
    %109 = arith.addf %102, %108 : vector<128x64xf32>
    %110 = vector.extract_strided_slice %80 {offsets = [0, 1, 1, 0], sizes = [2, 8, 8, 32], strides = [1, 1, 1, 1]} : vector<2x10x10x32xf32> to vector<2x8x8x32xf32>
    %111 = vector.shape_cast %110 : vector<2x8x8x32xf32> to vector<128x32xf32>
    %112 = arith.truncf %111 : vector<128x32xf32> to vector<128x32xbf16>
    %c4_68 = arith.constant 4 : index
    %c0_69 = arith.constant 0 : index
    %c0_70 = arith.constant 0 : index
    %113 = vector.load %arg4[%c4_68, %c0_69, %c0_70] : memref<9x32x64xbf16, #tpu.memory_space<vmem>>, vector<1x32x64xbf16>
    %114 = vector.shape_cast %113 : vector<1x32x64xbf16> to vector<32x64xbf16>
    %cst_71 = arith.constant dense<0.000000e+00> : vector<128x64xf32>
    %115 = tpu.matmul %112, %114, %cst_71 {dimension_numbers = #tpu.dot_dimension_numbers<[1], [0], [0], [1], [0, 0, 1, 1], [], []>} : vector<128x32xbf16>, vector<32x64xbf16>, vector<128x64xf32> -> vector<128x64xf32>
    %116 = arith.addf %109, %115 : vector<128x64xf32>
    %117 = vector.extract_strided_slice %80 {offsets = [0, 1, 2, 0], sizes = [2, 8, 8, 32], strides = [1, 1, 1, 1]} : vector<2x10x10x32xf32> to vector<2x8x8x32xf32>
    %118 = vector.shape_cast %117 : vector<2x8x8x32xf32> to vector<128x32xf32>
    %119 = arith.truncf %118 : vector<128x32xf32> to vector<128x32xbf16>
    %c5_72 = arith.constant 5 : index
    %c0_73 = arith.constant 0 : index
    %c0_74 = arith.constant 0 : index
    %120 = vector.load %arg4[%c5_72, %c0_73, %c0_74] : memref<9x32x64xbf16, #tpu.memory_space<vmem>>, vector<1x32x64xbf16>
    %121 = vector.shape_cast %120 : vector<1x32x64xbf16> to vector<32x64xbf16>
    %cst_75 = arith.constant dense<0.000000e+00> : vector<128x64xf32>
    %122 = tpu.matmul %119, %121, %cst_75 {dimension_numbers = #tpu.dot_dimension_numbers<[1], [0], [0], [1], [0, 0, 1, 1], [], []>} : vector<128x32xbf16>, vector<32x64xbf16>, vector<128x64xf32> -> vector<128x64xf32>
    %123 = arith.addf %116, %122 : vector<128x64xf32>
    %124 = vector.extract_strided_slice %80 {offsets = [0, 2, 0, 0], sizes = [2, 8, 8, 32], strides = [1, 1, 1, 1]} : vector<2x10x10x32xf32> to vector<2x8x8x32xf32>
    %125 = vector.shape_cast %124 : vector<2x8x8x32xf32> to vector<128x32xf32>
    %126 = arith.truncf %125 : vector<128x32xf32> to vector<128x32xbf16>
    %c6_76 = arith.constant 6 : index
    %c0_77 = arith.constant 0 : index
    %c0_78 = arith.constant 0 : index
    %127 = vector.load %arg4[%c6_76, %c0_77, %c0_78] : memref<9x32x64xbf16, #tpu.memory_space<vmem>>, vector<1x32x64xbf16>
    %128 = vector.shape_cast %127 : vector<1x32x64xbf16> to vector<32x64xbf16>
    %cst_79 = arith.constant dense<0.000000e+00> : vector<128x64xf32>
    %129 = tpu.matmul %126, %128, %cst_79 {dimension_numbers = #tpu.dot_dimension_numbers<[1], [0], [0], [1], [0, 0, 1, 1], [], []>} : vector<128x32xbf16>, vector<32x64xbf16>, vector<128x64xf32> -> vector<128x64xf32>
    %130 = arith.addf %123, %129 : vector<128x64xf32>
    %131 = vector.extract_strided_slice %80 {offsets = [0, 2, 1, 0], sizes = [2, 8, 8, 32], strides = [1, 1, 1, 1]} : vector<2x10x10x32xf32> to vector<2x8x8x32xf32>
    %132 = vector.shape_cast %131 : vector<2x8x8x32xf32> to vector<128x32xf32>
    %133 = arith.truncf %132 : vector<128x32xf32> to vector<128x32xbf16>
    %c7_80 = arith.constant 7 : index
    %c0_81 = arith.constant 0 : index
    %c0_82 = arith.constant 0 : index
    %134 = vector.load %arg4[%c7_80, %c0_81, %c0_82] : memref<9x32x64xbf16, #tpu.memory_space<vmem>>, vector<1x32x64xbf16>
    %135 = vector.shape_cast %134 : vector<1x32x64xbf16> to vector<32x64xbf16>
    %cst_83 = arith.constant dense<0.000000e+00> : vector<128x64xf32>
    %136 = tpu.matmul %133, %135, %cst_83 {dimension_numbers = #tpu.dot_dimension_numbers<[1], [0], [0], [1], [0, 0, 1, 1], [], []>} : vector<128x32xbf16>, vector<32x64xbf16>, vector<128x64xf32> -> vector<128x64xf32>
    %137 = arith.addf %130, %136 : vector<128x64xf32>
    %138 = vector.extract_strided_slice %80 {offsets = [0, 2, 2, 0], sizes = [2, 8, 8, 32], strides = [1, 1, 1, 1]} : vector<2x10x10x32xf32> to vector<2x8x8x32xf32>
    %139 = vector.shape_cast %138 : vector<2x8x8x32xf32> to vector<128x32xf32>
    %140 = arith.truncf %139 : vector<128x32xf32> to vector<128x32xbf16>
    %c8_84 = arith.constant 8 : index
    %c0_85 = arith.constant 0 : index
    %c0_86 = arith.constant 0 : index
    %141 = vector.load %arg4[%c8_84, %c0_85, %c0_86] : memref<9x32x64xbf16, #tpu.memory_space<vmem>>, vector<1x32x64xbf16>
    %142 = vector.shape_cast %141 : vector<1x32x64xbf16> to vector<32x64xbf16>
    %cst_87 = arith.constant dense<0.000000e+00> : vector<128x64xf32>
    %143 = tpu.matmul %140, %142, %cst_87 {dimension_numbers = #tpu.dot_dimension_numbers<[1], [0], [0], [1], [0, 0, 1, 1], [], []>} : vector<128x32xbf16>, vector<32x64xbf16>, vector<128x64xf32> -> vector<128x64xf32>
    %144 = arith.addf %137, %143 : vector<128x64xf32>
    %c0_88 = arith.constant 0 : index
    %c0_89 = arith.constant 0 : index
    %145 = vector.load %arg5[%c0_88, %c0_89] : memref<3x64xf32, #tpu.memory_space<vmem>>, vector<1x64xf32>
    %146 = vector.broadcast %145 : vector<1x64xf32> to vector<128x64xf32>
    %147 = arith.addf %144, %146 : vector<128x64xf32>
    %cst_90 = arith.constant 0.000000e+00 : f32
    %148 = vector.broadcast %cst_90 : f32 to vector<128x64xf32>
    %149 = arith.maximumf %147, %148 : vector<128x64xf32>
    %c1_91 = arith.constant 1 : index
    %c0_92 = arith.constant 0 : index
    %150 = vector.load %arg5[%c1_91, %c0_92] : memref<3x64xf32, #tpu.memory_space<vmem>>, vector<1x64xf32>
    %151 = vector.broadcast %150 : vector<1x64xf32> to vector<128x64xf32>
    %152 = arith.mulf %149, %151 : vector<128x64xf32>
    %c2_93 = arith.constant 2 : index
    %c0_94 = arith.constant 0 : index
    %153 = vector.load %arg5[%c2_93, %c0_94] : memref<3x64xf32, #tpu.memory_space<vmem>>, vector<1x64xf32>
    %154 = vector.broadcast %153 : vector<1x64xf32> to vector<128x64xf32>
    %155 = arith.addf %152, %154 : vector<128x64xf32>
    %156 = arith.truncf %155 : vector<128x64xf32> to vector<128x64xbf16>
    %c0_95 = arith.constant 0 : index
    %c0_96 = arith.constant 0 : index
    %157 = vector.load %arg6[%c0_95, %c0_96] : memref<128x64xbf16, #tpu.memory_space<vmem>>, vector<128x64xbf16>
    tpu.vector_store %arg6[%c0_95, %c0_96], %156 {strides = array<i32>} : memref<128x64xbf16, #tpu.memory_space<vmem>>, vector<128x64xbf16>,
    return
  }
  func.func @transform_0(%arg0: i32) -> (i32, i32, i32, i32) {
    %c0_i32 = arith.constant 0 : i32
    %c0_i32_0 = arith.constant 0 : i32
    %c0_i32_1 = arith.constant 0 : i32
    %c0_i32_2 = arith.constant 0 : i32
    %c0_i32_3 = arith.constant 0 : i32
    return %c0_i32, %c0_i32_0, %c0_i32_1, %c0_i32_2 : i32, i32, i32, i32
  }
  func.func @transform_1(%arg0: i32) -> (i32, i32, i32) {
    %c0_i32 = arith.constant 0 : i32
    %c0_i32_0 = arith.constant 0 : i32
    %c0_i32_1 = arith.constant 0 : i32
    %c0_i32_2 = arith.constant 0 : i32
    return %c0_i32, %c0_i32_0, %c0_i32_1 : i32, i32, i32
  }
  func.func @transform_2(%arg0: i32) -> (i32, i32) {
    %c0_i32 = arith.constant 0 : i32
    %c0_i32_0 = arith.constant 0 : i32
    %c0_i32_1 = arith.constant 0 : i32
    return %c0_i32, %c0_i32_0 : i32, i32
  }
  func.func @transform_3(%arg0: i32) -> (i32, i32, i32) {
    %c0_i32 = arith.constant 0 : i32
    %c0_i32_0 = arith.constant 0 : i32
    %c0_i32_1 = arith.constant 0 : i32
    %c0_i32_2 = arith.constant 0 : i32
    return %c0_i32, %c0_i32_0, %c0_i32_1 : i32, i32, i32
  }
  func.func @transform_4(%arg0: i32) -> (i32, i32) {
    %c0_i32 = arith.constant 0 : i32
    %c0_i32_0 = arith.constant 0 : i32
    %c0_i32_1 = arith.constant 0 : i32
    return %c0_i32, %c0_i32_0 : i32, i32
  }
  func.func @transform_5(%arg0: i32) -> (i32, i32) {
    %c0_i32 = arith.constant 0 : i32
    %c0_i32_0 = arith.constant 0 : i32
    %c0_i32_1 = arith.constant 0 : i32
    return %c0_i32, %c0_i32_0 : i32, i32
  }
}

module attributes {stable_mosaic.version = 11 : i64} {
  func.func @head_kernel(%arg0: i32, %arg1: memref<2x4096xbf16, #tpu.memory_space<vmem>>, %arg2: memref<4096x64xbf16, #tpu.memory_space<vmem>>, %arg3: memref<1x64xf32, #tpu.memory_space<vmem>>, %arg4: memref<64x128xbf16, #tpu.memory_space<vmem>>, %arg5: memref<1x128xf32, #tpu.memory_space<vmem>>, %arg6: memref<2x128xf32, #tpu.memory_space<vmem>>) attributes {dimension_semantics = [#tpu.dimension_semantics<arbitrary>], iteration_bounds = array<i64: 1>, scalar_prefetch = 0 : i64, scratch_operands = 0 : i64, tpu.core_type = #tpu.core_type<tc>, window_params = [{pipeline_mode = #tpu.pipeline_mode<synchronous>, transform_indices = @transform_0, window_bounds = array<i64: 2, 4096>}, {pipeline_mode = #tpu.pipeline_mode<synchronous>, transform_indices = @transform_1, window_bounds = array<i64: 4096, 64>}, {pipeline_mode = #tpu.pipeline_mode<synchronous>, transform_indices = @transform_2, window_bounds = array<i64: 1, 64>}, {pipeline_mode = #tpu.pipeline_mode<synchronous>, transform_indices = @transform_3, window_bounds = array<i64: 64, 128>}, {pipeline_mode = #tpu.pipeline_mode<synchronous>, transform_indices = @transform_4, window_bounds = array<i64: 1, 128>}, {pipeline_mode = #tpu.pipeline_mode<synchronous>, transform_indices = @transform_5, window_bounds = array<i64: 2, 128>}]} {
    %c0 = arith.constant 0 : index
    %c0_0 = arith.constant 0 : index
    %0 = vector.load %arg1[%c0, %c0_0] : memref<2x4096xbf16, #tpu.memory_space<vmem>>, vector<2x4096xbf16>
    %c0_1 = arith.constant 0 : index
    %c0_2 = arith.constant 0 : index
    %1 = vector.load %arg2[%c0_1, %c0_2] : memref<4096x64xbf16, #tpu.memory_space<vmem>>, vector<4096x64xbf16>
    %cst = arith.constant dense<0.000000e+00> : vector<2x64xf32>
    %2 = tpu.matmul %0, %1, %cst {dimension_numbers = #tpu.dot_dimension_numbers<[1], [0], [0], [1], [0, 0, 1, 1], [], []>} : vector<2x4096xbf16>, vector<4096x64xbf16>, vector<2x64xf32> -> vector<2x64xf32>
    %c0_3 = arith.constant 0 : index
    %c0_4 = arith.constant 0 : index
    %3 = vector.load %arg3[%c0_3, %c0_4] : memref<1x64xf32, #tpu.memory_space<vmem>>, vector<1x64xf32>
    %4 = vector.broadcast %3 : vector<1x64xf32> to vector<2x64xf32>
    %5 = arith.addf %2, %4 : vector<2x64xf32>
    %cst_5 = arith.constant 0.000000e+00 : f32
    %6 = vector.broadcast %cst_5 : f32 to vector<2x64xf32>
    %7 = arith.maximumf %5, %6 : vector<2x64xf32>
    %8 = arith.truncf %7 : vector<2x64xf32> to vector<2x64xbf16>
    %c0_6 = arith.constant 0 : index
    %c0_7 = arith.constant 0 : index
    %9 = vector.load %arg4[%c0_6, %c0_7] : memref<64x128xbf16, #tpu.memory_space<vmem>>, vector<64x128xbf16>
    %cst_8 = arith.constant dense<0.000000e+00> : vector<2x128xf32>
    %10 = tpu.matmul %8, %9, %cst_8 {dimension_numbers = #tpu.dot_dimension_numbers<[1], [0], [0], [1], [0, 0, 1, 1], [], []>} : vector<2x64xbf16>, vector<64x128xbf16>, vector<2x128xf32> -> vector<2x128xf32>
    %c0_9 = arith.constant 0 : index
    %c0_10 = arith.constant 0 : index
    %11 = vector.load %arg5[%c0_9, %c0_10] : memref<1x128xf32, #tpu.memory_space<vmem>>, vector<1x128xf32>
    %12 = vector.broadcast %11 : vector<1x128xf32> to vector<2x128xf32>
    %13 = arith.addf %10, %12 : vector<2x128xf32>
    %14 = tpu.iota {dimensions = array<i32: 1>} : vector<2x128xi32>
    %c6_i32 = arith.constant 6 : i32
    %15 = vector.broadcast %c6_i32 : i32 to vector<2x128xi32>
    %16 = arith.cmpi slt, %14, %15 : vector<2x128xi32>
    %cst_11 = arith.constant -1.000000e+30 : f32
    %17 = vector.broadcast %cst_11 : f32 to vector<2x128xf32>
    %18 = arith.select %16, %13, %17 : vector<2x128xi1>, vector<2x128xf32>
    %cst_12 = arith.constant dense<0xFF800000> : vector<2xf32>
    %19 = vector.multi_reduction <maximumf>, %18, %cst_12 [1] : vector<2x128xf32> to vector<2xf32>
    %20 = vector.shape_cast %19 : vector<2xf32> to vector<2x1xf32>
    %21 = vector.broadcast %20 : vector<2x1xf32> to vector<2x128xf32>
    %22 = arith.subf %13, %21 : vector<2x128xf32>
    %cst_13 = arith.constant -1.000000e+30 : f32
    %23 = vector.broadcast %cst_13 : f32 to vector<2x128xf32>
    %24 = arith.select %16, %22, %23 : vector<2x128xi1>, vector<2x128xf32>
    %25 = math.exp %24 : vector<2x128xf32>
    %cst_14 = arith.constant dense<0.000000e+00> : vector<2xf32>
    %26 = vector.multi_reduction <add>, %25, %cst_14 [1] : vector<2x128xf32> to vector<2xf32>
    %27 = vector.shape_cast %26 : vector<2xf32> to vector<2x1xf32>
    %28 = tpu.reciprocal %27 : vector<2x1xf32> -> vector<2x1xf32>
    %29 = vector.broadcast %28 : vector<2x1xf32> to vector<2x128xf32>
    %30 = arith.mulf %25, %29 : vector<2x128xf32>
    %c6_i32_15 = arith.constant 6 : i32
    %31 = vector.broadcast %c6_i32_15 : i32 to vector<2x128xi32>
    %32 = arith.cmpi eq, %14, %31 : vector<2x128xi32>
    %33 = arith.select %32, %13, %30 : vector<2x128xi1>, vector<2x128xf32>
    %c0_16 = arith.constant 0 : index
    %c0_17 = arith.constant 0 : index
    %34 = vector.load %arg6[%c0_16, %c0_17] : memref<2x128xf32, #tpu.memory_space<vmem>>, vector<2x128xf32>
    tpu.vector_store %arg6[%c0_16, %c0_17], %33 {strides = array<i32>} : memref<2x128xf32, #tpu.memory_space<vmem>>, vector<2x128xf32>,
    return
  }
  func.func @transform_0(%arg0: i32) -> (i32, i32) {
    %c0_i32 = arith.constant 0 : i32
    %c0_i32_0 = arith.constant 0 : i32
    %c0_i32_1 = arith.constant 0 : i32
    return %c0_i32, %c0_i32_0 : i32, i32
  }
  func.func @transform_1(%arg0: i32) -> (i32, i32) {
    %c0_i32 = arith.constant 0 : i32
    %c0_i32_0 = arith.constant 0 : i32
    %c0_i32_1 = arith.constant 0 : i32
    return %c0_i32, %c0_i32_0 : i32, i32
  }
  func.func @transform_2(%arg0: i32) -> (i32, i32) {
    %c0_i32 = arith.constant 0 : i32
    %c0_i32_0 = arith.constant 0 : i32
    %c0_i32_1 = arith.constant 0 : i32
    return %c0_i32, %c0_i32_0 : i32, i32
  }
  func.func @transform_3(%arg0: i32) -> (i32, i32) {
    %c0_i32 = arith.constant 0 : i32
    %c0_i32_0 = arith.constant 0 : i32
    %c0_i32_1 = arith.constant 0 : i32
    return %c0_i32, %c0_i32_0 : i32, i32
  }
  func.func @transform_4(%arg0: i32) -> (i32, i32) {
    %c0_i32 = arith.constant 0 : i32
    %c0_i32_0 = arith.constant 0 : i32
    %c0_i32_1 = arith.constant 0 : i32
    return %c0_i32, %c0_i32_0 : i32, i32
  }
  func.func @transform_5(%arg0: i32) -> (i32, i32) {
    %c0_i32 = arith.constant 0 : i32
    %c0_i32_0 = arith.constant 0 : i32
    %c0_i32_1 = arith.constant 0 : i32
    return %c0_i32, %c0_i32_0 : i32, i32
  }
}

</mosaic_0001>

<bundles_post_ra>
// kernel: actor_critic_forward.2
= control target key start
LH: loop header
LB: loop body
LE: loop exit
PB: predicated region body
PF: predicated region fallthrough
CT: control target
= control target key end

     0   :  { %vm202_vm0 = vcmask 1041408   ;;  %vm102_vm1 = vcmask 1046528   ;;  %vm177_vm2 = vcmask 31744   ;;  %vm427_vm3 = vcmask 1045504   ;;  %s5960_s1 = inlined_call_operand.vmem [shape: bf16[9,4,32], index: 1, kind: input, shape index: {}]   ;;  %s5961_s0 = inlined_call_operand.vmem [shape: f32[2,10,10,4], index: 0, kind: input, shape index: {}]   ;;  %s5962_s3 = inlined_call_operand.vmem [shape: bf16[9,32,64], index: 3, kind: input, shape index: {}]   ;;  %s5963_s2 = inlined_call_operand.vmem [shape: f32[3,32], index: 2, kind: input, shape index: {}]   ;;  %s5964_s4 = inlined_call_operand.vmem [shape: f32[3,64], index: 4, kind: input, shape index: {}]   ;;  %s5965_s5 = inlined_call_operand.vmem [shape: bf16[128,64], index: 5, kind: output, shape index: {}]  }
   0x1   :  { %v3405_v0 = vld [vmem:[%s5960_s1 + $0x2] sm:$0x3]  ;;  %v4484_v2 = vld [vmem:[%s5961_s0 + $0x8] sm:$0x3]  ;;  %v4491_v4 = vld [vmem:[%s5961_s0 + $0x10] sm:$0xff]  ;;  %vm1589_vm4 = vcmask 261120  }
   0x2   :  { %v4479_v1 = vld [vmem:[%s5961_s0] sm:$0xff]  ;;  %4414 = vmatprep.subr.msk.bf16.mxu0 %vm202_vm0, %v3405_v0  ;;  %v204_v3 = vsel %vm202_vm0, %v3405_v0, 0  ;;  %v4496_v5 = vld [vmem:[%s5961_s0 + $0x18] sm:$0x3]  ;;  %v26_v8 = vld [vmem:[%s5961_s0 + $0x28] sm:$0x3] }
   0x3   :  { %v4501_v6 = vld [vmem:[%s5961_s0 + $0x20] sm:$0xff]  ;;  %v103_v7 = vrot.slane %v4479_v1, 1  ;;  %3817 = vmatpush3.bf16.msra.mxu0 %v204_v3  ;;  %v4510_v9 = vld [vmem:[%s5961_s0 + $0x30] sm:$0xff]  ;;  %v28_v10 = vld [vmem:[%s5961_s0 + $0x38] sm:$0x3]  ;;  %v104_v11 = vrot.slane %v4484_v2, 1 }
   0x4   :  { %v4521_v13 = vld [vmem:[%s5961_s0 + $0x40] sm:$0xff]  ;;  %v4526_v14 = vld [vmem:[%s5961_s0 + $0x48] sm:$0x3]  ;;  %v106_v15 = vrot.slane %v4491_v4, 1  ;;  %v107_v16 = vrot.slane %v4496_v5, 1  ;;  %v109_v17 = vrot.slane %v4501_v6, 1 }
   0x5   :  { %v105_v18 = vsel %vm102_vm1, %v103_v7, %v104_v11  ;;  %v110_v19 = vrot.slane %v26_v8, 1  ;;  %v112_v20 = vrot.slane %v4510_v9, 1  ;;  %v113_v21 = vrot.slane %v28_v10, 1  ;;  %v69_v22 = vld [vmem:[%s5960_s1] sm:$0x3]  ;;  %v4552_v29 = vld [vmem:[%s5961_s0 + $0x50] sm:$0xff] }
   0x6   :  { %v4537_v23 = vsel %vm102_vm1, %v106_v15, %v107_v16  ;;  %v115_v24 = vrot.slane %v4521_v13, 1  ;;  %v116_v25 = vrot.slane %v4526_v14, 1  ;;  %4415 = vmatprep.subr.msk.bf16.mxu0 %vm202_vm0, %v69_v22  ;;  %v4557_v30 = vld [vmem:[%s5961_s0 + $0x58] sm:$0x3]  ;;  %v434_v33 = vrot.slane %v4501_v6, 2  ;;  %v4570_v34 = vld [vmem:[%s5961_s0 + $0x60] sm:$0xff] }
   0x7   :  { %v4543_v26 = vsel %vm102_vm1, %v109_v17, %v110_v19  ;;  %v4546_v27 = vsel %vm102_vm1, %v112_v20, %v113_v21  ;;  %v167_v28 = vpack.c.bf16 %v4537_v23, %v105_v18  ;;  %v4575_v35 = vld [vmem:[%s5961_s0 + $0x68] sm:$0x3]  ;;  %v4580_v36 = vld [vmem:[%s5961_s0 + $0x78] sm:$0x3]  ;;  %v435_v37 = vrot.slane %v26_v8, 2  ;;  %v4589_v41 = vld [vmem:[%s5961_s0 + $0x70] sm:$0xff] }
   0x8   :  { %v4560_v31 = vsel %vm102_vm1, %v115_v24, %v116_v25  ;;  %v4564_v32 = vpack.c.bf16 %v4546_v27, %v4543_v26  ;;  %v437_v38 = vrot.slane %v4510_v9, 2  ;;  %v438_v39 = vrot.slane %v28_v10, 2  ;;  %v4594_v42 = vld [vmem:[%s5961_s0 + $0xa8] sm:$0x3]  ;;  %v4606_v47 = vld [vmem:[%s5961_s0 + $0xa0] sm:$0xff]  ;;  %v4624_v53 = vld [vmem:[%s5961_s0 + $0xb0] sm:$0xff] }
   0x9   :  { %3818 = vmatprep.mubr.msk.bf16.mxu0 %vm177_vm2, %v167_v28  ;;  %v328_v44 = vsel %vm202_vm0, %v69_v22, 0  ;;  %v118_v45 = vrot.slane %v4552_v29, 1  ;;  %v119_v46 = vrot.slane %v4557_v30, 1  ;;  %v4611_v48 = vld [vmem:[%s5961_s0 + $0xb8] sm:$0x3]  ;;  %v4614_v49 = vsel %vm427_vm3, %v434_v33, %v435_v37  ;;  %v4629_v54 = vld [vmem:[%s5961_s0 + $0xc0] sm:$0xff] }
   0xa   :  { %5980 = vst [vmem:[#allocation3_spill] sm:$0xff] %v4564_v32  ;;  %3819 = vmatmul.mubr.msk.bf16.vlgmr.msra.gmra.mrb[0].mxu0 %vm177_vm2, %v4564_v32  ;;  %v4617_v50 = vsel %vm427_vm3, %v437_v38, %v438_v39  ;;  %v121_v51 = vrot.slane %v4570_v34, 1  ;;  %v122_v52 = vrot.slane %v4575_v35, 1  ;;  %v4634_v55 = vld [vmem:[%s5961_s0 + $0xc8] sm:$0x3]  ;;  %v124_v58 = vrot.slane %v4589_v41, 1 }
   0xb   :  { %3835 = vmatpush3.bf16.msra.mxu0 %v328_v44  ;;  %v4638_v56 = vpack.c.bf16 %v4617_v50, %v4614_v49  ;;  %v4641_v57 = vsel %vm102_vm1, %v118_v45, %v119_v46  ;;  %v125_v59 = vrot.slane %v4580_v36, 1  ;;  %v4648_v60 = vld [vmem:[%s5961_s0 + $0xd0] sm:$0xff]  ;;  %v4653_v61 = vld [vmem:[%s5961_s0 + $0xd8] sm:$0x3]  ;;  %v127_v0 = vrot.slane %v4606_v47, 1  ;;  %v4667_v7 = vld [vmem:[%s5961_s0 + $0xe0] sm:$0xff] }
   0xc   :  { %v4657_v62 = vpack.c.bf16 %v4641_v57, %v4560_v31  ;;  %v4660_v63 = vsel %vm102_vm1, %v121_v51, %v122_v52  ;;  %v128_v3 = vrot.slane %v4594_v42, 1  ;;  %v4672_v8 = vld [vmem:[%s5961_s0 + $0xe8] sm:$0x3]  ;;  %v130_v11 = vrot.slane %v4624_v53, 1  ;;  %v4683_v17 = vld [vmem:[%s5961_s0 + $0xf0] sm:$0xff]  ;;  %v4713_v38 = vld [vmem:[%s5961_s0 + $0x100] sm:$0xff] }
   0xd   :  { %v4675_v10 = vsel %vm102_vm1, %v124_v58, %v125_v59  ;;  %v131_v15 = vrot.slane %v4611_v48, 1  ;;  %v133_v16 = vrot.slane %v4629_v54, 1  ;;  %v4688_v18 = vld [vmem:[%s5961_s0 + $0xf8] sm:$0x3]  ;;  %v134_v21 = vrot.slane %v4634_v55, 1  ;;  %v4728_v51 = vld [vmem:[%s5961_s0 + $0x110] sm:$0xff] }
   0xe   :  { %5981 = vst [vmem:[#allocation4_spill] sm:$0xff] %v4657_v62  ;;  %3822 = vmatprep.mubr.msk.bf16.mxu0 %vm177_vm2, %v4657_v62  ;;  %v4694_v19 = vpack.c.bf16 %v4675_v10, %v4660_v63  ;;  %v129_v20 = vsel %vm102_vm1, %v127_v0, %v128_v3  ;;  %v136_v22 = vrot.slane %v4648_v60, 1  ;;  %v4702_v24 = vld [vmem:[%s5960_s1 + $0x4] sm:$0x3]  ;;  %v137_v28 = vrot.slane %v4653_v61, 1 }
   0xf   :  { %v4705_v25 = vsel %vm102_vm1, %v130_v11, %v131_v15  ;;  %v139_v33 = vrot.slane %v4667_v7, 1  ;;  %v140_v37 = vrot.slane %v4672_v8, 1  ;;  %v4718_v39 = vld [vmem:[%s5961_s0 + $0x108] sm:$0x3]  ;;  %4416 = vmatprep.subr.msk.bf16.mxu0 %vm202_vm0, %v4702_v24  ;;  %v142_v45 = vrot.slane %v4683_v17, 1 }
  0x10   :  { %5982 = vst [vmem:[#allocation5_spill] sm:$0xff] %v4694_v19  ;;  %v171_v44 = vpack.c.bf16 %v4705_v25, %v129_v20  ;;  %v143_v46 = vrot.slane %v4688_v18, 1  ;;  %v4733_v52 = vld [vmem:[%s5961_s0 + $0x118] sm:$0x3]  ;;  %v4739_v58 = vsel %vm102_vm1, %v133_v16, %v134_v21  ;;  %v4742_v59 = vsel %vm102_vm1, %v136_v22, %v137_v28 }
  0x11   :  { %v4745_v0 = vsel %vm102_vm1, %v139_v33, %v140_v37  ;;  %v145_v3 = vrot.slane %v4713_v38, 1  ;;  %v146_v15 = vrot.slane %v4718_v39, 1  ;;  %v148_v20 = vrot.slane %v4728_v51, 1 }
  0x12   :  { %3823 = vmatmul.mubr.msk.bf16.gmra.mrb[4].mxu0 %vm177_vm2, %v4694_v19  ;;  %v4749_v11 = vsel %vm102_vm1, %v142_v45, %v143_v46  ;;  %v4756_v16 = vpack.c.bf16 %v4742_v59, %v4739_v58  ;;  %v440_v22 = vrot.slane %v4521_v13, 2  ;;  %v441_v28 = vrot.slane %v4526_v14, 2 }
  0x13   :  { %3826 = vmatprep.mubr.msk.bf16.mxu0 %vm177_vm2, %v171_v44  ;;  %v149_v44 = vrot.slane %v4733_v52, 1  ;;  %v4760_v21 = vpack.c.bf16 %v4749_v11, %v4745_v0  ;;  %v4765_v33 = vsel %vm102_vm1, %v145_v3, %v146_v15  ;;  %v446_v45 = vrot.slane %v4570_v34, 2 }
  0x14   :  { %5983 = vst [vmem:[#allocation6_spill] sm:$0xff] %v4756_v16  ;;  %v447_v46 = vrot.slane %v4575_v35, 2  ;;  %v4773_v43 = vsel %vm427_vm3, %v440_v22, %v441_v28  ;;  %v449_v40 = vrot.slane %v4589_v41, 2  ;;  %v450_v12 = vrot.slane %v4580_v36, 2 }
  0x15   :  { %5984 = vst [vmem:[#allocation7_spill] sm:$0xff] %v4760_v21  ;;  %v4768_v37 = vsel %vm102_vm1, %v148_v20, %v149_v44  ;;  %v432_v19 = vrot.slane %v4496_v5, 2  ;;  %v61_v14 = vpack.c.bf16 %v4491_v4, %v4479_v1  ;;  %v452_v15 = vrot.slane %v4606_v47, 2 }
  0x16   :  { %v4785_v35 = vsel %vm427_vm3, %v446_v45, %v447_v46  ;;  %v4791_v36 = vpack.c.bf16 %v4768_v37, %v4765_v33  ;;  %v4794_v5 = vsel %vm427_vm3, %v449_v40, %v450_v12  ;;  %v453_v20 = vrot.slane %v4594_v42, 2 }
  0x17   :  { %5986 = vst [vmem:[#allocation9_spill] sm:$0xff] %v4794_v5  ;;  %v4800_v44 = vpack.c.bf16 %v4794_v5, %v4785_v35  ;;  %v455_v22 = vrot.slane %v4624_v53, 2  ;;  %v456_v28 = vrot.slane %v4611_v48, 2  ;;  %v458_v45 = vrot.slane %v4629_v54, 2 }
  0x18   :  { %5985 = vst [vmem:[#allocation8_spill] sm:$0xff] %v4791_v36  ;;  %v4806_v46 = vsel %vm427_vm3, %v452_v15, %v453_v20  ;;  %v459_v12 = vrot.slane %v4634_v55, 2  ;;  %v461_v40 = vrot.slane %v4648_v60, 2  ;;  %v462_v3 = vrot.slane %v4653_v61, 2 }
  0x19   :  { %v4812_v42 = vsel %vm427_vm3, %v455_v22, %v456_v28  ;;  %v467_v48 = vrot.slane %v4683_v17, 2  ;;  %v468_v61 = vrot.slane %v4688_v18, 2  ;;  %v471_v28 = vrot.slane %v4718_v39, 2 }
  0x1a   :  { %3827 = vmatmul.mubr.msk.bf16.gmra.mrb[8].mxu0 %vm177_vm2, %v4756_v16  ;;  %v465_v16 = vrot.slane %v4672_v8, 2  ;;  %v4820_v15 = vsel %vm427_vm3, %v458_v45, %v459_v12  ;;  %v4823_v55 = vsel %vm427_vm3, %v461_v40, %v462_v3  ;;  %v470_v8 = vrot.slane %v4713_v38, 2 }
  0x1b   :  { %3830 = vmatprep.mubr.msk.bf16.mxu0 %vm177_vm2, %v4760_v21  ;;  %v464_v21 = vrot.slane %v4667_v7, 2  ;;  %v4828_v20 = vpack.c.bf16 %v4823_v55, %v4820_v15  ;;  %v4836_v62 = vsel %vm427_vm3, %v467_v48, %v468_v61  ;;  %v473_v45 = vrot.slane %v4728_v51, 2 }
  0x1c   :  { %v474_v3 = vrot.slane %v4733_v52, 2  ;;  %v4850_v39 = vsel %vm427_vm3, %v470_v8, %v471_v28  ;;  %v644_v12 = vpack.c.bf16 %v4570_v34, %v4552_v29  ;;  %v646_v40 = vpack.c.bf16 %v4629_v54, %v4624_v53 }
  0x1d   :  { %v4831_v22 = vsel %vm427_vm3, %v464_v21, %v465_v16  ;;  %v431_v16 = vrot.slane %v4491_v4, 2  ;;  %v647_v48 = vpack.c.bf16 %v4667_v7, %v4648_v60  ;;  %v648_v8 = vpack.c.bf16 %v4713_v38, %v4683_v17 }
  0x1e   :  { %v4847_v21 = vpack.c.bf16 %v4836_v62, %v4831_v22  ;;  %v4856_v52 = vsel %vm427_vm3, %v473_v45, %v474_v3  ;;  %v4870_v28 = vpack.c.bf16 %v4510_v9, %v4501_v6  ;;  %v809_v32 = vpack.c.bf16 %v4745_v0, %v4742_v59  ;;  %v3467_v59 = vld [vmem:[%s5960_s1 + $0xe] sm:$0x3] }
  0x1f   :  { %5987 = vst [vmem:[#allocation10_spill] sm:$0xff] %v4856_v52  ;;  %v4864_v61 = vpack.c.bf16 %v4856_v52, %v4850_v39  ;;  %v4878_v18 = vsel %vm427_vm3, %v431_v16, %v432_v19  ;;  %v810_v52 = vpack.c.bf16 %v4765_v33, %v4749_v11  ;;  %v4887_v5 = vpack.c.bf16 %v4552_v29, %v4521_v13  ;;  %v5996_v11 = vld [vmem:[#allocation9_spill] sm:$0xff] }
  0x20   :  { %v962_v45 = vpack.c.bf16 %v4614_v49, %v4878_v18  ;;  %v527_v3 = vsel %vm202_vm0, %v4702_v24, 0  ;;  %v4908_v24 = vpack.c.bf16 %v4589_v41, %v4570_v34  ;;  %v65_v16 = vpack.c.bf16 %v4624_v53, %v4606_v47 }
  0x21   :  { %v4925_v34 = vpack.c.bf16 %v4683_v17, %v4667_v7  ;;  %v428_v47 = vrot.slane %v4479_v1, 2  ;;  %v429_v53 = vrot.slane %v4484_v2, 2  ;;  %v3440_v17 = vld [vmem:[%s5960_s1 + $0x8] sm:$0x3]  ;;  %v5995_v0 = vpack.c.bf16 %v4773_v43, %v4617_v50 }
  0x22   :  { %3831 = vmatmul.mubr.msk.bf16.gmra.mrb[12].mxu0 %vm177_vm2, %v4791_v36  ;;  %v444_v36 = vrot.slane %v4557_v30, 2  ;;  %v3431_v30 = vld [vmem:[%s5960_s1 + $0x6] sm:$0x3]  ;;  %vm1591_vm5 = vcmask 254976   ;;  %vm3384_vm6 = vcmask 519168  }
  0x23   :  { %3836 = vmatprep.mubr.msk.bf16.mxu0 %vm177_vm2, %v61_v14  ;;  %v443_v14 = vrot.slane %v4552_v29, 2  ;;  %v677_v2 = vsel %vm202_vm0, %v3431_v30, 0 }
  0x25   :  { %v4899_v19 = vsel %vm427_vm3, %v443_v14, %v444_v36  ;;  %v966_v36 = vpack.c.bf16 %v4820_v15, %v4812_v42  ;;  %v967_v14 = vpack.c.bf16 %v4831_v22, %v4823_v55  ;;  %v3476_v15 = vld [vmem:[%s5960_s1 + $0x10] sm:$0x3] }
  0x26   :  { %v964_v29 = vpack.c.bf16 %v4785_v35, %v4899_v19  ;;  %v4946_v1 = vpack.c.bf16 %v4899_v19, %v4773_v43  ;;  %v5997_v35 = vld [vmem:[#allocation10_spill] sm:$0xff]  ;;  %v1395_v19 = vsel %vm202_vm0, %v3476_v15, 0 }
  0x2a   :  { %3837 = vmatmul.mubr.msk.bf16.vlgmr.msra.gmra.mrb[0].mxu0 %vm177_vm2, %v4870_v28 }
  0x2b   :  { %3853 = vmatpush3.bf16.msra.mxu0 %v527_v3  ;;  %3840 = vmatprep.mubr.msk.bf16.mxu0 %vm177_vm2, %v4887_v5  ;;  %v4921_v3 = vpack.c.bf16 %v4648_v60, %v4629_v54  ;;  %v430_v54 = vsel %vm427_vm3, %v428_v47, %v429_v53  ;;  %v4938_v60 = vpack.c.bf16 %v4728_v51, %v4713_v38  ;;  %v839_v47 = vsel %vm202_vm0, %v3440_v17, 0 }
  0x2c   :  { %4417 = vmatprep.subr.msk.bf16.mxu0 %vm202_vm0, %v3431_v30  ;;  %v492_v7 = vpack.c.bf16 %v4878_v18, %v430_v54  ;;  %v5988_v38 = vpack.c.bf16 %v4812_v42, %v4806_v46  ;;  %v5989_v30 = vpack.c.bf16 %v4501_v6, %v4491_v4  ;;  %v3449_v46 = vld [vmem:[%s5960_s1 + $0xa] sm:$0x3]  ;;  %v5990_v53 = vpack.c.bf16 %v4521_v13, %v4510_v9  ;;  %v37_v4 = vld [vmem:[%s5961_s0 + $0x80] sm:$0xff]  ;;  %v3458_v54 = vld [vmem:[%s5960_s1 + $0xc] sm:$0x3] }
  0x2d   :  { %v645_v6 = vpack.c.bf16 %v37_v4, %v4589_v41  ;;  %v57_v9 = vld [vmem:[%s5961_s0 + $0x120] sm:$0xff]  ;;  %v38_v41 = vld [vmem:[%s5961_s0 + $0x88] sm:$0x3]  ;;  %v1261_v42 = vsel %vm202_vm0, %v3467_v59, 0 }
  0x2e   :  { %v649_v13 = vpack.c.bf16 %v57_v9, %v4728_v51  ;;  %v5992_v51 = vpack.c.bf16 %v4560_v31, %v4546_v27  ;;  %v58_v27 = vld [vmem:[%s5961_s0 + $0x128] sm:$0x3]  ;;  %v799_v31 = vrot.slane %v57_v9, 1  ;;  %v957_v43 = vrot.slane %v57_v9, 2 }
  0x2f   :  { %v958_v50 = vrot.slane %v58_v27, 2 }
  0x32   :  { %3841 = vmatmul.mubr.msk.bf16.gmra.mrb[4].mxu0 %vm177_vm2, %v4908_v24 }
  0x33   :  { %3844 = vmatprep.mubr.msk.bf16.mxu0 %vm177_vm2, %v65_v16  ;;  %v968_v16 = vpack.c.bf16 %v4850_v39, %v4836_v62  ;;  %v39_v62 = vld [vmem:[%s5961_s0 + $0x90] sm:$0xff]  ;;  %v5998_v39 = vld [vmem:[#allocation3_spill] sm:$0xff] }
  0x34   :  { %v1112_v55 = vpack.c.bf16 %v39_v62, %v37_v4 }
  0x3a   :  { %3845 = vmatmul.mubr.msk.bf16.gmra.mrb[8].mxu0 %vm177_vm2, %v4921_v3 }
  0x3b   :  { %3848 = vmatprep.mubr.msk.bf16.mxu0 %vm177_vm2, %v4925_v34 }
  0x42   :  { %3849 = vmatmul.mubr.msk.bf16.gmra.mrb[12].mxu0 %vm177_vm2, %v4938_v60 }
  0x43   :  { %3854 = vmatprep.mubr.msk.bf16.mxu0 %vm177_vm2, %v492_v7 }
  0x4a   :  { %3855 = vmatmul.mubr.msk.bf16.vlgmr.msra.gmra.mrb[0].mxu0 %vm177_vm2, %v4638_v56 }
  0x4b   :  { %3871 = vmatpush3.bf16.msra.mxu0 %v677_v2  ;;  %3858 = vmatprep.mubr.msk.bf16.mxu0 %vm177_vm2, %v4946_v1  ;;  %v5994_v2 = vpack.c.bf16 %v4739_v58, %v4705_v25  ;;  %v954_v25 = vrot.slane %v37_v4, 2  ;;  %v955_v58 = vrot.slane %v38_v41, 2 }
  0x4c   :  { %4418 = vmatprep.subr.msk.bf16.mxu0 %vm202_vm0, %v3440_v17  ;;  %v6002_v17 = vld [vmem:[#allocation7_spill] sm:$0xff] }
  0x4d   :  { %v956_v49 = vsel %vm427_vm3, %v954_v25, %v955_v58 }
  0x4e   :  { %v965_v33 = vpack.c.bf16 %v956_v49, %v5996_v11 }
  0x52   :  { %3859 = vmatmul.mubr.msk.bf16.gmra.mrb[4].mxu0 %vm177_vm2, %v4800_v44 }
  0x53   :  { %3862 = vmatprep.mubr.msk.bf16.mxu0 %vm177_vm2, %v5988_v38  ;;  %v6003_v38 = vld [vmem:[#allocation8_spill] sm:$0xff] }
  0x5a   :  { %3863 = vmatmul.mubr.msk.bf16.gmra.mrb[8].mxu0 %vm177_vm2, %v4828_v20 }
  0x5b   :  { %3866 = vmatprep.mubr.msk.bf16.mxu0 %vm177_vm2, %v4847_v21 }
  0x62   :  { %3867 = vmatmul.mubr.msk.bf16.gmra.mrb[12].mxu0 %vm177_vm2, %v4864_v61 }
  0x63   :  { %3872 = vmatprep.mubr.msk.bf16.mxu0 %vm177_vm2, %v5989_v30 }
  0x6a   :  { %3873 = vmatmul.mubr.msk.bf16.vlgmr.msra.gmra.mrb[0].mxu0 %vm177_vm2, %v5990_v53 }
  0x6b   :  { %3889 = vmatpush3.bf16.msra.mxu0 %v839_v47  ;;  %3876 = vmatprep.mubr.msk.bf16.mxu0 %vm177_vm2, %v644_v12  ;;  %v5991_v12 = vpack.c.bf16 %v4543_v26, %v4537_v23  ;;  %v5993_v23 = vpack.c.bf16 %v4660_v63, %v4641_v57  ;;  %v800_v57 = vrot.slane %v58_v27, 1 }
  0x6c   :  { %4419 = vmatprep.subr.msk.bf16.mxu0 %vm202_vm0, %v3449_v46 }
  0x6d   :  { %v801_v63 = vsel %vm102_vm1, %v799_v31, %v800_v57 }
  0x72   :  { %3877 = vmatmul.mubr.msk.bf16.gmra.mrb[4].mxu0 %vm177_vm2, %v645_v6 }
  0x73   :  { %3880 = vmatprep.mubr.msk.bf16.mxu0 %vm177_vm2, %v646_v40  ;;  %v796_v40 = vrot.slane %v37_v4, 1 }
  0x7a   :  { %3881 = vmatmul.mubr.msk.bf16.gmra.mrb[8].mxu0 %vm177_vm2, %v647_v48  ;;  %v797_v48 = vrot.slane %v38_v41, 1 }
  0x7b   :  { %3884 = vmatprep.mubr.msk.bf16.mxu0 %vm177_vm2, %v648_v8  ;;  %v997_v8 = vsel %vm202_vm0, %v3449_v46, 0  ;;  %v1376_v46 = vrot.slane %v39_v62, 2 }
  0x7c   :  { %v798_v26 = vsel %vm102_vm1, %v796_v40, %v797_v48 }
  0x7d   :  { %v807_v7 = vpack.c.bf16 %v798_v26, %v4675_v10  ;;  %v811_v10 = vpack.c.bf16 %v801_v63, %v4768_v37  ;;  %v959_v37 = vsel %vm427_vm3, %v957_v43, %v958_v50 }
  0x7e   :  { %v969_v18 = vpack.c.bf16 %v959_v37, %v5997_v35 }
  0x82   :  { %3885 = vmatmul.mubr.msk.bf16.gmra.mrb[12].mxu0 %vm177_vm2, %v649_v13 }
  0x83   :  { %3890 = vmatprep.mubr.msk.bf16.mxu0 %vm177_vm2, %v5991_v12  ;;  %v5191_v12 = vld [vmem:[%s5963_s2] ss:$0 sm:$0xff] }
  0x8a   :  { %3891 = vmatmul.mubr.msk.bf16.vlgmr.msra.gmra.mrb[0].mxu0 %vm177_vm2, %v5992_v51 }
  0x8b   :  { %3907 = vmatpush3.bf16.msra.mxu0 %v997_v8  ;;  %3894 = vmatprep.mubr.msk.bf16.mxu0 %vm177_vm2, %v5993_v23  ;;  %v5197_v8 = vld [vmem:[%s5963_s2 + $0x1] ss:$0 sm:$0xff] }
  0x8c   :  { %4420 = vmatprep.subr.msk.bf16.mxu0 %vm202_vm0, %v3458_v54 }
  0x92   :  { %3895 = vmatmul.mubr.msk.bf16.gmra.mrb[4].mxu0 %vm177_vm2, %v807_v7 }
  0x93   :  { %3898 = vmatprep.mubr.msk.bf16.mxu0 %vm177_vm2, %v5994_v2  ;;  %v5204_v2 = vld [vmem:[%s5963_s2 + $0x2] ss:$0 sm:$0xff] }
  0x9a   :  { %3899 = vmatmul.mubr.msk.bf16.gmra.mrb[8].mxu0 %vm177_vm2, %v809_v32  ;;  %v1123_v32 = vsel %vm202_vm0, %v3458_v54, 0 }
  0x9b   :  { %3902 = vmatprep.mubr.msk.bf16.mxu0 %vm177_vm2, %v810_v52  ;;  %v40_v52 = vld [vmem:[%s5961_s0 + $0x98] sm:$0x3] }
  0x9c   :  { %v1377_v53 = vrot.slane %v40_v52, 2 }
  0x9e   :  { %v1378_v4 = vsel %vm427_vm3, %v1376_v46, %v1377_v53 }
  0x9f   :  { %v1384_v6 = vpack.c.bf16 %v1378_v4, %v956_v49 }
  0xa2   :  { %3903 = vmatmul.mubr.msk.bf16.gmra.mrb[12].mxu0 %vm177_vm2, %v811_v10 }
  0xa3   :  { %3908 = vmatprep.mubr.msk.bf16.mxu0 %vm177_vm2, %v962_v45  ;;  %v1243_v45 = vrot.slane %v40_v52, 1 }
  0xaa   :  { %3909 = vmatmul.mubr.msk.bf16.vlgmr.msra.gmra.mrb[0].mxu0 %vm177_vm2, %v5995_v0 }
  0xab   :  { %3925 = vmatpush3.bf16.msra.mxu0 %v1123_v32  ;;  %3912 = vmatprep.mubr.msk.bf16.mxu0 %vm177_vm2, %v964_v29  ;;  %v5999_v29 = vld [vmem:[#allocation4_spill] sm:$0xff] }
  0xac   :  { %4421 = vmatprep.subr.msk.bf16.mxu0 %vm202_vm0, %v3467_v59 }
  0xb2   :  { %3913 = vmatmul.mubr.msk.bf16.gmra.mrb[4].mxu0 %vm177_vm2, %v965_v33 }
  0xb3   :  { %3916 = vmatprep.mubr.msk.bf16.mxu0 %vm177_vm2, %v966_v36 }
  0xba   :  { %3917 = vmatmul.mubr.msk.bf16.gmra.mrb[8].mxu0 %vm177_vm2, %v967_v14 }
  0xbb   :  { %3920 = vmatprep.mubr.msk.bf16.mxu0 %vm177_vm2, %v968_v16 }
  0xc2   :  { %3921 = vmatmul.mubr.msk.bf16.gmra.mrb[12].mxu0 %vm177_vm2, %v969_v18 }
  0xc3   :  { %3926 = vmatprep.mubr.msk.bf16.mxu0 %vm177_vm2, %v4870_v28  ;;  %v1242_v28 = vrot.slane %v39_v62, 1 }
  0xc5   :  { %v1244_v36 = vsel %vm102_vm1, %v1242_v28, %v1243_v45 }
  0xc6   :  { %v1250_v14 = vpack.c.bf16 %v1244_v36, %v798_v26 }
  0xca   :  { %3927 = vmatmul.mubr.msk.bf16.vlgmr.msra.gmra.mrb[0].mxu0 %vm177_vm2, %v4887_v5  ;;  %v59_v5 = vld [vmem:[%s5961_s0 + $0x130] sm:$0xff] }
  0xcb   :  { %3943 = vmatpush3.bf16.msra.mxu0 %v1261_v42  ;;  %3930 = vmatprep.mubr.msk.bf16.mxu0 %vm177_vm2, %v4908_v24  ;;  %v1113_v22 = vpack.c.bf16 %v59_v5, %v57_v9  ;;  %v6000_v24 = vld [vmem:[#allocation5_spill] sm:$0xff]  ;;  %v1245_v16 = vrot.slane %v59_v5, 1  ;;  %v1379_v9 = vrot.slane %v59_v5, 2 }
  0xcc   :  { %4422 = vmatprep.subr.msk.bf16.mxu0 %vm202_vm0, %v3476_v15 }
  0xd2   :  { %3931 = vmatmul.mubr.msk.bf16.gmra.mrb[4].mxu0 %vm177_vm2, %v1112_v55 }
  0xd3   :  { %3934 = vmatprep.mubr.msk.bf16.mxu0 %vm177_vm2, %v4921_v3  ;;  %v6001_v3 = vld [vmem:[#allocation6_spill] sm:$0xff] }
  0xda   :  { %3935 = vmatmul.mubr.msk.bf16.gmra.mrb[8].mxu0 %vm177_vm2, %v4925_v34  ;;  %v60_v34 = vld [vmem:[%s5961_s0 + $0x138] sm:$0x3] }
  0xdb   :  { %3938 = vmatprep.mubr.msk.bf16.mxu0 %vm177_vm2, %v4938_v60  ;;  %v1246_v60 = vrot.slane %v60_v34, 1  ;;  %v1380_v13 = vrot.slane %v60_v34, 2 }
  0xdd   :  { %v1247_v30 = vsel %vm102_vm1, %v1245_v16, %v1246_v60 }
  0xde   :  { %v1251_v47 = vpack.c.bf16 %v1247_v30, %v801_v63 }
  0xe2   :  { %3939 = vmatmul.mubr.msk.bf16.gmra.mrb[12].mxu0 %vm177_vm2, %v1113_v22 }
  0xe3   :  { %3944 = vmatprep.mubr.msk.bf16.mxu0 %vm177_vm2, %v5998_v39 }
  0xea   :  { %3945 = vmatmul.mubr.msk.bf16.vlgmr.msra.gmra.mrb[0].mxu0 %vm177_vm2, %v5999_v29 }
  0xeb   :  { %3961 = vmatpush3.bf16.msra.mxu0 %v1395_v19  ;;  %3948 = vmatprep.mubr.msk.bf16.mxu0 %vm177_vm2, %v6000_v24 }
  0xf2   :  { %3949 = vmatmul.mubr.msk.bf16.gmra.mrb[4].mxu0 %vm177_vm2, %v1250_v14 }
  0xf3   :  { %3952 = vmatprep.mubr.msk.bf16.mxu0 %vm177_vm2, %v6001_v3 }
  0xfa   :  { %3953 = vmatmul.mubr.msk.bf16.gmra.mrb[8].mxu0 %vm177_vm2, %v6002_v17 }
  0xfb   :  { %3956 = vmatprep.mubr.msk.bf16.mxu0 %vm177_vm2, %v6003_v38 }
 0x102   :  { %3957 = vmatmul.mubr.msk.bf16.gmra.mrb[12].mxu0 %vm177_vm2, %v1251_v47 }
 0x103   :  { %3962 = vmatprep.mubr.msk.bf16.mxu0 %vm177_vm2, %v4638_v56  ;;  %v1381_v56 = vsel %vm427_vm3, %v1379_v9, %v1380_v13 }
 0x10a   :  { %3963 = vmatmul.mubr.msk.bf16.vlgmr.msra.gmra.mrb[0].mxu0 %vm177_vm2, %v4946_v1  ;;  %v1385_v1 = vpack.c.bf16 %v1381_v56, %v959_v37 }
 0x10b   :  { %3966 = vmatprep.mubr.msk.bf16.mxu0 %vm177_vm2, %v4800_v44  ;;  %v4442_v44 = vmov 0.0  }
 0x10c   :  { %1597 = vst.msk [vmem:[#allocation2 + $0x30] sm:$0xff] %vm1589_vm4, %v4442_v44  ;;  %1590 = vst.msk [vmem:[#allocation2] sm:$0xff] %vm1589_vm4, %v4442_v44 }
 0x10d   :  { %1598 = vst.msk [vmem:[#allocation2 + $0x38] sm:$0x3] %vm1591_vm5, %v4442_v44  ;;  %1592 = vst.msk [vmem:[#allocation2 + $0x8] sm:$0x3] %vm1591_vm5, %v4442_v44 }
 0x10e   :  { %1593 = vst.msk [vmem:[#allocation2 + $0x10] sm:$0xff] %vm1589_vm4, %v4442_v44  ;;  %1595 = vst.msk [vmem:[#allocation2 + $0x20] sm:$0xff] %vm1589_vm4, %v4442_v44 }
 0x10f   :  { %1594 = vst.msk [vmem:[#allocation2 + $0x18] sm:$0x3] %vm1591_vm5, %v4442_v44  ;;  %1596 = vst.msk [vmem:[#allocation2 + $0x28] sm:$0x3] %vm1591_vm5, %v4442_v44 }
 0x110   :  { %1599 = vst.msk [vmem:[#allocation2 + $0x40] sm:$0xff] %vm1589_vm4, %v4442_v44  ;;  %1601 = vst.msk [vmem:[#allocation2 + $0x50] sm:$0xff] %vm1589_vm4, %v4442_v44 }
 0x111   :  { %1600 = vst.msk [vmem:[#allocation2 + $0x48] sm:$0x3] %vm1591_vm5, %v4442_v44  ;;  %1602 = vst.msk [vmem:[#allocation2 + $0x58] sm:$0x3] %vm1591_vm5, %v4442_v44 }
 0x112   :  { %3967 = vmatmul.mubr.msk.bf16.gmra.mrb[4].mxu0 %vm177_vm2, %v1384_v6  ;;  %1603 = vst.msk [vmem:[#allocation2 + $0x60] sm:$0xff] %vm1589_vm4, %v4442_v44  ;;  %1605 = vst.msk [vmem:[#allocation2 + $0x70] sm:$0xff] %vm1589_vm4, %v4442_v44 }
 0x113   :  { %3970 = vmatprep.mubr.msk.bf16.mxu0 %vm177_vm2, %v4828_v20  ;;  %1604 = vst.msk [vmem:[#allocation2 + $0x68] sm:$0x3] %vm1591_vm5, %v4442_v44  ;;  %1606 = vst.msk [vmem:[#allocation2 + $0x78] sm:$0x3] %vm1591_vm5, %v4442_v44  ;;  %v4424_v20 = vld [vmem:[%s5962_s3 + $0x10] sm:$0xff]   ;;  %v5223_v5 = vld [vmem:[#allocation2] sm:$0xff] }
 0x114   :  { %1607 = vst.msk [vmem:[#allocation2 + $0x80] sm:$0xff] %vm1589_vm4, %v4442_v44  ;;  %1609 = vst.msk [vmem:[#allocation2 + $0x90] sm:$0xff] %vm1589_vm4, %v4442_v44  ;;  %3978 = vmatprep.subr.bf16.mxu1 %v4424_v20  ;;  %v5225_v22 = vld [vmem:[#allocation2 + $0x8] sm:$0x3]  ;;  %v1732_v14 = vrot.slane %v5223_v5, 1 }
 0x115   :  { %1608 = vst.msk [vmem:[#allocation2 + $0x88] sm:$0x3] %vm1591_vm5, %v4442_v44  ;;  %1610 = vst.msk [vmem:[#allocation2 + $0x98] sm:$0x3] %vm1591_vm5, %v4442_v44  ;;  %3979 = vmatpush3.bf16.msra.mxu1 %v4424_v20  ;;  %v1733_v3 = vrot.slane %v5225_v22, 1 }
 0x116   :  { %1611 = vst.msk [vmem:[#allocation2 + $0xa0] sm:$0xff] %vm1589_vm4, %v4442_v44  ;;  %1613 = vst.msk [vmem:[#allocation2 + $0xb0] sm:$0xff] %vm1589_vm4, %v4442_v44 }
 0x117   :  { %1612 = vst.msk [vmem:[#allocation2 + $0xa8] sm:$0x3] %vm1591_vm5, %v4442_v44  ;;  %1614 = vst.msk [vmem:[#allocation2 + $0xb8] sm:$0x3] %vm1591_vm5, %v4442_v44 }
 0x118   :  { %1615 = vst.msk [vmem:[#allocation2 + $0xc0] sm:$0xff] %vm1589_vm4, %v4442_v44  ;;  %1617 = vst.msk [vmem:[#allocation2 + $0xd0] sm:$0xff] %vm1589_vm4, %v4442_v44 }
 0x119   :  { %1616 = vst.msk [vmem:[#allocation2 + $0xc8] sm:$0x3] %vm1591_vm5, %v4442_v44  ;;  %1618 = vst.msk [vmem:[#allocation2 + $0xd8] sm:$0x3] %vm1591_vm5, %v4442_v44 }
 0x11a   :  { %3971 = vmatmul.mubr.msk.bf16.gmra.mrb[8].mxu0 %vm177_vm2, %v4847_v21  ;;  %1619 = vst.msk [vmem:[#allocation2 + $0xe0] sm:$0xff] %vm1589_vm4, %v4442_v44  ;;  %1621 = vst.msk [vmem:[#allocation2 + $0xf0] sm:$0xff] %vm1589_vm4, %v4442_v44  ;;  %v4425_v21 = vld [vmem:[%s5962_s3 + $0x18] sm:$0xff]  }
 0x11b   :  { %3974 = vmatprep.mubr.msk.bf16.mxu0 %vm177_vm2, %v4864_v61  ;;  %1620 = vst.msk [vmem:[#allocation2 + $0xe8] sm:$0x3] %vm1591_vm5, %v4442_v44  ;;  %1622 = vst.msk [vmem:[#allocation2 + $0xf8] sm:$0x3] %vm1591_vm5, %v4442_v44  ;;  %3980 = vmatprep.subr.bf16.mxu1 %v4425_v21  ;;  %v5185_v61 = vld [vmem:[%s5962_s3] sm:$0xff]  }
 0x11c   :  { %1623 = vst.msk [vmem:[#allocation2 + $0x100] sm:$0xff] %vm1589_vm4, %v4442_v44  ;;  %1625 = vst.msk [vmem:[#allocation2 + $0x110] sm:$0xff] %vm1589_vm4, %v4442_v44  ;;  %3981 = vmatpush3.bf16.msra.mxu1 %v4425_v21 }
 0x11d   :  { %1624 = vst.msk [vmem:[#allocation2 + $0x108] sm:$0x3] %vm1591_vm5, %v4442_v44  ;;  %1626 = vst.msk [vmem:[#allocation2 + $0x118] sm:$0x3] %vm1591_vm5, %v4442_v44  ;;  %3998 = vmatprep.subr.bf16.mxu1 %v5185_v61  ;;  %v5228_v28 = vld [vmem:[#allocation2 + $0xa0] sm:$0xff] }
 0x11e   :  { %1627 = vst.msk [vmem:[#allocation2 + $0x120] sm:$0xff] %vm1589_vm4, %v4442_v44  ;;  %1629 = vst.msk [vmem:[#allocation2 + $0x130] sm:$0xff] %vm1589_vm4, %v4442_v44  ;;  %v5231_v29 = vld [vmem:[#allocation2 + $0xa8] sm:$0x3]  ;;  %v1756_v30 = vrot.slane %v5228_v28, 1 }
 0x11f   :  { %1628 = vst.msk [vmem:[#allocation2 + $0x128] sm:$0x3] %vm1591_vm5, %v4442_v44  ;;  %1630 = vst.msk [vmem:[#allocation2 + $0x138] sm:$0x3] %vm1591_vm5, %v4442_v44  ;;  %v1757_v13 = vrot.slane %v5231_v29, 1 }
 0x122   :  { %3975 = vmatmul.mubr.msk.bf16.gmra.mrb[12].mxu0 %vm177_vm2, %v1385_v1 }
 0x1dd   :  { %v3964_v41 = vpop.f32.mrb[0].mxu0 }
 0x1de   :  { %v1517_v40 = vadd.f32 %v3964_v41, %v5191_v12  ;;  %v1431_v48 = vpop.f32.mrb[1].mxu0 }
 0x1df   :  { %v1515_v54 = vadd.f32 %v5191_v12, %v1431_v48  ;;  %v3965_v51 = vpop.f32.mrb[2].mxu0 }
 0x1e0   :  { %v1533_v23 = vmax.f32 %v1517_v40, 0.0  ;;  %v1518_v26 = vadd.f32 %v3965_v51, %v5191_v12  ;;  %v1434_v7 = vpop.f32.mrb[3].mxu0 }
 0x1e1   :  { %v1531_v27 = vmax.f32 %v1515_v54, 0.0  ;;  %v1516_v31 = vadd.f32 %v5191_v12, %v1434_v7  ;;  %v1734_v7 = vsel %vm102_vm1, %v1732_v14, %v1733_v3 }
 0x1e2   :  { %v1554_v57 = vmul.f32 %v5197_v8, %v1533_v23  ;;  %v1534_v63 = vmax.f32 %v1518_v26, 0.0 }
 0x1e3   :  { %v1552_v10 = vmul.f32 %v5197_v8, %v1531_v27  ;;  %v1532_v25 = vmax.f32 %v1516_v31, 0.0 }
 0x1e4   :  { %v1575_v58 = vadd.f32 %v5204_v2, %v1554_v57  ;;  %v1555_v32 = vmul.f32 %v5197_v8, %v1534_v63 }
 0x1e5   :  { %v1573_v59 = vadd.f32 %v5204_v2, %v1552_v10  ;;  %v1553_v0 = vmul.f32 %v5197_v8, %v1532_v25  ;;  %v3968_v49 = vpop.f32.mrb[4].mxu0 }
 0x1e6   :  { %1634 = vst.msk [vmem:[#allocation2 + $0x31] sm:$0xff] %vm1589_vm4, %v1575_v58  ;;  %v1576_v11 = vadd.f32 %v5204_v2, %v1555_v32  ;;  %v1521_v33 = vadd.f32 %v3968_v49, %v5191_v12  ;;  %v1447_v43 = vpop.f32.mrb[5].mxu0 }
 0x1e7   :  { %1632 = vst.msk [vmem:[#allocation2 + $0x11] sm:$0xff] %vm1589_vm4, %v1573_v59  ;;  %v1574_v50 = vadd.f32 %v5204_v2, %v1553_v0  ;;  %v1519_v37 = vadd.f32 %v5191_v12, %v1447_v43  ;;  %v3969_v35 = vpop.f32.mrb[6].mxu0 }
 0x1e8   :  { %1635 = vst.msk [vmem:[#allocation2 + $0x41] sm:$0xff] %vm1589_vm4, %v1576_v11  ;;  %v1537_v18 = vmax.f32 %v1521_v33, 0.0  ;;  %v1522_v42 = vadd.f32 %v3969_v35, %v5191_v12  ;;  %v1450_v15 = vpop.f32.mrb[7].mxu0 }
 0x1e9   :  { %1633 = vst.msk [vmem:[#allocation2 + $0x21] sm:$0xff] %vm1589_vm4, %v1574_v50  ;;  %v1535_v62 = vmax.f32 %v1519_v37, 0.0  ;;  %v1520_v55 = vadd.f32 %v5191_v12, %v1450_v15 }
 0x1ea   :  { %v1558_v39 = vmul.f32 %v5197_v8, %v1537_v18  ;;  %v1538_v52 = vmax.f32 %v1522_v42, 0.0 }
 0x1eb   :  { %v1556_v45 = vmul.f32 %v5197_v8, %v1535_v62  ;;  %v1536_v19 = vmax.f32 %v1520_v55, 0.0 }
 0x1ec   :  { %v1579_v24 = vadd.f32 %v5204_v2, %v1558_v39  ;;  %v1559_v36 = vmul.f32 %v5197_v8, %v1538_v52  ;;  %v4427_v39 = vld [vmem:[%s5962_s3 + $0x8] sm:$0xff]  }
 0x1ed   :  { %v1577_v34 = vadd.f32 %v5204_v2, %v1556_v45  ;;  %v1557_v16 = vmul.f32 %v5197_v8, %v1536_v19  ;;  %v3972_v60 = vpop.f32.mrb[8].mxu0  ;;  %v5239_v17 = vld [vmem:[#allocation2 + $0x30] sm:$0xff]  ;;  %v5241_v38 = vld [vmem:[#allocation2 + $0x38] sm:$0x3] }
 0x1ee   :  { %1638 = vst.msk [vmem:[#allocation2 + $0x71] sm:$0xff] %vm1589_vm4, %v1579_v24  ;;  %v1580_v47 = vadd.f32 %v5204_v2, %v1559_v36  ;;  %v1525_v46 = vadd.f32 %v3972_v60, %v5191_v12  ;;  %v1463_v53 = vpop.f32.mrb[9].mxu0  ;;  %v5247_v4 = vld [vmem:[#allocation2 + $0x10] sm:$0xff]  ;;  %v5249_v6 = vld [vmem:[#allocation2 + $0x18] sm:$0x3]  ;;  %v1741_v9 = vrot.slane %v5239_v17, 1 }
 0x1ef   :  { %1636 = vst.msk [vmem:[#allocation2 + $0x51] sm:$0xff] %vm1589_vm4, %v1577_v34  ;;  %v1578_v56 = vadd.f32 %v5204_v2, %v1557_v16  ;;  %v1523_v1 = vadd.f32 %v5191_v12, %v1463_v53  ;;  %v3973_v44 = vpop.f32.mrb[10].mxu0  ;;  %v5256_v20 = vld [vmem:[#allocation2 + $0x40] sm:$0xff]  ;;  %v5258_v21 = vld [vmem:[#allocation2 + $0x48] sm:$0x3]  ;;  %v1735_v41 = vrot.slane %v5247_v4, 1 }
 0x1f0   :  { %v1736_v40 = vrot.slane %v5249_v6, 1  ;;  %1639 = vst.msk [vmem:[#allocation2 + $0x81] sm:$0xff] %vm1589_vm4, %v1580_v47  ;;  %v1541_v48 = vmax.f32 %v1525_v46, 0.0  ;;  %v1526_v54 = vadd.f32 %v3973_v44, %v5191_v12  ;;  %v1466_v51 = vpop.f32.mrb[11].mxu0  ;;  %v5264_v23 = vld [vmem:[#allocation2 + $0x20] sm:$0xff]  ;;  %v1742_v27 = vrot.slane %v5241_v38, 1 }
 0x1f1   :  { %v1653_v26 = vld [vmem:[#allocation2 + $0x28] sm:$0x3]  ;;  %1637 = vst.msk [vmem:[#allocation2 + $0x61] sm:$0xff] %vm1589_vm4, %v1578_v56  ;;  %v1539_v31 = vmax.f32 %v1523_v1, 0.0  ;;  %v1524_v57 = vadd.f32 %v5191_v12, %v1466_v51  ;;  %v1744_v10 = vrot.slane %v5256_v20, 1  ;;  %v1738_v32 = vrot.slane %v5264_v23, 1 }
 0x1f2   :  { %v5271_v63 = vsel %vm102_vm1, %v1735_v41, %v1736_v40  ;;  %v1562_v25 = vmul.f32 %v5197_v8, %v1541_v48  ;;  %v1542_v58 = vmax.f32 %v1526_v54, 0.0  ;;  %v1739_v59 = vrot.slane %v1653_v26, 1 }
 0x1f3   :  { %v1560_v0 = vmul.f32 %v5197_v8, %v1539_v31  ;;  %v1540_v49 = vmax.f32 %v1524_v57, 0.0  ;;  %v1745_v11 = vrot.slane %v5258_v21, 1  ;;  %v1796_v33 = vpack.c.bf16 %v5271_v63, %v1734_v7 }
 0x1f4   :  { %v1583_v43 = vadd.f32 %v5204_v2, %v1562_v25  ;;  %v1563_v50 = vmul.f32 %v5197_v8, %v1542_v58  ;;  %v5282_v37 = vsel %vm102_vm1, %v1738_v32, %v1739_v59  ;;  %v5285_v35 = vsel %vm102_vm1, %v1741_v9, %v1742_v27 }
 0x1f5   :  { %v1581_v18 = vadd.f32 %v5204_v2, %v1560_v0  ;;  %v1561_v42 = vmul.f32 %v5197_v8, %v1540_v49  ;;  %v5290_v15 = vsel %vm102_vm1, %v1744_v10, %v1745_v11  ;;  %v5294_v62 = vpack.c.bf16 %v5285_v35, %v5282_v37  ;;  %3982 = vmatprep.mubr.msk.bf16.mxu1 %vm1589_vm4, %v1796_v33  ;;  %v3976_v55 = vpop.f32.mrb[12].mxu0  ;;  %v5345_v57 = vld [vmem:[#allocation2 + $0x70] sm:$0xff] }
 0x1f6   :  { %1642 = vst.msk [vmem:[#allocation2 + $0xd1] sm:$0xff] %vm1589_vm4, %v1583_v43  ;;  %v1584_v52 = vadd.f32 %v5204_v2, %v1563_v50  ;;  %v2081_v45 = vrot.slane %v5264_v23, 2  ;;  %v2082_v19 = vrot.slane %v1653_v26, 2  ;;  %v2084_v24 = vrot.slane %v5239_v17, 2  ;;  %v1479_v36 = vpop.f32.mrb[13].mxu0  ;;  %v5304_v14 = vld [vmem:[#allocation2 + $0x50] sm:$0xff] }
 0x1f7   :  { %6004 = vst [vmem:[#allocation9_spill] sm:$0xff] %v5294_v62  ;;  %1640 = vst.msk [vmem:[#allocation2 + $0xb1] sm:$0xff] %vm1589_vm4, %v1581_v18  ;;  %v1582_v3 = vadd.f32 %v5204_v2, %v1561_v42  ;;  %v2085_v34 = vrot.slane %v5241_v38, 2  ;;  %3983 = vmatmul.mubr.msk.bf16.vlgmr.msra.gmra.mrb[0].mxu1 %vm1589_vm4, %v5294_v62  ;;  %v3977_v47 = vpop.f32.mrb[14].mxu0  ;;  %v5315_v46 = vld [vmem:[#allocation2 + $0x58] sm:$0x3]  ;;  %v1529_v9 = vadd.f32 %v3976_v55, %v5191_v12 }
 0x1f8   :  { %1643 = vst.msk [vmem:[#allocation2 + $0xe1] sm:$0xff] %vm1589_vm4, %v1584_v52  ;;  %v5319_v53 = vsel %vm427_vm3, %v2081_v45, %v2082_v19  ;;  %v1527_v38 = vadd.f32 %v5191_v12, %v1479_v36  ;;  %3999 = vmatpush3.bf16.msra.mxu1 %v5185_v61  ;;  %v1530_v56 = vadd.f32 %v3977_v47, %v5191_v12  ;;  %v1482_v1 = vpop.f32.mrb[15].mxu0  ;;  %v5325_v44 = vld [vmem:[#allocation2 + $0x60] sm:$0xff]  ;;  %v5327_v41 = vld [vmem:[#allocation2 + $0x68] sm:$0x3]  ;;  %v1747_v54 = vrot.slane %v5304_v14, 1 }
 0x1f9   :  { %1641 = vst.msk [vmem:[#allocation2 + $0xc1] sm:$0xff] %vm1589_vm4, %v1582_v3  ;;  %v5331_v40 = vsel %vm427_vm3, %v2084_v24, %v2085_v34  ;;  %v1528_v48 = vadd.f32 %v5191_v12, %v1482_v1  ;;  %v1748_v51 = vrot.slane %v5315_v46, 1  ;;  %4000 = vmatprep.subr.bf16.mxu1 %v4427_v39  ;;  %v5339_v61 = vld [vmem:[%s5962_s3 + $0x20] sm:$0xff]   ;;  %v1545_v7 = vmax.f32 %v1529_v9, 0.0  ;;  %v5347_v12 = vld [vmem:[#allocation2 + $0x78] sm:$0x3] }
 0x1fa   :  { %v5343_v26 = vpack.c.bf16 %v5331_v40, %v5319_v53  ;;  %v1543_v27 = vmax.f32 %v1527_v38, 0.0  ;;  %v1546_v31 = vmax.f32 %v1530_v56, 0.0  ;;  %v1750_v58 = vrot.slane %v5325_v44, 1 }
 0x1fb   :  { %v1544_v10 = vmax.f32 %v1528_v48, 0.0  ;;  %v5350_v25 = vsel %vm102_vm1, %v1747_v54, %v1748_v51  ;;  %v1751_v32 = vrot.slane %v5327_v41, 1  ;;  %v1566_v59 = vmul.f32 %v5197_v8, %v1545_v7 }
 0x1fc   :  { %v1564_v0 = vmul.f32 %v5197_v8, %v1543_v27  ;;  %v1567_v49 = vmul.f32 %v5197_v8, %v1546_v31  ;;  %v5359_v11 = vpack.c.bf16 %v5350_v25, %v5290_v15  ;;  %4001 = vmatpush3.bf16.msra.mxu1 %v4427_v39  ;;  %v1753_v50 = vrot.slane %v5345_v57, 1 }
 0x1fd   :  { %v1565_v33 = vmul.f32 %v5197_v8, %v1544_v10  ;;  %v5363_v43 = vsel %vm102_vm1, %v1750_v58, %v1751_v32  ;;  %v1754_v18 = vrot.slane %v5347_v12, 1  ;;  %v5367_v42 = vld [vmem:[#allocation2 + $0xd0] sm:$0xff]  ;;  %4018 = vmatprep.subr.bf16.mxu1 %v5339_v61  ;;  %v1587_v55 = vadd.f32 %v5204_v2, %v1566_v59  ;;  %v5384_v24 = vld [vmem:[#allocation2 + $0xd8] sm:$0x3] }
 0x1fe   :  { %6005 = vst [vmem:[#allocation10_spill] sm:$0xff] %v5359_v11  ;;  %v1585_v52 = vadd.f32 %v5204_v2, %v1564_v0  ;;  %v1588_v45 = vadd.f32 %v5204_v2, %v1567_v49  ;;  %3986 = vmatprep.mubr.msk.bf16.mxu1 %vm1589_vm4, %v5359_v11  ;;  %v5375_v8 = vld [vmem:[#allocation2 + $0xb0] sm:$0xff]  ;;  %v5377_v39 = vld [vmem:[#allocation2 + $0xb8] sm:$0x3]  ;;  %v1758_v19 = vsel %vm102_vm1, %v1756_v30, %v1757_v13  ;;  %v1765_v9 = vrot.slane %v5367_v42, 1 }
 0x1ff   :  { %v1586_v36 = vadd.f32 %v5204_v2, %v1565_v33  ;;  %v5388_v3 = vsel %vm102_vm1, %v1753_v50, %v1754_v18  ;;  %v1759_v34 = vrot.slane %v5375_v8, 1  ;;  %v1760_v47 = vrot.slane %v5377_v39, 1  ;;  %1646 = vst.msk [vmem:[#allocation2 + $0x111] sm:$0xff] %vm1589_vm4, %v1587_v55  ;;  %v5408_v54 = vld [vmem:[#allocation2 + $0xe0] sm:$0xff]  ;;  %v5413_v7 = vld [vmem:[#allocation2 + $0xe8] sm:$0x3] }
 0x200   :  { %1644 = vst.msk [vmem:[#allocation2 + $0xf1] sm:$0xff] %vm1589_vm4, %v1585_v52  ;;  %1647 = vst.msk [vmem:[#allocation2 + $0x121] sm:$0xff] %vm1589_vm4, %v1588_v45  ;;  %v5397_v30 = vpack.c.bf16 %v5388_v3, %v5363_v43  ;;  %v5399_v13 = vld [vmem:[#allocation2 + $0xc0] sm:$0xff]  ;;  %v1673_v2 = vld [vmem:[#allocation2 + $0xc8] sm:$0x3]  ;;  %v1766_v48 = vrot.slane %v5384_v24, 1 }
 0x201   :  { %1645 = vst.msk [vmem:[#allocation2 + $0x101] sm:$0xff] %vm1589_vm4, %v1586_v36  ;;  %v5404_v38 = vsel %vm102_vm1, %v1759_v34, %v1760_v47  ;;  %v1762_v56 = vrot.slane %v5399_v13, 1  ;;  %v1763_v1 = vrot.slane %v1673_v2, 1  ;;  %v1768_v31 = vrot.slane %v5408_v54, 1 }
 0x202   :  { %6006 = vst [vmem:[#allocation3_spill] sm:$0xff] %v5397_v30  ;;  %3987 = vmatmul.mubr.msk.bf16.gmra.mrb[4].mxu1 %vm1589_vm4, %v5397_v30  ;;  %v1800_v51 = vpack.c.bf16 %v5404_v38, %v1758_v19  ;;  %v2087_v10 = vrot.slane %v5256_v20, 2  ;;  %v2088_v58 = vrot.slane %v5258_v21, 2  ;;  %v5423_v32 = vsel %vm102_vm1, %v1765_v9, %v1766_v48 }
 0x203   :  { %v5416_v27 = vsel %vm102_vm1, %v1762_v56, %v1763_v1  ;;  %v1769_v59 = vrot.slane %v5413_v7, 1  ;;  %v2093_v0 = vrot.slane %v5325_v44, 2  ;;  %v2094_v49 = vrot.slane %v5327_v41, 2 }
 0x204   :  { %3990 = vmatprep.mubr.msk.bf16.mxu1 %vm1589_vm4, %v1800_v51  ;;  %v5430_v33 = vpack.c.bf16 %v5423_v32, %v5416_v27  ;;  %v5433_v50 = vsel %vm427_vm3, %v2087_v10, %v2088_v58  ;;  %v2096_v18 = vrot.slane %v5345_v57, 2  ;;  %v2097_v21 = vrot.slane %v5347_v12, 2 }
 0x205   :  { %v5446_v19 = vsel %vm427_vm3, %v2093_v0, %v2094_v49  ;;  %v5457_v51 = vsel %vm102_vm1, %v1768_v31, %v1769_v59  ;;  %v2079_v49 = vrot.slane %v5249_v6, 2  ;;  %v1688_v59 = vpack.c.bf16 %v5247_v4, %v5223_v5 }
 0x206   :  { %6007 = vst [vmem:[#allocation4_spill] sm:$0xff] %v5430_v33  ;;  %v5441_v45 = vld [vmem:[#allocation2 + $0x110] sm:$0xff]  ;;  %v1683_v12 = vld [vmem:[#allocation2 + $0x118] sm:$0x3]  ;;  %v5463_v0 = vsel %vm427_vm3, %v2096_v18, %v2097_v21  ;;  %v2106_v18 = vrot.slane %v1673_v2, 2  ;;  %v2108_v21 = vrot.slane %v5367_v42, 2 }
 0x207   :  { %v5437_v55 = vld [vmem:[#allocation2 + $0xf0] sm:$0xff]  ;;  %v5439_v52 = vld [vmem:[#allocation2 + $0xf8] sm:$0x3]  ;;  %v1777_v48 = vrot.slane %v5441_v45, 1  ;;  %v1778_v58 = vrot.slane %v1683_v12, 1  ;;  %6008 = vst [vmem:[#allocation5_spill] sm:$0xff] %v5463_v0  ;;  %v5475_v31 = vpack.c.bf16 %v5463_v0, %v5446_v19 }
 0x208   :  { %v1771_v36 = vrot.slane %v5437_v55, 1  ;;  %v1772_v34 = vrot.slane %v5439_v52, 1  ;;  %v5450_v47 = vld [vmem:[#allocation2 + $0x100] sm:$0xff]  ;;  %v1681_v9 = vld [vmem:[#allocation2 + $0x108] sm:$0x3]  ;;  %v2091_v2 = vrot.slane %v5315_v46, 2 }
 0x209   :  { %v1774_v56 = vrot.slane %v5450_v47, 1  ;;  %v1775_v1 = vrot.slane %v1681_v9, 1  ;;  %v5484_v6 = vsel %vm102_vm1, %v1777_v48, %v1778_v58  ;;  %v2103_v48 = vrot.slane %v5377_v39, 2 }
 0x20a   :  { %3991 = vmatmul.mubr.msk.bf16.gmra.mrb[8].mxu1 %vm1589_vm4, %v5430_v33  ;;  %v5460_v10 = vsel %vm102_vm1, %v1771_v36, %v1772_v34  ;;  %v2105_v36 = vrot.slane %v5399_v13, 2  ;;  %v2078_v34 = vrot.slane %v5247_v4, 2  ;;  %v2102_v33 = vrot.slane %v5375_v8, 2 }
 0x20b   :  { %v5468_v41 = vpack.c.bf16 %v5460_v10, %v5457_v51  ;;  %v5471_v60 = vsel %vm102_vm1, %v1774_v56, %v1775_v1  ;;  %v2090_v56 = vrot.slane %v5304_v14, 2  ;;  %v2109_v1 = vrot.slane %v5384_v24, 2 }
 0x20c   :  { %v5491_v16 = vpack.c.bf16 %v5484_v6, %v5471_v60  ;;  %v5496_v30 = vsel %vm427_vm3, %v2105_v36, %v2106_v18  ;;  %v2118_v11 = vrot.slane %v1681_v9, 2  ;;  %v2111_v62 = vrot.slane %v5408_v54, 2 }
 0x20d   :  { %6009 = vst [vmem:[#allocation6_spill] sm:$0xff] %v5468_v41  ;;  %3994 = vmatprep.mubr.msk.bf16.mxu1 %vm1589_vm4, %v5468_v41  ;;  %v5500_v58 = vsel %vm427_vm3, %v2108_v21, %v2109_v1  ;;  %v2117_v41 = vrot.slane %v5450_v47, 2  ;;  %v2120_v46 = vrot.slane %v5441_v45, 2  ;;  %v2121_v0 = vrot.slane %v1683_v12, 2 }
 0x20e   :  { %v5505_v24 = vpack.c.bf16 %v5500_v58, %v5496_v30  ;;  %v2112_v36 = vrot.slane %v5413_v7, 2  ;;  %v2301_v39 = vpack.c.bf16 %v5264_v23, %v5247_v4  ;;  %v2114_v21 = vrot.slane %v5437_v55, 2  ;;  %v4434_v4 = vld [vmem:[%s5962_s3 + $0x50] sm:$0xff]  }
 0x20f   :  { %v5511_v18 = vsel %vm427_vm3, %v2117_v41, %v2118_v11  ;;  %v2115_v1 = vrot.slane %v5439_v52, 2  ;;  %v5522_v12 = vsel %vm427_vm3, %v2120_v46, %v2121_v0  ;;  %v5538_v0 = vsel %vm427_vm3, %v2078_v34, %v2079_v49 }
 0x210   :  { %v5529_v7 = vpack.c.bf16 %v5522_v12, %v5511_v18  ;;  %v5541_v46 = vsel %vm427_vm3, %v2090_v56, %v2091_v2  ;;  %v5546_v11 = vsel %vm427_vm3, %v2111_v62, %v2112_v36  ;;  %v5555_v49 = vsel %vm427_vm3, %v2102_v33, %v2103_v48  ;;  %v4429_v33 = vld [vmem:[%s5962_s3 + $0x28] sm:$0xff]  }
 0x211   :  { %v5562_v62 = vsel %vm427_vm3, %v2114_v21, %v2115_v1  ;;  %v5568_v36 = vpack.c.bf16 %v5239_v17, %v5264_v23  ;;  %v5579_v21 = vpack.c.bf16 %v5304_v14, %v5256_v20  ;;  %v4430_v1 = vld [vmem:[%s5962_s3 + $0x30] sm:$0xff]   ;;  %v5591_v56 = vpack.c.bf16 %v5345_v57, %v5325_v44  ;;  %v5670_v23 = vld [vmem:[#allocation2 + $0x80] sm:$0xff] }
 0x212   :  { %3995 = vmatmul.mubr.msk.bf16.gmra.mrb[12].mxu1 %vm1589_vm4, %v5491_v16  ;;  %v1692_v48 = vpack.c.bf16 %v5375_v8, %v5228_v28  ;;  %v2075_v2 = vrot.slane %v5223_v5, 2  ;;  %v2076_v34 = vrot.slane %v5225_v22, 2  ;;  %v5615_v52 = vpack.c.bf16 %v5441_v45, %v5450_v47  ;;  %v4431_v5 = vld [vmem:[%s5962_s3 + $0x38] sm:$0xff]  }
 0x213   :  { %4002 = vmatprep.mubr.msk.bf16.mxu1 %vm1589_vm4, %v1688_v59  ;;  %v2477_v59 = vpack.c.bf16 %v5363_v43, %v5350_v25  ;;  %v5626_v22 = vpack.c.bf16 %v5541_v46, %v5433_v50  ;;  %v1685_v25 = vld [vmem:[#allocation2 + $0x128] sm:$0x3] }
 0x21a   :  { %4003 = vmatmul.mubr.msk.bf16.vlgmr.msra.gmra.mrb[0].mxu1 %vm1589_vm4, %v5568_v36 }
 0x21b   :  { %4019 = vmatpush3.bf16.msra.mxu1 %v5339_v61  ;;  %4006 = vmatprep.mubr.msk.bf16.mxu1 %vm1589_vm4, %v5579_v21  ;;  %v5600_v61 = vpack.c.bf16 %v5367_v42, %v5399_v13 }
 0x21c   :  { %4020 = vmatprep.subr.bf16.mxu1 %v4429_v33 }
 0x21f   :  { %4021 = vmatpush3.bf16.msra.mxu1 %v4429_v33  ;;  %v5604_v33 = vpack.c.bf16 %v5437_v55, %v5408_v54 }
 0x220   :  { %4038 = vmatprep.subr.bf16.mxu1 %v4430_v1 }
 0x222   :  { %4007 = vmatmul.mubr.msk.bf16.gmra.mrb[4].mxu1 %vm1589_vm4, %v5591_v56 }
 0x223   :  { %4010 = vmatprep.mubr.msk.bf16.mxu1 %vm1589_vm4, %v1692_v48  ;;  %v2077_v48 = vsel %vm427_vm3, %v2075_v2, %v2076_v34  ;;  %v2099_v34 = vrot.slane %v5228_v28, 2  ;;  %v2100_v2 = vrot.slane %v5231_v29, 2  ;;  %v5644_v28 = vpack.c.bf16 %v5562_v62, %v5546_v11  ;;  %v4433_v29 = vld [vmem:[%s5962_s3 + $0x48] sm:$0xff]  }
 0x224   :  { %v2139_v9 = vpack.c.bf16 %v5538_v0, %v2077_v48 }
 0x225   :  { %v2101_v48 = vsel %vm427_vm3, %v2099_v34, %v2100_v2  ;;  %v6023_v34 = vld [vmem:[#allocation5_spill] sm:$0xff] }
 0x226   :  { %v2143_v41 = vpack.c.bf16 %v5555_v49, %v2101_v48 }
 0x22a   :  { %4011 = vmatmul.mubr.msk.bf16.gmra.mrb[8].mxu1 %vm1589_vm4, %v5600_v61 }
 0x22b   :  { %4014 = vmatprep.mubr.msk.bf16.mxu1 %vm1589_vm4, %v5604_v33 }
 0x232   :  { %4015 = vmatmul.mubr.msk.bf16.gmra.mrb[12].mxu1 %vm1589_vm4, %v5615_v52 }
 0x233   :  { %4022 = vmatprep.mubr.msk.bf16.mxu1 %vm1589_vm4, %v2139_v9  ;;  %v4432_v9 = vld [vmem:[%s5962_s3 + $0x40] sm:$0xff]  }
 0x23a   :  { %4023 = vmatmul.mubr.msk.bf16.vlgmr.msra.gmra.mrb[0].mxu1 %vm1589_vm4, %v5343_v26 }
 0x23b   :  { %4039 = vmatpush3.bf16.msra.mxu1 %v4430_v1  ;;  %4026 = vmatprep.mubr.msk.bf16.mxu1 %vm1589_vm4, %v5626_v22  ;;  %v6011_v1 = vpack.c.bf16 %v5325_v44, %v5304_v14  ;;  %v6014_v14 = vpack.c.bf16 %v5450_v47, %v5437_v55  ;;  %v5687_v44 = vld [vmem:[#allocation2 + $0x120] sm:$0xff]  ;;  %v6016_v47 = vpack.c.bf16 %v5290_v15, %v5285_v35 }
 0x23c   :  { %4040 = vmatprep.subr.bf16.mxu1 %v4431_v5  ;;  %v6017_v15 = vpack.c.bf16 %v5416_v27, %v5404_v38  ;;  %v2470_v43 = vrot.slane %v5687_v44, 1  ;;  %v6020_v27 = vpack.c.bf16 %v5319_v53, %v5538_v0  ;;  %v4438_v53 = vld [vmem:[%s5962_s3 + $0x70] sm:$0xff]  }
 0x23f   :  { %4041 = vmatpush3.bf16.msra.mxu1 %v4431_v5 }
 0x240   :  { %4058 = vmatprep.subr.bf16.mxu1 %v4432_v9 }
 0x242   :  { %4027 = vmatmul.mubr.msk.bf16.gmra.mrb[4].mxu1 %vm1589_vm4, %v5475_v31 }
 0x243   :  { %4030 = vmatprep.mubr.msk.bf16.mxu1 %vm1589_vm4, %v2143_v41  ;;  %v6010_v41 = vpack.c.bf16 %v5256_v20, %v5239_v17  ;;  %v6012_v17 = vpack.c.bf16 %v5399_v13, %v5375_v8  ;;  %v6013_v20 = vpack.c.bf16 %v5408_v54, %v5367_v42  ;;  %v6015_v8 = vpack.c.bf16 %v5282_v37, %v5271_v63  ;;  %v1665_v42 = vld [vmem:[#allocation2 + $0x88] sm:$0x3]  ;;  %v4435_v13 = vld [vmem:[%s5962_s3 + $0x58] sm:$0xff]   ;;  %v4436_v63 = vld [vmem:[%s5962_s3 + $0x60] sm:$0xff]  }
 0x244   :  { %v2467_v54 = vrot.slane %v5670_v23, 1  ;;  %v2468_v55 = vrot.slane %v1665_v42, 1 }
 0x246   :  { %v5712_v37 = vsel %vm102_vm1, %v2467_v54, %v2468_v55 }
 0x247   :  { %v2478_v35 = vpack.c.bf16 %v5712_v37, %v5388_v3  ;;  %v6019_v3 = vpack.c.bf16 %v5471_v60, %v5460_v10  ;;  %v2637_v60 = vrot.slane %v5670_v23, 2  ;;  %v6021_v10 = vpack.c.bf16 %v5433_v50, %v5331_v40 }
 0x248   :  { %v6024_v40 = vpack.c.bf16 %v5496_v30, %v5555_v49  ;;  %v2640_v50 = vrot.slane %v5687_v44, 2  ;;  %v4439_v30 = vld [vmem:[%s5962_s3 + $0x78] sm:$0xff]  }
 0x24a   :  { %4031 = vmatmul.mubr.msk.bf16.gmra.mrb[8].mxu1 %vm1589_vm4, %v5505_v24 }
 0x24b   :  { %4034 = vmatprep.mubr.msk.bf16.mxu1 %vm1589_vm4, %v5644_v28 }
 0x252   :  { %4035 = vmatmul.mubr.msk.bf16.gmra.mrb[12].mxu1 %vm1589_vm4, %v5529_v7 }
 0x253   :  { %4042 = vmatprep.mubr.msk.bf16.mxu1 %vm1589_vm4, %v2301_v39  ;;  %v2304_v39 = vpack.c.bf16 %v5670_v23, %v5345_v57  ;;  %v2308_v57 = vpack.c.bf16 %v5687_v44, %v5441_v45  ;;  %v2471_v45 = vrot.slane %v1685_v25, 1 }
 0x255   :  { %v5731_v5 = vsel %vm102_vm1, %v2470_v43, %v2471_v45 }
 0x256   :  { %v2482_v38 = vpack.c.bf16 %v5731_v5, %v5484_v6  ;;  %v6022_v6 = vpack.c.bf16 %v5446_v19, %v5541_v46  ;;  %v2641_v19 = vrot.slane %v1685_v25, 2  ;;  %v6025_v46 = vpack.c.bf16 %v5546_v11, %v5500_v58  ;;  %v4440_v58 = vld [vmem:[%s5962_s3 + $0x80] sm:$0xff]   ;;  %v1686_v11 = vld [vmem:[#allocation2 + $0x130] sm:$0xff] }
 0x257   :  { %v2808_v49 = vpack.c.bf16 %v1686_v11, %v5687_v44  ;;  %v5849_v25 = vld [vmem:[%s5964_s4 + $0x2] ss:$0 sm:$0xff] }
 0x258   :  { %v2642_v48 = vsel %vm427_vm3, %v2640_v50, %v2641_v19 }
 0x25a   :  { %4043 = vmatmul.mubr.msk.bf16.vlgmr.msra.gmra.mrb[0].mxu1 %vm1589_vm4, %v6010_v41  ;;  %v6028_v41 = vld [vmem:[#allocation10_spill] sm:$0xff] }
 0x25b   :  { %4059 = vmatpush3.bf16.msra.mxu1 %v4432_v9  ;;  %4046 = vmatprep.mubr.msk.bf16.mxu1 %vm1589_vm4, %v6011_v1  ;;  %v6026_v9 = vpack.c.bf16 %v5511_v18, %v5562_v62  ;;  %v1666_v18 = vld [vmem:[#allocation2 + $0x90] sm:$0xff]  ;;  %v1667_v62 = vld [vmem:[#allocation2 + $0x98] sm:$0x3] }
 0x25c   :  { %4060 = vmatprep.subr.bf16.mxu1 %v4433_v29 }
 0x25f   :  { %4061 = vmatpush3.bf16.msra.mxu1 %v4433_v29  ;;  %v2652_v29 = vpack.c.bf16 %v2642_v48, %v5522_v12  ;;  %v2807_v12 = vpack.c.bf16 %v1666_v18, %v5670_v23  ;;  %v1687_v23 = vld [vmem:[#allocation2 + $0x138] sm:$0x3] }
 0x260   :  { %4078 = vmatprep.subr.bf16.mxu1 %v4434_v4  ;;  %v3099_v54 = vrot.slane %v1687_v23, 2 }
 0x262   :  { %4047 = vmatmul.mubr.msk.bf16.gmra.mrb[4].mxu1 %vm1589_vm4, %v2304_v39  ;;  %v2952_v39 = vrot.slane %v1686_v11, 1 }
 0x263   :  { %4050 = vmatprep.mubr.msk.bf16.mxu1 %vm1589_vm4, %v6012_v17  ;;  %v2953_v17 = vrot.slane %v1687_v23, 1 }
 0x26a   :  { %4051 = vmatmul.mubr.msk.bf16.gmra.mrb[8].mxu1 %vm1589_vm4, %v6013_v20  ;;  %v6031_v20 = vld [vmem:[#allocation6_spill] sm:$0xff] }
 0x26b   :  { %4054 = vmatprep.mubr.msk.bf16.mxu1 %vm1589_vm4, %v6014_v14  ;;  %v2954_v14 = vsel %vm102_vm1, %v2952_v39, %v2953_v17 }
 0x26c   :  { %v2958_v44 = vpack.c.bf16 %v2954_v14, %v5731_v5 }
 0x272   :  { %4055 = vmatmul.mubr.msk.bf16.gmra.mrb[12].mxu1 %vm1589_vm4, %v2308_v57  ;;  %v3095_v57 = vrot.slane %v1666_v18, 2 }
 0x273   :  { %4062 = vmatprep.mubr.msk.bf16.mxu1 %vm1589_vm4, %v6015_v8  ;;  %v3096_v8 = vrot.slane %v1667_v62, 2 }
 0x27a   :  { %4063 = vmatmul.mubr.msk.bf16.vlgmr.msra.gmra.mrb[0].mxu1 %vm1589_vm4, %v6016_v47 }
 0x27b   :  { %4079 = vmatpush3.bf16.msra.mxu1 %v4434_v4  ;;  %4066 = vmatprep.mubr.msk.bf16.mxu1 %vm1589_vm4, %v2477_v59  ;;  %v6018_v59 = vpack.c.bf16 %v5457_v51, %v5423_v32  ;;  %v4437_v32 = vld [vmem:[%s5962_s3 + $0x68] sm:$0xff]   ;;  %v2638_v51 = vrot.slane %v1665_v42, 2  ;;  %v3097_v42 = vsel %vm427_vm3, %v3095_v57, %v3096_v8 }
 0x27c   :  { %4080 = vmatprep.subr.bf16.mxu1 %v4435_v13  ;;  %v6030_v4 = vld [vmem:[#allocation4_spill] sm:$0xff] }
 0x27d   :  { %v2639_v0 = vsel %vm427_vm3, %v2637_v60, %v2638_v51 }
 0x27e   :  { %v2648_v2 = vpack.c.bf16 %v2639_v0, %v6023_v34 }
 0x27f   :  { %4081 = vmatpush3.bf16.msra.mxu1 %v4435_v13  ;;  %v3098_v13 = vrot.slane %v1686_v11, 2 }
 0x280   :  { %4098 = vmatprep.subr.bf16.mxu1 %v4436_v63 }
 0x282   :  { %4067 = vmatmul.mubr.msk.bf16.gmra.mrb[4].mxu1 %vm1589_vm4, %v2478_v35 }
 0x283   :  { %4070 = vmatprep.mubr.msk.bf16.mxu1 %vm1589_vm4, %v6017_v15 }
 0x28a   :  { %4071 = vmatmul.mubr.msk.bf16.gmra.mrb[8].mxu1 %vm1589_vm4, %v6018_v59 }
 0x28b   :  { %4074 = vmatprep.mubr.msk.bf16.mxu1 %vm1589_vm4, %v6019_v3 }
 0x292   :  { %4075 = vmatmul.mubr.msk.bf16.gmra.mrb[12].mxu1 %vm1589_vm4, %v2482_v38 }
 0x293   :  { %4082 = vmatprep.mubr.msk.bf16.mxu1 %vm1589_vm4, %v6020_v27 }
 0x29a   :  { %4083 = vmatmul.mubr.msk.bf16.vlgmr.msra.gmra.mrb[0].mxu1 %vm1589_vm4, %v6021_v10 }
 0x29b   :  { %4099 = vmatpush3.bf16.msra.mxu1 %v4436_v63  ;;  %4086 = vmatprep.mubr.msk.bf16.mxu1 %vm1589_vm4, %v6022_v6 }
 0x29c   :  { %4100 = vmatprep.subr.bf16.mxu1 %v4437_v32 }
 0x29f   :  { %4101 = vmatpush3.bf16.msra.mxu1 %v4437_v32 }
 0x2a0   :  { %4118 = vmatprep.subr.bf16.mxu1 %v4438_v53 }
 0x2a2   :  { %4087 = vmatmul.mubr.msk.bf16.gmra.mrb[4].mxu1 %vm1589_vm4, %v2648_v2 }
 0x2a3   :  { %4090 = vmatprep.mubr.msk.bf16.mxu1 %vm1589_vm4, %v6024_v40 }
 0x2aa   :  { %4091 = vmatmul.mubr.msk.bf16.gmra.mrb[8].mxu1 %vm1589_vm4, %v6025_v46 }
 0x2ab   :  { %4094 = vmatprep.mubr.msk.bf16.mxu1 %vm1589_vm4, %v6026_v9 }
 0x2b2   :  { %4095 = vmatmul.mubr.msk.bf16.gmra.mrb[12].mxu1 %vm1589_vm4, %v2652_v29 }
 0x2b3   :  { %4102 = vmatprep.mubr.msk.bf16.mxu1 %vm1589_vm4, %v5568_v36  ;;  %v4441_v36 = vld [vmem:[%s5962_s3 + $0x88] sm:$0xff]  }
 0x2ba   :  { %4103 = vmatmul.mubr.msk.bf16.vlgmr.msra.gmra.mrb[0].mxu1 %vm1589_vm4, %v5579_v21  ;;  %v2949_v21 = vrot.slane %v1666_v18, 1 }
 0x2bb   :  { %4119 = vmatpush3.bf16.msra.mxu1 %v4438_v53  ;;  %4106 = vmatprep.mubr.msk.bf16.mxu1 %vm1589_vm4, %v5591_v56  ;;  %v6027_v56 = vld [vmem:[#allocation9_spill] sm:$0xff] }
 0x2bc   :  { %4120 = vmatprep.subr.bf16.mxu1 %v4439_v30 }
 0x2bf   :  { %4121 = vmatpush3.bf16.msra.mxu1 %v4439_v30 }
 0x2c0   :  { %4138 = vmatprep.subr.bf16.mxu1 %v4440_v58 }
 0x2c2   :  { %4107 = vmatmul.mubr.msk.bf16.gmra.mrb[4].mxu1 %vm1589_vm4, %v2807_v12 }
 0x2c3   :  { %4110 = vmatprep.mubr.msk.bf16.mxu1 %vm1589_vm4, %v5600_v61  ;;  %v2950_v61 = vrot.slane %v1667_v62, 1 }
 0x2ca   :  { %4111 = vmatmul.mubr.msk.bf16.gmra.mrb[8].mxu1 %vm1589_vm4, %v5604_v33  ;;  %v2951_v33 = vsel %vm102_vm1, %v2949_v21, %v2950_v61 }
 0x2cb   :  { %4114 = vmatprep.mubr.msk.bf16.mxu1 %vm1589_vm4, %v5615_v52  ;;  %v6029_v52 = vld [vmem:[#allocation3_spill] sm:$0xff]  ;;  %v2957_v1 = vpack.c.bf16 %v2951_v33, %v5712_v37 }
 0x2d2   :  { %4115 = vmatmul.mubr.msk.bf16.gmra.mrb[12].mxu1 %vm1589_vm4, %v2808_v49 }
 0x2d3   :  { %4122 = vmatprep.mubr.msk.bf16.mxu1 %vm1589_vm4, %v6027_v56 }
 0x2da   :  { %4123 = vmatmul.mubr.msk.bf16.vlgmr.msra.gmra.mrb[0].mxu1 %vm1589_vm4, %v6028_v41 }
 0x2db   :  { %4139 = vmatpush3.bf16.msra.mxu1 %v4440_v58  ;;  %4126 = vmatprep.mubr.msk.bf16.mxu1 %vm1589_vm4, %v6029_v52 }
 0x2dc   :  { %4140 = vmatprep.subr.bf16.mxu1 %v4441_v36 }
 0x2df   :  { %4141 = vmatpush3.bf16.msra.mxu1 %v4441_v36 }
 0x2e2   :  { %4127 = vmatmul.mubr.msk.bf16.gmra.mrb[4].mxu1 %vm1589_vm4, %v2957_v1 }
 0x2e3   :  { %4130 = vmatprep.mubr.msk.bf16.mxu1 %vm1589_vm4, %v6030_v4 }
 0x2ea   :  { %4131 = vmatmul.mubr.msk.bf16.gmra.mrb[8].mxu1 %vm1589_vm4, %v6031_v20 }
 0x2eb   :  { %4134 = vmatprep.mubr.msk.bf16.mxu1 %vm1589_vm4, %v5491_v16  ;;  %v3103_v16 = vpack.c.bf16 %v3097_v42, %v2639_v0 }
 0x2f2   :  { %4135 = vmatmul.mubr.msk.bf16.gmra.mrb[12].mxu1 %vm1589_vm4, %v2958_v44 }
 0x2f3   :  { %4142 = vmatprep.mubr.msk.bf16.mxu1 %vm1589_vm4, %v5343_v26  ;;  %v3100_v26 = vsel %vm427_vm3, %v3098_v13, %v3099_v54 }
 0x2fa   :  { %4143 = vmatmul.mubr.msk.bf16.vlgmr.msra.gmra.mrb[0].mxu1 %vm1589_vm4, %v5626_v22  ;;  %v3104_v22 = vpack.c.bf16 %v3100_v26, %v2642_v48 }
 0x2fb   :  { %4146 = vmatprep.mubr.msk.bf16.mxu1 %vm1589_vm4, %v5475_v31  ;;  %v5836_v31 = vld [vmem:[%s5964_s4] ss:$0 sm:$0xff] }
 0x302   :  { %4147 = vmatmul.mubr.msk.bf16.gmra.mrb[4].mxu1 %vm1589_vm4, %v3103_v16 }
 0x303   :  { %4150 = vmatprep.mubr.msk.bf16.mxu1 %vm1589_vm4, %v5505_v24 }
 0x30a   :  { %4151 = vmatmul.mubr.msk.bf16.gmra.mrb[8].mxu1 %vm1589_vm4, %v5644_v28  ;;  %v5842_v28 = vld [vmem:[%s5964_s4 + $0x1] ss:$0 sm:$0xff] }
 0x30b   :  { %4154 = vmatprep.mubr.msk.bf16.mxu1 %vm1589_vm4, %v5529_v7 }
 0x312   :  { %4155 = vmatmul.mubr.msk.bf16.gmra.mrb[12].mxu1 %vm1589_vm4, %v3104_v22 }
 0x3cd   :  { %v4144_v55 = vpop.f32.mrb[0].mxu1 }
 0x3ce   :  { %v3248_v24 = vadd.f32 %v4144_v55, %v5836_v31  ;;  %v3162_v47 = vpop.f32.mrb[1].mxu1 }
 0x3cf   :  { %v3246_v7 = vadd.f32 %v5836_v31, %v3162_v47  ;;  %v4145_v63 = vpop.f32.mrb[2].mxu1 }
 0x3d0   :  { %v3264_v37 = vmax.f32 %v3248_v24, 0.0  ;;  %v3249_v35 = vadd.f32 %v4145_v63, %v5836_v31  ;;  %v3165_v15 = vpop.f32.mrb[3].mxu1 }
 0x3d1   :  { %v3262_v43 = vmax.f32 %v3246_v7, 0.0  ;;  %v3247_v45 = vadd.f32 %v5836_v31, %v3165_v15 }
 0x3d2   :  { %v3285_v59 = vmul.f32 %v5842_v28, %v3264_v37  ;;  %v3265_v3 = vmax.f32 %v3249_v35, 0.0 }
 0x3d3   :  { %v3283_v5 = vmul.f32 %v5842_v28, %v3262_v43  ;;  %v3263_v38 = vmax.f32 %v3247_v45, 0.0 }
 0x3d4   :  { %v3306_v27 = vadd.f32 %v5849_v25, %v3285_v59  ;;  %v3286_v32 = vmul.f32 %v5842_v28, %v3265_v3 }
 0x3d5   :  { %v3304_v60 = vadd.f32 %v5849_v25, %v3283_v5  ;;  %v3284_v51 = vmul.f32 %v5842_v28, %v3263_v38  ;;  %v4148_v10 = vpop.f32.mrb[4].mxu1 }
 0x3d6   :  { %v3631_v6 = vpack.c.bf16 %v3306_v27, %v3306_v27  ;;  %v3307_v53 = vadd.f32 %v5849_v25, %v3286_v32  ;;  %v3252_v0 = vadd.f32 %v4148_v10, %v5836_v31  ;;  %v3178_v34 = vpop.f32.mrb[5].mxu1 }
 0x3d7   :  { %v3629_v2 = vpack.c.bf16 %v3304_v60, %v3304_v60  ;;  %v3305_v40 = vadd.f32 %v5849_v25, %v3284_v51  ;;  %v3250_v50 = vadd.f32 %v5836_v31, %v3178_v34  ;;  %v4149_v19 = vpop.f32.mrb[6].mxu1 }
 0x3d8   :  { %3387 = vst.msk [vmem:[%s5965_s5 + $0x8] sm:$0xf] %vm3384_vm6, %v3631_v6  ;;  %v3632_v46 = vpack.c.bf16 %v3307_v53, %v3307_v53  ;;  %v3268_v9 = vmax.f32 %v3252_v0, 0.0  ;;  %v3253_v48 = vadd.f32 %v4149_v19, %v5836_v31  ;;  %v3181_v29 = vpop.f32.mrb[7].mxu1 }
 0x3d9   :  { %3385 = vst.msk [vmem:[%s5965_s5] sm:$0xf] %vm3384_vm6, %v3629_v2  ;;  %v3630_v30 = vpack.c.bf16 %v3305_v40, %v3305_v40  ;;  %v3266_v58 = vmax.f32 %v3250_v50, 0.0  ;;  %v3251_v18 = vadd.f32 %v5836_v31, %v3181_v29 }
 0x3da   :  { %3388 = vst.msk [vmem:[%s5965_s5 + $0xc] sm:$0xf] %vm3384_vm6, %v3632_v46  ;;  %v3289_v12 = vmul.f32 %v5842_v28, %v3268_v9  ;;  %v3269_v11 = vmax.f32 %v3253_v48, 0.0 }
 0x3db   :  { %3386 = vst.msk [vmem:[%s5965_s5 + $0x4] sm:$0xf] %vm3384_vm6, %v3630_v30  ;;  %v3287_v49 = vmul.f32 %v5842_v28, %v3266_v58  ;;  %v3267_v56 = vmax.f32 %v3251_v18, 0.0 }
 0x3dc   :  { %v3310_v62 = vadd.f32 %v5849_v25, %v3289_v12  ;;  %v3290_v36 = vmul.f32 %v5842_v28, %v3269_v11 }
 0x3dd   :  { %v3308_v21 = vadd.f32 %v5849_v25, %v3287_v49  ;;  %v3288_v61 = vmul.f32 %v5842_v28, %v3267_v56  ;;  %v4152_v41 = vpop.f32.mrb[8].mxu1 }
 0x3de   :  { %v3635_v52 = vpack.c.bf16 %v3310_v62, %v3310_v62  ;;  %v3311_v33 = vadd.f32 %v5849_v25, %v3290_v36  ;;  %v3256_v1 = vadd.f32 %v4152_v41, %v5836_v31  ;;  %v3194_v4 = vpop.f32.mrb[9].mxu1 }
 0x3df   :  { %v3633_v23 = vpack.c.bf16 %v3308_v21, %v3308_v21  ;;  %v3309_v39 = vadd.f32 %v5849_v25, %v3288_v61  ;;  %v3254_v17 = vadd.f32 %v5836_v31, %v3194_v4  ;;  %v4153_v20 = vpop.f32.mrb[10].mxu1 }
 0x3e0   :  { %3391 = vst.msk [vmem:[%s5965_s5 + $0x18] sm:$0xf] %vm3384_vm6, %v3635_v52  ;;  %v3636_v14 = vpack.c.bf16 %v3311_v33, %v3311_v33  ;;  %v3272_v44 = vmax.f32 %v3256_v1, 0.0  ;;  %v3257_v57 = vadd.f32 %v4153_v20, %v5836_v31  ;;  %v3197_v8 = vpop.f32.mrb[11].mxu1 }
 0x3e1   :  { %3389 = vst.msk [vmem:[%s5965_s5 + $0x10] sm:$0xf] %vm3384_vm6, %v3633_v23  ;;  %v3634_v42 = vpack.c.bf16 %v3309_v39, %v3309_v39  ;;  %v3270_v16 = vmax.f32 %v3254_v17, 0.0  ;;  %v3255_v13 = vadd.f32 %v5836_v31, %v3197_v8 }
 0x3e2   :  { %3392 = vst.msk [vmem:[%s5965_s5 + $0x1c] sm:$0xf] %vm3384_vm6, %v3636_v14  ;;  %v3293_v54 = vmul.f32 %v5842_v28, %v3272_v44  ;;  %v3273_v26 = vmax.f32 %v3257_v57, 0.0 }
 0x3e3   :  { %3390 = vst.msk [vmem:[%s5965_s5 + $0x14] sm:$0xf] %vm3384_vm6, %v3634_v42  ;;  %v3291_v22 = vmul.f32 %v5842_v28, %v3270_v16  ;;  %v3271_v55 = vmax.f32 %v3255_v13, 0.0 }
 0x3e4   :  { %v3314_v24 = vadd.f32 %v5849_v25, %v3293_v54  ;;  %v3294_v47 = vmul.f32 %v5842_v28, %v3273_v26 }
 0x3e5   :  { %v3312_v7 = vadd.f32 %v5849_v25, %v3291_v22  ;;  %v3292_v63 = vmul.f32 %v5842_v28, %v3271_v55  ;;  %v4156_v37 = vpop.f32.mrb[12].mxu1 }
 0x3e6   :  { %v3639_v35 = vpack.c.bf16 %v3314_v24, %v3314_v24  ;;  %v3315_v15 = vadd.f32 %v5849_v25, %v3294_v47  ;;  %v3260_v43 = vadd.f32 %v4156_v37, %v5836_v31  ;;  %v3210_v45 = vpop.f32.mrb[13].mxu1 }
 0x3e7   :  { %v3637_v59 = vpack.c.bf16 %v3312_v7, %v3312_v7  ;;  %v3313_v3 = vadd.f32 %v5849_v25, %v3292_v63  ;;  %v3258_v5 = vadd.f32 %v5836_v31, %v3210_v45  ;;  %v4157_v38 = vpop.f32.mrb[14].mxu1 }
 0x3e8   :  { %3395 = vst.msk [vmem:[%s5965_s5 + $0x28] sm:$0xf] %vm3384_vm6, %v3639_v35  ;;  %v3640_v27 = vpack.c.bf16 %v3315_v15, %v3315_v15  ;;  %v3276_v32 = vmax.f32 %v3260_v43, 0.0  ;;  %v3261_v60 = vadd.f32 %v4157_v38, %v5836_v31  ;;  %v3213_v51 = vpop.f32.mrb[15].mxu1 }
 0x3e9   :  { %3393 = vst.msk [vmem:[%s5965_s5 + $0x20] sm:$0xf] %vm3384_vm6, %v3637_v59  ;;  %v3638_v10 = vpack.c.bf16 %v3313_v3, %v3313_v3  ;;  %v3274_v6 = vmax.f32 %v3258_v5, 0.0  ;;  %v3259_v53 = vadd.f32 %v5836_v31, %v3213_v51 }
 0x3ea   :  { %3396 = vst.msk [vmem:[%s5965_s5 + $0x2c] sm:$0xf] %vm3384_vm6, %v3640_v27  ;;  %v3297_v0 = vmul.f32 %v5842_v28, %v3276_v32  ;;  %v3277_v34 = vmax.f32 %v3261_v60, 0.0 }
 0x3eb   :  { %3394 = vst.msk [vmem:[%s5965_s5 + $0x24] sm:$0xf] %vm3384_vm6, %v3638_v10  ;;  %v3295_v2 = vmul.f32 %v5842_v28, %v3274_v6  ;;  %v3275_v40 = vmax.f32 %v3259_v53, 0.0 }
 0x3ec   :  { %v3318_v50 = vadd.f32 %v5849_v25, %v3297_v0  ;;  %v3298_v31 = vmul.f32 %v5842_v28, %v3277_v34 }
 0x3ed   :  { %v3316_v19 = vadd.f32 %v5849_v25, %v3295_v2  ;;  %v3296_v46 = vmul.f32 %v5842_v28, %v3275_v40 }
 0x3ee   :  { %v3643_v9 = vpack.c.bf16 %v3318_v50, %v3318_v50  ;;  %v3319_v48 = vadd.f32 %v5849_v25, %v3298_v31 }
 0x3ef   :  { %v3641_v29 = vpack.c.bf16 %v3316_v19, %v3316_v19  ;;  %v3317_v30 = vadd.f32 %v5849_v25, %v3296_v46 }
 0x3f0   :  { %3399 = vst.msk [vmem:[%s5965_s5 + $0x38] sm:$0xf] %vm3384_vm6, %v3643_v9  ;;  %v3644_v58 = vpack.c.bf16 %v3319_v48, %v3319_v48 }
 0x3f1   :  { %3397 = vst.msk [vmem:[%s5965_s5 + $0x30] sm:$0xf] %vm3384_vm6, %v3641_v29  ;;  %v3642_v18 = vpack.c.bf16 %v3317_v30, %v3317_v30 }
 0x3f2   :  { %3400 = vst.msk [vmem:[%s5965_s5 + $0x3c] sm:$0xf] %vm3384_vm6, %v3644_v58 }
 0x3f3   :  { %3398 = vst.msk [vmem:[%s5965_s5 + $0x34] sm:$0xf] %vm3384_vm6, %v3642_v18 }

// kernel: actor_critic_forward.3
= control target key start
LH: loop header
LB: loop body
LE: loop exit
PB: predicated region body
PF: predicated region fallthrough
CT: control target
= control target key end

     0   :  { %10 = vsyncpa [#allocation3], 0  ;;  %s4006_s18 = smov [#allocation2]   ;;  %s4135_s0 = inlined_call_operand.vmem [shape: bf16[2,4096], index: 0, kind: input, shape index: {}]   ;;  %s4136_s1 = inlined_call_operand.hbm [shape: bf16[4096,64], index: 1, kind: input, shape index: {}]   ;;  %s4137_s2 = inlined_call_operand.vmem [shape: f32[1,64], index: 2, kind: input, shape index: {}]   ;;  %s4138_s3 = inlined_call_operand.vmem [shape: bf16[64,128], index: 3, kind: input, shape index: {}]   ;;  %s4139_s4 = inlined_call_operand.vmem [shape: f32[1,128], index: 4, kind: input, shape index: {}]   ;;  %s4140_s5 = inlined_call_operand.vmem [shape: f32[2,128], index: 5, kind: output, shape index: {}]  }
   0x1   :  { %s18_s19 = sshll.u32 %s4006_s18, 4  ;;  %s3982_s22 = scalar_lea.hbm %s4136_s1, 32768  ;;  %s19_s19 = int_to_ptr.vmem [resolvable:$true] %s18_s19 }
   0x2   :  { %p3983_p0 = scmp.ne.s32.totalorder %s4136_s1, %s3982_s22  ;;  %p3986_p1 = scmp.lt.u32.totalorder %s3982_s22, %s4136_s1 }
   0x4   :  { %p3988_p2 = pnand %p3986_p1, %p3983_p0 }
   0x6   :  { %3991 = shalt.err (!%p3988_p2)
}
   0x7   :  { %s3992_s27 = scalar_lea.vmem %s19_s19, 32768  ;;  %p3997_p4 = scmp.lt.s32.totalorder %s19_s19, %s19_s19 }
   0x8   :  { %p3993_p3 = scmp.ne.s32.totalorder %s19_s19, %s3992_s27  ;;  %p3998_p5 = scmp.lt.s32.totalorder %s3992_s27, %s3992_s27 }
   0xa   :  { %p3999_p6 = por %p3998_p5, %p3997_p4 }
   0xc   :  { %p4000_p7 = pnand %p3999_p6, %p3993_p3 }
   0xe   :  { %4003 = shalt.err (!%p4000_p7)
}
   0xf   :  { %s4007_s28 = smov 64   ;;  %s4008_s29 = smov 4  }
  0x10   :  { %24 = dma.hbm_to_vmem [thread:$0]  %s4136_s1, 32768, %s19_s19, [#allocation3], %s4007_s28, %s4007_s28, %s4008_s29  }
  0x11   :  { %4004 = dma.done.wait [#allocation3], 32768  }
  0x12   :  { %4005 = vsyncadd [#allocation3], 4294934528  ;;  %v3714_v0 = vld [vmem:[#allocation2 + $0x40] sm:$0xff]   ;;  %v3718_v4 = vld [vmem:[#allocation2 + $0x48] sm:$0xff]   ;;  %v4009_v22 = vmov 1966171168   ;;  %v566_v24 = vlaneseq }
  0x13   :  { %v3715_v1 = vld [vmem:[#allocation2 + $0xc0] sm:$0xff]   ;;  %3339 = vmatprep.subr.bf16.mxu0 %v3714_v0  ;;  %v3719_v5 = vld [vmem:[#allocation2 + $0xc8] sm:$0xff]   ;;  %v3722_v8 = vld [vmem:[#allocation2 + $0x50] sm:$0xff]   ;;  %v564_v23 = vunpack.c.l.s4 %v4009_v22  ;;  %vm4011_vm0 = vmmov 0   ;;  %vm3007_vm1 = vcmask 523264   ;;  %vm3055_vm3 = vcmask 1041408  }
  0x14   :  { %v3716_v2 = vld [vmem:[#allocation2] sm:$0xff]   ;;  %3361 = vmatprep.subr.bf16.mxu1 %v3715_v1  ;;  %v3720_v6 = vld [vmem:[#allocation2 + $0x8] sm:$0xff]   ;;  %v3723_v9 = vld [vmem:[#allocation2 + $0xd0] sm:$0xff]   ;;  %v567_v30 = vshrl.u32 %v566_v24, 7 }
  0x15   :  { %v3717_v3 = vld [vmem:[#allocation2 + $0x80] sm:$0xff]   ;;  %3340 = vmatpush3.bf16.msra.mxu0 %v3716_v2  ;;  %v3721_v7 = vld [vmem:[#allocation2 + $0x88] sm:$0xff]   ;;  %v3724_v10 = vld [vmem:[#allocation2 + $0x10] sm:$0xff]   ;;  %v565_v29 = vunpack.c.0.s8 %v564_v23 }
  0x16   :  { %3362 = vmatpush3.bf16.msra.mxu1 %v3717_v3  ;;  %3341 = vmatprep.subr.bf16.mxu0 %v3718_v4  ;;  %v3725_v11 = vld [vmem:[#allocation2 + $0x90] sm:$0xff]   ;;  %v3726_v12 = vld [vmem:[#allocation2 + $0x58] sm:$0xff]   ;;  %v3730_v16 = vld [vmem:[#allocation2 + $0x60] sm:$0xff]  }
  0x17   :  { %3363 = vmatprep.subr.bf16.mxu1 %v3719_v5  ;;  %v3727_v13 = vld [vmem:[#allocation2 + $0xd8] sm:$0xff]   ;;  %v3731_v17 = vld [vmem:[#allocation2 + $0xe0] sm:$0xff]   ;;  %v3734_v20 = vld [vmem:[#allocation2 + $0x68] sm:$0xff]   ;;  %v4055_v35 = vsub.s32 %v565_v29, %v567_v30 }
  0x18   :  { %v3728_v14 = vld [vmem:[#allocation2 + $0x18] sm:$0xff]   ;;  %v3732_v18 = vld [vmem:[#allocation2 + $0x20] sm:$0xff]   ;;  %v3735_v21 = vld [vmem:[#allocation2 + $0xe8] sm:$0xff]  }
  0x19   :  { %3342 = vmatpush3.bf16.msra.mxu0 %v3720_v6  ;;  %v3729_v15 = vld [vmem:[#allocation2 + $0x98] sm:$0xff]   ;;  %v3733_v19 = vld [vmem:[#allocation2 + $0xa0] sm:$0xff]   ;;  %v3736_v25 = vld [vmem:[#allocation2 + $0x28] sm:$0xff]  }
  0x1a   :  { %3364 = vmatpush3.bf16.msra.mxu1 %v3721_v7  ;;  %3343 = vmatprep.subr.bf16.mxu0 %v3722_v8  ;;  %v3737_v26 = vld [vmem:[#allocation2 + $0xa8] sm:$0xff]   ;;  %v3738_v27 = vld [vmem:[#allocation2 + $0x70] sm:$0xff]   ;;  %v3742_v33 = vld [vmem:[#allocation2 + $0x78] sm:$0xff]  }
  0x1b   :  { %3365 = vmatprep.subr.bf16.mxu1 %v3723_v9  ;;  %v3739_v28 = vld [vmem:[#allocation2 + $0xf0] sm:$0xff]   ;;  %v3743_v34 = vld [vmem:[#allocation2 + $0xf8] sm:$0xff]   ;;  %v35_v38 = vld [vmem:[%s4135_s0] sm:$0xff] }
  0x1c   :  { %v3740_v31 = vld [vmem:[#allocation2 + $0x30] sm:$0xff]   ;;  %v3744_v36 = vld [vmem:[#allocation2 + $0x38] sm:$0xff]   ;;  %v562_v39 = vcombine.high %v35_v38, %v35_v38  ;;  %v569_v40 = vrot.slane %v35_v38, %v4055_v35  ;;  %v3747_v41 = vld [vmem:[#allocation2 + $0x140] sm:$0xff]  }
  0x1d   :  { %3344 = vmatpush3.bf16.msra.mxu0 %v3724_v10  ;;  %v3741_v32 = vld [vmem:[#allocation2 + $0xb0] sm:$0xff]   ;;  %v3745_v37 = vld [vmem:[#allocation2 + $0xb8] sm:$0xff]   ;;  %v3748_v42 = vld [vmem:[#allocation2 + $0x1c0] sm:$0xff]  }
  0x1e   :  { %3366 = vmatpush3.bf16.msra.mxu1 %v3725_v11  ;;  %3345 = vmatprep.subr.bf16.mxu0 %v3726_v12  ;;  %v577_v43 = vcombine.high %v569_v40, %v569_v40  ;;  %v585_v44 = vrot.slane %v569_v40, %v4055_v35  ;;  %v4063_v45 = vrot.slane %v562_v39, %v4055_v35  ;;  %v3749_v46 = vld [vmem:[#allocation2 + $0x100] sm:$0xff]   ;;  %v3751_v51 = vld [vmem:[#allocation2 + $0x148] sm:$0xff]   ;;  %v3755_v58 = vld [vmem:[#allocation2 + $0x150] sm:$0xff]  }
  0x1f   :  { %3367 = vmatprep.subr.bf16.mxu1 %v3727_v13  ;;  %v3750_v48 = vld [vmem:[#allocation2 + $0x180] sm:$0xff]   ;;  %v3752_v53 = vld [vmem:[#allocation2 + $0x1c8] sm:$0xff]   ;;  %v3756_v59 = vld [vmem:[#allocation2 + $0x1d0] sm:$0xff]  }
  0x20   :  { %v599_v47 = vrot.slane %v577_v43, %v4055_v35  ;;  %v578_v49 = vcombine.high %v4063_v45, %v4063_v45  ;;  %v607_v50 = vcombine.high %v585_v44, %v585_v44  ;;  %v3753_v55 = vld [vmem:[#allocation2 + $0x108] sm:$0xff]   ;;  %v3757_v60 = vld [vmem:[#allocation2 + $0x110] sm:$0xff]   ;;  %v3759_v62 = vld [vmem:[#allocation2 + $0x158] sm:$0xff]  }
  0x21   :  { %3346 = vmatpush3.bf16.msra.mxu0 %v3728_v14  ;;  %v3754_v56 = vld [vmem:[#allocation2 + $0x188] sm:$0xff]   ;;  %v3758_v61 = vld [vmem:[#allocation2 + $0x190] sm:$0xff]   ;;  %v3760_v63 = vld [vmem:[#allocation2 + $0x1d8] sm:$0xff]  }
  0x22   :  { %3368 = vmatpush3.bf16.msra.mxu1 %v3729_v15  ;;  %3347 = vmatprep.subr.bf16.mxu0 %v3730_v16  ;;  %v609_v52 = vcombine.high %v599_v47, %v599_v47  ;;  %v606_v54 = vrot.slane %v578_v49, %v4055_v35  ;;  %v3761_v0 = vld [vmem:[#allocation2 + $0x118] sm:$0xff]   ;;  %v3763_v2 = vld [vmem:[#allocation2 + $0x160] sm:$0xff]   ;;  %v3767_v6 = vld [vmem:[#allocation2 + $0x168] sm:$0xff]  }
  0x23   :  { %3369 = vmatprep.subr.bf16.mxu1 %v3731_v17  ;;  %2358 = vmatprep.mubr.bf16.mxu0 %v599_v47  ;;  %v3762_v1 = vld [vmem:[#allocation2 + $0x198] sm:$0xff]   ;;  %v3764_v3 = vld [vmem:[#allocation2 + $0x1e0] sm:$0xff]   ;;  %v3768_v7 = vld [vmem:[#allocation2 + $0x1e8] sm:$0xff]  }
  0x24   :  { %2398 = vmatprep.mubr.bf16.mxu1 %v609_v52  ;;  %v610_v57 = vcombine.high %v606_v54, %v606_v54  ;;  %v3765_v4 = vld [vmem:[#allocation2 + $0x120] sm:$0xff]   ;;  %v3769_v8 = vld [vmem:[#allocation2 + $0x128] sm:$0xff]   ;;  %v3771_v10 = vld [vmem:[#allocation2 + $0x170] sm:$0xff]  }
  0x25   :  { %3348 = vmatpush3.bf16.msra.mxu0 %v3732_v18  ;;  %v3766_v5 = vld [vmem:[#allocation2 + $0x1a0] sm:$0xff]   ;;  %v3770_v9 = vld [vmem:[#allocation2 + $0x1a8] sm:$0xff]   ;;  %v3772_v11 = vld [vmem:[#allocation2 + $0x1f0] sm:$0xff]   ;;  %v592_v18 = vrot.slane %v4063_v45, %v4055_v35 }
  0x26   :  { %3370 = vmatpush3.bf16.msra.mxu1 %v3733_v19  ;;  %3349 = vmatprep.subr.bf16.mxu0 %v3734_v20  ;;  %v3773_v12 = vld [vmem:[#allocation2 + $0x130] sm:$0xff]   ;;  %v3775_v14 = vld [vmem:[#allocation2 + $0x178] sm:$0xff]   ;;  %v3779_v19 = vld [vmem:[#allocation2 + $0x240] sm:$0xff]  }
  0x27   :  { %3371 = vmatprep.subr.bf16.mxu1 %v3735_v21  ;;  %v3774_v13 = vld [vmem:[#allocation2 + $0x1b0] sm:$0xff]   ;;  %v3776_v15 = vld [vmem:[#allocation2 + $0x1f8] sm:$0xff]   ;;  %v3780_v20 = vld [vmem:[#allocation2 + $0x2c0] sm:$0xff]   ;;  %v608_v23 = vcombine.high %v592_v18, %v592_v18 }
  0x28   :  { %v3777_v16 = vld [vmem:[#allocation2 + $0x138] sm:$0xff]   ;;  %v3781_v21 = vld [vmem:[#allocation2 + $0x200] sm:$0xff]   ;;  %v3787_v29 = vld [vmem:[#allocation2 + $0x250] sm:$0xff]  }
  0x29   :  { %3350 = vmatpush3.bf16.msra.mxu0 %v3736_v25  ;;  %v3778_v17 = vld [vmem:[#allocation2 + $0x1b8] sm:$0xff]   ;;  %v3782_v22 = vld [vmem:[#allocation2 + $0x280] sm:$0xff]   ;;  %v3783_v25 = vld [vmem:[#allocation2 + $0x248] sm:$0xff]  }
  0x2a   :  { %3372 = vmatpush3.bf16.msra.mxu1 %v3737_v26  ;;  %3351 = vmatprep.subr.bf16.mxu0 %v3738_v27  ;;  %v3784_v26 = vld [vmem:[#allocation2 + $0x2c8] sm:$0xff]   ;;  %v3788_v30 = vld [vmem:[#allocation2 + $0x2d0] sm:$0xff]   ;;  %v3795_v38 = vld [vmem:[#allocation2 + $0x260] sm:$0xff]  }
  0x2b   :  { %3373 = vmatprep.subr.bf16.mxu1 %v3739_v28  ;;  %v3785_v27 = vld [vmem:[#allocation2 + $0x208] sm:$0xff]   ;;  %v3796_v39 = vld [vmem:[#allocation2 + $0x2e0] sm:$0xff]   ;;  %v3804_v47 = vld [vmem:[#allocation2 + $0x2f0] sm:$0xff]  }
  0x2c   :  { %v3786_v28 = vld [vmem:[#allocation2 + $0x288] sm:$0xff]   ;;  %v3797_v40 = vld [vmem:[#allocation2 + $0x220] sm:$0xff]   ;;  %v3806_v49 = vld [vmem:[#allocation2 + $0x2b0] sm:$0xff]  }
  0x2d   :  { %3352 = vmatpush3.bf16.msra.mxu0 %v3740_v31  ;;  %v3789_v31 = vld [vmem:[#allocation2 + $0x210] sm:$0xff]   ;;  %v3800_v43 = vld [vmem:[#allocation2 + $0x2e8] sm:$0xff]   ;;  %v3809_v52 = vld [vmem:[#allocation2 + $0x238] sm:$0xff]  }
  0x2e   :  { %3374 = vmatpush3.bf16.msra.mxu1 %v3741_v32  ;;  %3353 = vmatprep.subr.bf16.mxu0 %v3742_v33  ;;  %v3790_v32 = vld [vmem:[#allocation2 + $0x290] sm:$0xff]   ;;  %v3791_v33 = vld [vmem:[#allocation2 + $0x258] sm:$0xff]   ;;  %v3802_v45 = vld [vmem:[#allocation2 + $0x2a8] sm:$0xff]  }
  0x2f   :  { %3375 = vmatprep.subr.bf16.mxu1 %v3743_v34  ;;  %v3792_v34 = vld [vmem:[#allocation2 + $0x2d8] sm:$0xff]  }
  0x31   :  { %3354 = vmatpush3.bf16.msra.mxu0 %v3744_v36  ;;  %v3793_v36 = vld [vmem:[#allocation2 + $0x218] sm:$0xff]  }
  0x32   :  { %3376 = vmatpush3.bf16.msra.mxu1 %v3745_v37  ;;  %3383 = vmatprep.subr.bf16.mxu0 %v3747_v41  ;;  %v3794_v37 = vld [vmem:[#allocation2 + $0x298] sm:$0xff]   ;;  %v3798_v41 = vld [vmem:[#allocation2 + $0x2a0] sm:$0xff]  }
  0x33   :  { %3405 = vmatprep.subr.bf16.mxu1 %v3748_v42  ;;  %v3799_v42 = vld [vmem:[#allocation2 + $0x268] sm:$0xff]  }
  0x34   :  { %2359 = vmatmul.mubr.bf16.vlgmr.msra.gmra.mrb[0].mxu0 %v585_v44  ;;  %v3801_v44 = vld [vmem:[#allocation2 + $0x228] sm:$0xff]  }
  0x35   :  { %3384 = vmatpush3.bf16.msra.mxu0 %v3749_v46  ;;  %2399 = vmatmul.mubr.bf16.vlgmr.msra.gmra.mrb[0].mxu1 %v607_v50  ;;  %v3803_v46 = vld [vmem:[#allocation2 + $0x270] sm:$0xff]   ;;  %v3807_v50 = vld [vmem:[#allocation2 + $0x278] sm:$0xff]  }
  0x36   :  { %3385 = vmatprep.subr.bf16.mxu0 %v3751_v51  ;;  %3406 = vmatpush3.bf16.msra.mxu1 %v3750_v48  ;;  %v3805_v48 = vld [vmem:[#allocation2 + $0x230] sm:$0xff]   ;;  %v3808_v51 = vld [vmem:[#allocation2 + $0x2f8] sm:$0xff]  }
  0x37   :  { %2438 = vmatprep.mubr.bf16.mxu0 %v606_v54  ;;  %3407 = vmatprep.subr.bf16.mxu1 %v3752_v53  ;;  %v36_v53 = vld [vmem:[%s4135_s0 + $0x8] sm:$0xff]  ;;  %v3810_v54 = vld [vmem:[#allocation2 + $0x2b8] sm:$0xff]  }
  0x38   :  { %2478 = vmatprep.mubr.bf16.mxu1 %v610_v57  ;;  %v3811_v57 = vld [vmem:[#allocation2 + $0x340] sm:$0xff]  }
  0x39   :  { %3386 = vmatpush3.bf16.msra.mxu0 %v3753_v55  ;;  %v618_v55 = vrot.slane %v36_v53, %v4055_v35 }
  0x3a   :  { %3387 = vmatprep.subr.bf16.mxu0 %v3755_v58  ;;  %3408 = vmatpush3.bf16.msra.mxu1 %v3754_v56  ;;  %v611_v56 = vcombine.high %v36_v53, %v36_v53  ;;  %v3859_v53 = vld [vmem:[#allocation2 + $0x498] sm:$0xff]  }
  0x3b   :  { %3409 = vmatprep.subr.bf16.mxu1 %v3756_v59  ;;  %v626_v58 = vcombine.high %v618_v55, %v618_v55  ;;  %v634_v59 = vrot.slane %v618_v55, %v4055_v35  ;;  %v3861_v55 = vld [vmem:[#allocation2 + $0x4e0] sm:$0xff]  }
  0x3d   :  { %3388 = vmatpush3.bf16.msra.mxu0 %v3757_v60  ;;  %v3812_v60 = vld [vmem:[#allocation2 + $0x3c0] sm:$0xff]  }
  0x3e   :  { %3389 = vmatprep.subr.bf16.mxu0 %v3759_v62  ;;  %3410 = vmatpush3.bf16.msra.mxu1 %v3758_v61  ;;  %v4077_v61 = vrot.slane %v611_v56, %v4055_v35  ;;  %v3813_v62 = vld [vmem:[#allocation2 + $0x300] sm:$0xff]  }
  0x3f   :  { %3411 = vmatprep.subr.bf16.mxu1 %v3760_v63  ;;  %v648_v63 = vrot.slane %v626_v58, %v4055_v35  ;;  %v3862_v56 = vld [vmem:[#allocation2 + $0x420] sm:$0xff]   ;;  %v3864_v58 = vld [vmem:[#allocation2 + $0x468] sm:$0xff]  }
  0x41   :  { %3390 = vmatpush3.bf16.msra.mxu0 %v3761_v0  ;;  %v3814_v0 = vld [vmem:[#allocation2 + $0x380] sm:$0xff]  }
  0x42   :  { %3391 = vmatprep.subr.bf16.mxu0 %v3763_v2  ;;  %3412 = vmatpush3.bf16.msra.mxu1 %v3762_v1  ;;  %v627_v1 = vcombine.high %v4077_v61, %v4077_v61  ;;  %v656_v2 = vcombine.high %v634_v59, %v634_v59 }
  0x43   :  { %3413 = vmatprep.subr.bf16.mxu1 %v3764_v3  ;;  %v3815_v3 = vld [vmem:[#allocation2 + $0x348] sm:$0xff]  }
  0x45   :  { %3392 = vmatpush3.bf16.msra.mxu0 %v3765_v4  ;;  %v658_v4 = vcombine.high %v648_v63, %v648_v63 }
  0x46   :  { %3393 = vmatprep.subr.bf16.mxu0 %v3767_v6  ;;  %3414 = vmatpush3.bf16.msra.mxu1 %v3766_v5  ;;  %v3816_v5 = vld [vmem:[#allocation2 + $0x3c8] sm:$0xff]   ;;  %v655_v6 = vrot.slane %v627_v1, %v4055_v35  ;;  %v3871_v1 = vld [vmem:[#allocation2 + $0x4b0] sm:$0xff]  }
  0x47   :  { %3415 = vmatprep.subr.bf16.mxu1 %v3768_v7  ;;  %v3817_v7 = vld [vmem:[#allocation2 + $0x308] sm:$0xff]  }
  0x49   :  { %3394 = vmatpush3.bf16.msra.mxu0 %v3769_v8  ;;  %v3818_v8 = vld [vmem:[#allocation2 + $0x388] sm:$0xff]  }
  0x4a   :  { %3395 = vmatprep.subr.bf16.mxu0 %v3771_v10  ;;  %3416 = vmatpush3.bf16.msra.mxu1 %v3770_v9  ;;  %v659_v9 = vcombine.high %v655_v6, %v655_v6  ;;  %v3819_v10 = vld [vmem:[#allocation2 + $0x350] sm:$0xff]  }
  0x4b   :  { %3417 = vmatprep.subr.bf16.mxu1 %v3772_v11  ;;  %v3820_v11 = vld [vmem:[#allocation2 + $0x3d0] sm:$0xff]  }
  0x4d   :  { %3396 = vmatpush3.bf16.msra.mxu0 %v3773_v12  ;;  %v3821_v12 = vld [vmem:[#allocation2 + $0x310] sm:$0xff]  }
  0x4e   :  { %3397 = vmatprep.subr.bf16.mxu0 %v3775_v14  ;;  %3418 = vmatpush3.bf16.msra.mxu1 %v3774_v13  ;;  %v3822_v13 = vld [vmem:[#allocation2 + $0x390] sm:$0xff]   ;;  %v3823_v14 = vld [vmem:[#allocation2 + $0x358] sm:$0xff]  }
  0x4f   :  { %3419 = vmatprep.subr.bf16.mxu1 %v3776_v15  ;;  %v3824_v15 = vld [vmem:[#allocation2 + $0x3d8] sm:$0xff]  }
  0x51   :  { %3398 = vmatpush3.bf16.msra.mxu0 %v3777_v16  ;;  %v3825_v16 = vld [vmem:[#allocation2 + $0x318] sm:$0xff]  }
  0x52   :  { %3427 = vmatprep.subr.bf16.mxu0 %v3779_v19  ;;  %3420 = vmatpush3.bf16.msra.mxu1 %v3778_v17  ;;  %v3826_v17 = vld [vmem:[#allocation2 + $0x398] sm:$0xff]   ;;  %v3828_v19 = vld [vmem:[#allocation2 + $0x3e0] sm:$0xff]  }
  0x53   :  { %3449 = vmatprep.subr.bf16.mxu1 %v3780_v20  ;;  %v3829_v20 = vld [vmem:[#allocation2 + $0x320] sm:$0xff]  }
  0x54   :  { %2439 = vmatmul.mubr.bf16.vlgmr.msra.gmra.mrb[4].mxu0 %v592_v18  ;;  %v3827_v18 = vld [vmem:[#allocation2 + $0x360] sm:$0xff]  }
  0x55   :  { %3428 = vmatpush3.bf16.msra.mxu0 %v3781_v21  ;;  %2479 = vmatmul.mubr.bf16.vlgmr.msra.gmra.mrb[4].mxu1 %v608_v23  ;;  %v3830_v21 = vld [vmem:[#allocation2 + $0x3a0] sm:$0xff]   ;;  %v3832_v23 = vld [vmem:[#allocation2 + $0x3e8] sm:$0xff]  }
  0x56   :  { %3429 = vmatprep.subr.bf16.mxu0 %v3783_v25  ;;  %3450 = vmatpush3.bf16.msra.mxu1 %v3782_v22  ;;  %v3831_v22 = vld [vmem:[#allocation2 + $0x368] sm:$0xff]  }
  0x57   :  { %3451 = vmatprep.subr.bf16.mxu1 %v3784_v26  ;;  %2518 = vmatprep.mubr.bf16.mxu0 %v648_v63  ;;  %v3833_v25 = vld [vmem:[#allocation2 + $0x328] sm:$0xff]   ;;  %v3869_v63 = vld [vmem:[#allocation2 + $0x4f0] sm:$0xff]  }
  0x58   :  { %2558 = vmatprep.mubr.bf16.mxu1 %v658_v4  ;;  %v3834_v26 = vld [vmem:[#allocation2 + $0x3a8] sm:$0xff]   ;;  %v3874_v4 = vld [vmem:[#allocation2 + $0x438] sm:$0xff]  }
  0x59   :  { %3430 = vmatpush3.bf16.msra.mxu0 %v3785_v27  ;;  %v3835_v27 = vld [vmem:[#allocation2 + $0x370] sm:$0xff]  }
  0x5a   :  { %3431 = vmatprep.subr.bf16.mxu0 %v3787_v29  ;;  %3452 = vmatpush3.bf16.msra.mxu1 %v3786_v28  ;;  %v3836_v28 = vld [vmem:[#allocation2 + $0x3f0] sm:$0xff]  }
  0x5b   :  { %3453 = vmatprep.subr.bf16.mxu1 %v3788_v30  ;;  %v3837_v29 = vld [vmem:[#allocation2 + $0x330] sm:$0xff]  }
  0x5c   :  { %v3838_v30 = vld [vmem:[#allocation2 + $0x3b0] sm:$0xff]  }
  0x5d   :  { %3432 = vmatpush3.bf16.msra.mxu0 %v3789_v31  ;;  %v3839_v31 = vld [vmem:[#allocation2 + $0x378] sm:$0xff]  }
  0x5e   :  { %3433 = vmatprep.subr.bf16.mxu0 %v3791_v33  ;;  %3454 = vmatpush3.bf16.msra.mxu1 %v3790_v32  ;;  %v3840_v32 = vld [vmem:[#allocation2 + $0x3f8] sm:$0xff]  }
  0x5f   :  { %3455 = vmatprep.subr.bf16.mxu1 %v3792_v34  ;;  %v3841_v33 = vld [vmem:[#allocation2 + $0x338] sm:$0xff]  }
  0x60   :  { %v3842_v34 = vld [vmem:[#allocation2 + $0x3b8] sm:$0xff]  }
  0x61   :  { %3434 = vmatpush3.bf16.msra.mxu0 %v3793_v36  ;;  %v641_v36 = vrot.slane %v4077_v61, %v4055_v35  ;;  %v3867_v61 = vld [vmem:[#allocation2 + $0x4a8] sm:$0xff]  }
  0x62   :  { %3435 = vmatprep.subr.bf16.mxu0 %v3795_v38  ;;  %3456 = vmatpush3.bf16.msra.mxu1 %v3794_v37  ;;  %v3844_v37 = vld [vmem:[#allocation2 + $0x440] sm:$0xff]  }
  0x63   :  { %3457 = vmatprep.subr.bf16.mxu1 %v3796_v39  ;;  %v3845_v38 = vld [vmem:[#allocation2 + $0x4c0] sm:$0xff]  }
  0x64   :  { %v3846_v39 = vld [vmem:[#allocation2 + $0x400] sm:$0xff]  }
  0x65   :  { %3436 = vmatpush3.bf16.msra.mxu0 %v3797_v40  ;;  %v3847_v40 = vld [vmem:[#allocation2 + $0x480] sm:$0xff]  }
  0x66   :  { %3437 = vmatprep.subr.bf16.mxu0 %v3799_v42  ;;  %3458 = vmatpush3.bf16.msra.mxu1 %v3798_v41  ;;  %v657_v41 = vcombine.high %v641_v36, %v641_v36  ;;  %v3848_v42 = vld [vmem:[#allocation2 + $0x448] sm:$0xff]  }
  0x67   :  { %3459 = vmatprep.subr.bf16.mxu1 %v3800_v43  ;;  %v3849_v43 = vld [vmem:[#allocation2 + $0x4c8] sm:$0xff]  }
  0x69   :  { %3438 = vmatpush3.bf16.msra.mxu0 %v3801_v44  ;;  %v3850_v44 = vld [vmem:[#allocation2 + $0x408] sm:$0xff]  }
  0x6a   :  { %3439 = vmatprep.subr.bf16.mxu0 %v3803_v46  ;;  %3460 = vmatpush3.bf16.msra.mxu1 %v3802_v45  ;;  %v3851_v45 = vld [vmem:[#allocation2 + $0x488] sm:$0xff]   ;;  %v3852_v46 = vld [vmem:[#allocation2 + $0x450] sm:$0xff]  }
  0x6b   :  { %3461 = vmatprep.subr.bf16.mxu1 %v3804_v47  ;;  %v3853_v47 = vld [vmem:[#allocation2 + $0x4d0] sm:$0xff]  }
  0x6d   :  { %3440 = vmatpush3.bf16.msra.mxu0 %v3805_v48  ;;  %v3854_v48 = vld [vmem:[#allocation2 + $0x410] sm:$0xff]  }
  0x6e   :  { %3441 = vmatprep.subr.bf16.mxu0 %v3807_v50  ;;  %3462 = vmatpush3.bf16.msra.mxu1 %v3806_v49  ;;  %v3855_v49 = vld [vmem:[#allocation2 + $0x490] sm:$0xff]   ;;  %v3856_v50 = vld [vmem:[#allocation2 + $0x458] sm:$0xff]  }
  0x6f   :  { %3463 = vmatprep.subr.bf16.mxu1 %v3808_v51  ;;  %v3857_v51 = vld [vmem:[#allocation2 + $0x4d8] sm:$0xff]  }
  0x71   :  { %3442 = vmatpush3.bf16.msra.mxu0 %v3809_v52  ;;  %v3858_v52 = vld [vmem:[#allocation2 + $0x418] sm:$0xff]  }
  0x72   :  { %3471 = vmatprep.subr.bf16.mxu0 %v3811_v57  ;;  %3464 = vmatpush3.bf16.msra.mxu1 %v3810_v54  ;;  %v3860_v54 = vld [vmem:[#allocation2 + $0x460] sm:$0xff]  }
  0x73   :  { %3493 = vmatprep.subr.bf16.mxu1 %v3812_v60  ;;  %v3863_v57 = vld [vmem:[#allocation2 + $0x4a0] sm:$0xff]   ;;  %v3866_v60 = vld [vmem:[#allocation2 + $0x428] sm:$0xff]  }
  0x74   :  { %2519 = vmatmul.mubr.bf16.vlgmr.msra.gmra.mrb[8].mxu0 %v634_v59  ;;  %v3865_v59 = vld [vmem:[#allocation2 + $0x4e8] sm:$0xff]  }
  0x75   :  { %3472 = vmatpush3.bf16.msra.mxu0 %v3813_v62  ;;  %2559 = vmatmul.mubr.bf16.vlgmr.msra.gmra.mrb[8].mxu1 %v656_v2  ;;  %v3868_v62 = vld [vmem:[#allocation2 + $0x470] sm:$0xff]   ;;  %v3872_v2 = vld [vmem:[#allocation2 + $0x478] sm:$0xff]  }
  0x76   :  { %3473 = vmatprep.subr.bf16.mxu0 %v3815_v3  ;;  %3494 = vmatpush3.bf16.msra.mxu1 %v3814_v0  ;;  %v3870_v0 = vld [vmem:[#allocation2 + $0x430] sm:$0xff]   ;;  %v3873_v3 = vld [vmem:[#allocation2 + $0x4f8] sm:$0xff]  }
  0x77   :  { %2598 = vmatprep.mubr.bf16.mxu0 %v655_v6  ;;  %3495 = vmatprep.subr.bf16.mxu1 %v3816_v5  ;;  %v37_v5 = vld [vmem:[%s4135_s0 + $0x10] sm:$0xff]  ;;  %v3875_v6 = vld [vmem:[#allocation2 + $0x4b8] sm:$0xff]  }
  0x78   :  { %2638 = vmatprep.mubr.bf16.mxu1 %v659_v9  ;;  %v3876_v9 = vld [vmem:[#allocation2 + $0x540] sm:$0xff]  }
  0x79   :  { %3474 = vmatpush3.bf16.msra.mxu0 %v3817_v7  ;;  %v667_v7 = vrot.slane %v37_v5, %v4055_v35 }
  0x7a   :  { %3475 = vmatprep.subr.bf16.mxu0 %v3819_v10  ;;  %3496 = vmatpush3.bf16.msra.mxu1 %v3818_v8  ;;  %v660_v8 = vcombine.high %v37_v5, %v37_v5  ;;  %v3924_v5 = vld [vmem:[#allocation2 + $0x698] sm:$0xff]  }
  0x7b   :  { %3497 = vmatprep.subr.bf16.mxu1 %v3820_v11  ;;  %v675_v10 = vcombine.high %v667_v7, %v667_v7  ;;  %v683_v11 = vrot.slane %v667_v7, %v4055_v35  ;;  %v3926_v7 = vld [vmem:[#allocation2 + $0x6e0] sm:$0xff]  }
  0x7d   :  { %3476 = vmatpush3.bf16.msra.mxu0 %v3821_v12  ;;  %v3877_v12 = vld [vmem:[#allocation2 + $0x5c0] sm:$0xff]  }
  0x7e   :  { %3477 = vmatprep.subr.bf16.mxu0 %v3823_v14  ;;  %3498 = vmatpush3.bf16.msra.mxu1 %v3822_v13  ;;  %v4091_v13 = vrot.slane %v660_v8, %v4055_v35  ;;  %v3878_v14 = vld [vmem:[#allocation2 + $0x500] sm:$0xff]  }
  0x7f   :  { %3499 = vmatprep.subr.bf16.mxu1 %v3824_v15  ;;  %v697_v15 = vrot.slane %v675_v10, %v4055_v35  ;;  %v3927_v8 = vld [vmem:[#allocation2 + $0x620] sm:$0xff]   ;;  %v3929_v10 = vld [vmem:[#allocation2 + $0x668] sm:$0xff]  }
  0x81   :  { %3478 = vmatpush3.bf16.msra.mxu0 %v3825_v16  ;;  %v3879_v16 = vld [vmem:[#allocation2 + $0x580] sm:$0xff]  }
  0x82   :  { %3479 = vmatprep.subr.bf16.mxu0 %v3827_v18  ;;  %3500 = vmatpush3.bf16.msra.mxu1 %v3826_v17  ;;  %v676_v17 = vcombine.high %v4091_v13, %v4091_v13  ;;  %v705_v18 = vcombine.high %v683_v11, %v683_v11 }
  0x83   :  { %3501 = vmatprep.subr.bf16.mxu1 %v3828_v19  ;;  %v3880_v19 = vld [vmem:[#allocation2 + $0x548] sm:$0xff]  }
  0x85   :  { %3480 = vmatpush3.bf16.msra.mxu0 %v3829_v20  ;;  %v707_v20 = vcombine.high %v697_v15, %v697_v15 }
  0x86   :  { %3481 = vmatprep.subr.bf16.mxu0 %v3831_v22  ;;  %3502 = vmatpush3.bf16.msra.mxu1 %v3830_v21  ;;  %v3881_v21 = vld [vmem:[#allocation2 + $0x5c8] sm:$0xff]   ;;  %v704_v22 = vrot.slane %v676_v17, %v4055_v35  ;;  %v3936_v17 = vld [vmem:[#allocation2 + $0x6b0] sm:$0xff]  }
  0x87   :  { %3503 = vmatprep.subr.bf16.mxu1 %v3832_v23  ;;  %v3882_v23 = vld [vmem:[#allocation2 + $0x508] sm:$0xff]  }
  0x89   :  { %3482 = vmatpush3.bf16.msra.mxu0 %v3833_v25  ;;  %v3883_v25 = vld [vmem:[#allocation2 + $0x588] sm:$0xff]  }
  0x8a   :  { %3483 = vmatprep.subr.bf16.mxu0 %v3835_v27  ;;  %3504 = vmatpush3.bf16.msra.mxu1 %v3834_v26  ;;  %v708_v26 = vcombine.high %v704_v22, %v704_v22  ;;  %v3884_v27 = vld [vmem:[#allocation2 + $0x550] sm:$0xff]  }
  0x8b   :  { %3505 = vmatprep.subr.bf16.mxu1 %v3836_v28  ;;  %v3885_v28 = vld [vmem:[#allocation2 + $0x5d0] sm:$0xff]  }
  0x8d   :  { %3484 = vmatpush3.bf16.msra.mxu0 %v3837_v29  ;;  %v3886_v29 = vld [vmem:[#allocation2 + $0x510] sm:$0xff]  }
  0x8e   :  { %3485 = vmatprep.subr.bf16.mxu0 %v3839_v31  ;;  %3506 = vmatpush3.bf16.msra.mxu1 %v3838_v30  ;;  %v3887_v30 = vld [vmem:[#allocation2 + $0x590] sm:$0xff]   ;;  %v3888_v31 = vld [vmem:[#allocation2 + $0x558] sm:$0xff]  }
  0x8f   :  { %3507 = vmatprep.subr.bf16.mxu1 %v3840_v32  ;;  %v3889_v32 = vld [vmem:[#allocation2 + $0x5d8] sm:$0xff]  }
  0x91   :  { %3486 = vmatpush3.bf16.msra.mxu0 %v3841_v33  ;;  %v3890_v33 = vld [vmem:[#allocation2 + $0x518] sm:$0xff]  }
  0x92   :  { %3515 = vmatprep.subr.bf16.mxu0 %v3844_v37  ;;  %3508 = vmatpush3.bf16.msra.mxu1 %v3842_v34  ;;  %v3891_v34 = vld [vmem:[#allocation2 + $0x598] sm:$0xff]   ;;  %v3893_v37 = vld [vmem:[#allocation2 + $0x5e0] sm:$0xff]  }
  0x93   :  { %3537 = vmatprep.subr.bf16.mxu1 %v3845_v38  ;;  %v3894_v38 = vld [vmem:[#allocation2 + $0x520] sm:$0xff]  }
  0x94   :  { %2599 = vmatmul.mubr.bf16.vlgmr.msra.gmra.mrb[12].mxu0 %v641_v36  ;;  %v3892_v36 = vld [vmem:[#allocation2 + $0x560] sm:$0xff]  }
  0x95   :  { %3516 = vmatpush3.bf16.msra.mxu0 %v3846_v39  ;;  %2639 = vmatmul.mubr.bf16.vlgmr.msra.gmra.mrb[12].mxu1 %v657_v41  ;;  %v3895_v39 = vld [vmem:[#allocation2 + $0x5a0] sm:$0xff]   ;;  %v3897_v41 = vld [vmem:[#allocation2 + $0x5e8] sm:$0xff]  }
  0x96   :  { %3517 = vmatprep.subr.bf16.mxu0 %v3848_v42  ;;  %3538 = vmatpush3.bf16.msra.mxu1 %v3847_v40  ;;  %v3896_v40 = vld [vmem:[#allocation2 + $0x568] sm:$0xff]  }
  0x97   :  { %3539 = vmatprep.subr.bf16.mxu1 %v3849_v43  ;;  %2678 = vmatprep.mubr.bf16.mxu0 %v697_v15  ;;  %v3898_v42 = vld [vmem:[#allocation2 + $0x528] sm:$0xff]   ;;  %v3934_v15 = vld [vmem:[#allocation2 + $0x6f0] sm:$0xff]  }
  0x98   :  { %2718 = vmatprep.mubr.bf16.mxu1 %v707_v20  ;;  %v3899_v43 = vld [vmem:[#allocation2 + $0x5a8] sm:$0xff]   ;;  %v3939_v20 = vld [vmem:[#allocation2 + $0x638] sm:$0xff]  }
  0x99   :  { %3518 = vmatpush3.bf16.msra.mxu0 %v3850_v44  ;;  %v3900_v44 = vld [vmem:[#allocation2 + $0x570] sm:$0xff]  }
  0x9a   :  { %3519 = vmatprep.subr.bf16.mxu0 %v3852_v46  ;;  %3540 = vmatpush3.bf16.msra.mxu1 %v3851_v45  ;;  %v3901_v45 = vld [vmem:[#allocation2 + $0x5f0] sm:$0xff]  }
  0x9b   :  { %3541 = vmatprep.subr.bf16.mxu1 %v3853_v47  ;;  %v3902_v46 = vld [vmem:[#allocation2 + $0x530] sm:$0xff]  }
  0x9c   :  { %v3903_v47 = vld [vmem:[#allocation2 + $0x5b0] sm:$0xff]  }
  0x9d   :  { %3520 = vmatpush3.bf16.msra.mxu0 %v3854_v48  ;;  %v3904_v48 = vld [vmem:[#allocation2 + $0x578] sm:$0xff]  }
  0x9e   :  { %3521 = vmatprep.subr.bf16.mxu0 %v3856_v50  ;;  %3542 = vmatpush3.bf16.msra.mxu1 %v3855_v49  ;;  %v3905_v49 = vld [vmem:[#allocation2 + $0x5f8] sm:$0xff]  }
  0x9f   :  { %3543 = vmatprep.subr.bf16.mxu1 %v3857_v51  ;;  %v3906_v50 = vld [vmem:[#allocation2 + $0x538] sm:$0xff]  }
  0xa0   :  { %v3907_v51 = vld [vmem:[#allocation2 + $0x5b8] sm:$0xff]  }
  0xa1   :  { %3522 = vmatpush3.bf16.msra.mxu0 %v3858_v52  ;;  %v690_v52 = vrot.slane %v4091_v13, %v4055_v35  ;;  %v3932_v13 = vld [vmem:[#allocation2 + $0x6a8] sm:$0xff]  }
  0xa2   :  { %3523 = vmatprep.subr.bf16.mxu0 %v3860_v54  ;;  %3544 = vmatpush3.bf16.msra.mxu1 %v3859_v53  ;;  %v3909_v53 = vld [vmem:[#allocation2 + $0x640] sm:$0xff]  }
  0xa3   :  { %3545 = vmatprep.subr.bf16.mxu1 %v3861_v55  ;;  %v3910_v54 = vld [vmem:[#allocation2 + $0x6c0] sm:$0xff]  }
  0xa4   :  { %v3911_v55 = vld [vmem:[#allocation2 + $0x600] sm:$0xff]  }
  0xa5   :  { %3524 = vmatpush3.bf16.msra.mxu0 %v3862_v56  ;;  %v3912_v56 = vld [vmem:[#allocation2 + $0x680] sm:$0xff]  }
  0xa6   :  { %3525 = vmatprep.subr.bf16.mxu0 %v3864_v58  ;;  %3546 = vmatpush3.bf16.msra.mxu1 %v3863_v57  ;;  %v706_v57 = vcombine.high %v690_v52, %v690_v52  ;;  %v3913_v58 = vld [vmem:[#allocation2 + $0x648] sm:$0xff]  }
  0xa7   :  { %3547 = vmatprep.subr.bf16.mxu1 %v3865_v59  ;;  %v3914_v59 = vld [vmem:[#allocation2 + $0x6c8] sm:$0xff]  }
  0xa9   :  { %3526 = vmatpush3.bf16.msra.mxu0 %v3866_v60  ;;  %v3915_v60 = vld [vmem:[#allocation2 + $0x608] sm:$0xff]  }
  0xaa   :  { %3527 = vmatprep.subr.bf16.mxu0 %v3868_v62  ;;  %3548 = vmatpush3.bf16.msra.mxu1 %v3867_v61  ;;  %v3916_v61 = vld [vmem:[#allocation2 + $0x688] sm:$0xff]   ;;  %v3917_v62 = vld [vmem:[#allocation2 + $0x650] sm:$0xff]  }
  0xab   :  { %3549 = vmatprep.subr.bf16.mxu1 %v3869_v63  ;;  %v3918_v63 = vld [vmem:[#allocation2 + $0x6d0] sm:$0xff]  }
  0xad   :  { %3528 = vmatpush3.bf16.msra.mxu0 %v3870_v0  ;;  %v3919_v0 = vld [vmem:[#allocation2 + $0x610] sm:$0xff]  }
  0xae   :  { %3529 = vmatprep.subr.bf16.mxu0 %v3872_v2  ;;  %3550 = vmatpush3.bf16.msra.mxu1 %v3871_v1  ;;  %v3920_v1 = vld [vmem:[#allocation2 + $0x690] sm:$0xff]   ;;  %v3921_v2 = vld [vmem:[#allocation2 + $0x658] sm:$0xff]  }
  0xaf   :  { %3551 = vmatprep.subr.bf16.mxu1 %v3873_v3  ;;  %v3922_v3 = vld [vmem:[#allocation2 + $0x6d8] sm:$0xff]  }
  0xb1   :  { %3530 = vmatpush3.bf16.msra.mxu0 %v3874_v4  ;;  %v3923_v4 = vld [vmem:[#allocation2 + $0x618] sm:$0xff]  }
  0xb2   :  { %3559 = vmatprep.subr.bf16.mxu0 %v3876_v9  ;;  %3552 = vmatpush3.bf16.msra.mxu1 %v3875_v6  ;;  %v3925_v6 = vld [vmem:[#allocation2 + $0x660] sm:$0xff]  }
  0xb3   :  { %3581 = vmatprep.subr.bf16.mxu1 %v3877_v12  ;;  %v3928_v9 = vld [vmem:[#allocation2 + $0x6a0] sm:$0xff]   ;;  %v3931_v12 = vld [vmem:[#allocation2 + $0x628] sm:$0xff]  }
  0xb4   :  { %2679 = vmatmul.mubr.bf16.vlgmr.msra.gmra.mrb[16].mxu0 %v683_v11  ;;  %v3930_v11 = vld [vmem:[#allocation2 + $0x6e8] sm:$0xff]  }
  0xb5   :  { %3560 = vmatpush3.bf16.msra.mxu0 %v3878_v14  ;;  %2719 = vmatmul.mubr.bf16.vlgmr.msra.gmra.mrb[16].mxu1 %v705_v18  ;;  %v3933_v14 = vld [vmem:[#allocation2 + $0x670] sm:$0xff]   ;;  %v3937_v18 = vld [vmem:[#allocation2 + $0x678] sm:$0xff]  }
  0xb6   :  { %3561 = vmatprep.subr.bf16.mxu0 %v3880_v19  ;;  %3582 = vmatpush3.bf16.msra.mxu1 %v3879_v16  ;;  %v3935_v16 = vld [vmem:[#allocation2 + $0x630] sm:$0xff]   ;;  %v3938_v19 = vld [vmem:[#allocation2 + $0x6f8] sm:$0xff]  }
  0xb7   :  { %2758 = vmatprep.mubr.bf16.mxu0 %v704_v22  ;;  %3583 = vmatprep.subr.bf16.mxu1 %v3881_v21  ;;  %v38_v21 = vld [vmem:[%s4135_s0 + $0x18] sm:$0xff] }
  0xb8   :  { %2798 = vmatprep.mubr.bf16.mxu1 %v708_v26  ;;  %v716_v22 = vrot.slane %v38_v21, %v4055_v35  ;;  %v3940_v26 = vld [vmem:[#allocation2 + $0x6b8] sm:$0xff]  }
  0xb9   :  { %3562 = vmatpush3.bf16.msra.mxu0 %v3882_v23  ;;  %v3941_v23 = vld [vmem:[#allocation2 + $0x740] sm:$0xff]  }
  0xba   :  { %3563 = vmatprep.subr.bf16.mxu0 %v3884_v27  ;;  %3584 = vmatpush3.bf16.msra.mxu1 %v3883_v25  ;;  %v709_v25 = vcombine.high %v38_v21, %v38_v21  ;;  %v724_v27 = vcombine.high %v716_v22, %v716_v22 }
  0xbb   :  { %3585 = vmatprep.subr.bf16.mxu1 %v3885_v28  ;;  %v732_v28 = vrot.slane %v716_v22, %v4055_v35 }
  0xbd   :  { %3564 = vmatpush3.bf16.msra.mxu0 %v3886_v29  ;;  %v3942_v29 = vld [vmem:[#allocation2 + $0x7c0] sm:$0xff]  }
  0xbe   :  { %3565 = vmatprep.subr.bf16.mxu0 %v3888_v31  ;;  %3586 = vmatpush3.bf16.msra.mxu1 %v3887_v30  ;;  %v4105_v30 = vrot.slane %v709_v25, %v4055_v35  ;;  %v746_v31 = vrot.slane %v724_v27, %v4055_v35 }
  0xbf   :  { %3587 = vmatprep.subr.bf16.mxu1 %v3889_v32  ;;  %v3943_v32 = vld [vmem:[#allocation2 + $0x700] sm:$0xff]  }
  0xc1   :  { %3566 = vmatpush3.bf16.msra.mxu0 %v3890_v33  ;;  %v725_v33 = vcombine.high %v4105_v30, %v4105_v30 }
  0xc2   :  { %3567 = vmatprep.subr.bf16.mxu0 %v3892_v36  ;;  %3588 = vmatpush3.bf16.msra.mxu1 %v3891_v34  ;;  %v754_v34 = vcombine.high %v732_v28, %v732_v28  ;;  %v3945_v36 = vld [vmem:[#allocation2 + $0x748] sm:$0xff]  }
  0xc3   :  { %3589 = vmatprep.subr.bf16.mxu1 %v3893_v37  ;;  %v756_v37 = vcombine.high %v746_v31, %v746_v31 }
  0xc5   :  { %3568 = vmatpush3.bf16.msra.mxu0 %v3894_v38  ;;  %v3944_v38 = vld [vmem:[#allocation2 + $0x780] sm:$0xff]  }
  0xc6   :  { %3569 = vmatprep.subr.bf16.mxu0 %v3896_v40  ;;  %3590 = vmatpush3.bf16.msra.mxu1 %v3895_v39  ;;  %v753_v39 = vrot.slane %v725_v33, %v4055_v35  ;;  %v3946_v40 = vld [vmem:[#allocation2 + $0x7c8] sm:$0xff]  }
  0xc7   :  { %3591 = vmatprep.subr.bf16.mxu1 %v3897_v41  ;;  %v3947_v41 = vld [vmem:[#allocation2 + $0x708] sm:$0xff]  }
  0xc9   :  { %3570 = vmatpush3.bf16.msra.mxu0 %v3898_v42  ;;  %v757_v42 = vcombine.high %v753_v39, %v753_v39 }
  0xca   :  { %3571 = vmatprep.subr.bf16.mxu0 %v3900_v44  ;;  %3592 = vmatpush3.bf16.msra.mxu1 %v3899_v43  ;;  %v3949_v43 = vld [vmem:[#allocation2 + $0x750] sm:$0xff]   ;;  %v3948_v44 = vld [vmem:[#allocation2 + $0x788] sm:$0xff]  }
  0xcb   :  { %3593 = vmatprep.subr.bf16.mxu1 %v3901_v45  ;;  %v3950_v45 = vld [vmem:[#allocation2 + $0x7d0] sm:$0xff]  }
  0xcd   :  { %3572 = vmatpush3.bf16.msra.mxu0 %v3902_v46  ;;  %v3951_v46 = vld [vmem:[#allocation2 + $0x710] sm:$0xff]  }
  0xce   :  { %3573 = vmatprep.subr.bf16.mxu0 %v3904_v48  ;;  %3594 = vmatpush3.bf16.msra.mxu1 %v3903_v47  ;;  %v3953_v47 = vld [vmem:[#allocation2 + $0x758] sm:$0xff]   ;;  %v3952_v48 = vld [vmem:[#allocation2 + $0x790] sm:$0xff]  }
  0xcf   :  { %3595 = vmatprep.subr.bf16.mxu1 %v3905_v49  ;;  %v3954_v49 = vld [vmem:[#allocation2 + $0x7d8] sm:$0xff]  }
  0xd1   :  { %3574 = vmatpush3.bf16.msra.mxu0 %v3906_v50  ;;  %v3955_v50 = vld [vmem:[#allocation2 + $0x718] sm:$0xff]  }
  0xd2   :  { %3603 = vmatprep.subr.bf16.mxu0 %v3909_v53  ;;  %3596 = vmatpush3.bf16.msra.mxu1 %v3907_v51  ;;  %v3957_v51 = vld [vmem:[#allocation2 + $0x760] sm:$0xff]  }
  0xd3   :  { %3625 = vmatprep.subr.bf16.mxu1 %v3910_v54  ;;  %v3958_v53 = vld [vmem:[#allocation2 + $0x7e0] sm:$0xff]  }
  0xd4   :  { %2759 = vmatmul.mubr.bf16.vlgmr.msra.gmra.mrb[20].mxu0 %v690_v52  ;;  %v3956_v52 = vld [vmem:[#allocation2 + $0x798] sm:$0xff]   ;;  %v3959_v54 = vld [vmem:[#allocation2 + $0x720] sm:$0xff]  }
  0xd5   :  { %3604 = vmatpush3.bf16.msra.mxu0 %v3911_v55  ;;  %2799 = vmatmul.mubr.bf16.vlgmr.msra.gmra.mrb[20].mxu1 %v706_v57  ;;  %v3961_v55 = vld [vmem:[#allocation2 + $0x768] sm:$0xff]  }
  0xd6   :  { %3605 = vmatprep.subr.bf16.mxu0 %v3913_v58  ;;  %3626 = vmatpush3.bf16.msra.mxu1 %v3912_v56  ;;  %v3960_v56 = vld [vmem:[#allocation2 + $0x7a0] sm:$0xff]   ;;  %v3962_v57 = vld [vmem:[#allocation2 + $0x7e8] sm:$0xff]  }
  0xd7   :  { %3627 = vmatprep.subr.bf16.mxu1 %v3914_v59  ;;  %2838 = vmatprep.mubr.bf16.mxu0 %v746_v31  ;;  %v3076_v58 = vld [vmem:[%s4137_s2] ss:$0 sm:$0xff]  ;;  %v3963_v59 = vld [vmem:[#allocation2 + $0x728] sm:$0xff]  }
  0xd8   :  { %2878 = vmatprep.mubr.bf16.mxu1 %v756_v37 }
  0xd9   :  { %3606 = vmatpush3.bf16.msra.mxu0 %v3915_v60 }
  0xda   :  { %3607 = vmatprep.subr.bf16.mxu0 %v3917_v62  ;;  %3628 = vmatpush3.bf16.msra.mxu1 %v3916_v61  ;;  %v3965_v61 = vld [vmem:[#allocation2 + $0x770] sm:$0xff]  }
  0xdb   :  { %3629 = vmatprep.subr.bf16.mxu1 %v3918_v63  ;;  %v3964_v63 = vld [vmem:[#allocation2 + $0x7a8] sm:$0xff]  }
  0xdd   :  { %3608 = vmatpush3.bf16.msra.mxu0 %v3919_v0 }
  0xde   :  { %3609 = vmatprep.subr.bf16.mxu0 %v3921_v2  ;;  %3630 = vmatpush3.bf16.msra.mxu1 %v3920_v1 }
  0xdf   :  { %3631 = vmatprep.subr.bf16.mxu1 %v3922_v3  ;;  %v3966_v3 = vld [vmem:[#allocation2 + $0x7f0] sm:$0xff]  }
  0xe1   :  { %3610 = vmatpush3.bf16.msra.mxu0 %v3923_v4  ;;  %v3967_v4 = vld [vmem:[#allocation2 + $0x730] sm:$0xff]  }
  0xe2   :  { %3611 = vmatprep.subr.bf16.mxu0 %v3925_v6  ;;  %3632 = vmatpush3.bf16.msra.mxu1 %v3924_v5 }
  0xe3   :  { %3633 = vmatprep.subr.bf16.mxu1 %v3926_v7  ;;  %v3968_v7 = vld [vmem:[#allocation2 + $0x7b0] sm:$0xff]  }
  0xe5   :  { %3612 = vmatpush3.bf16.msra.mxu0 %v3927_v8 }
  0xe6   :  { %3613 = vmatprep.subr.bf16.mxu0 %v3929_v10  ;;  %3634 = vmatpush3.bf16.msra.mxu1 %v3928_v9 }
  0xe7   :  { %3635 = vmatprep.subr.bf16.mxu1 %v3930_v11  ;;  %v3969_v11 = vld [vmem:[#allocation2 + $0x778] sm:$0xff]  }
  0xe9   :  { %3614 = vmatpush3.bf16.msra.mxu0 %v3931_v12 }
  0xea   :  { %3615 = vmatprep.subr.bf16.mxu0 %v3933_v14  ;;  %3636 = vmatpush3.bf16.msra.mxu1 %v3932_v13  ;;  %v3970_v13 = vld [vmem:[#allocation2 + $0x7f8] sm:$0xff]  }
  0xeb   :  { %3637 = vmatprep.subr.bf16.mxu1 %v3934_v15  ;;  %v3971_v15 = vld [vmem:[#allocation2 + $0x738] sm:$0xff]  }
  0xed   :  { %3616 = vmatpush3.bf16.msra.mxu0 %v3935_v16  ;;  %v739_v16 = vrot.slane %v4105_v30, %v4055_v35 }
  0xee   :  { %3617 = vmatprep.subr.bf16.mxu0 %v3937_v18  ;;  %3638 = vmatpush3.bf16.msra.mxu1 %v3936_v17  ;;  %v3972_v17 = vld [vmem:[#allocation2 + $0x7b8] sm:$0xff]  }
  0xef   :  { %3639 = vmatprep.subr.bf16.mxu1 %v3938_v19  ;;  %v755_v18 = vcombine.high %v739_v16, %v739_v16 }
  0xf1   :  { %3618 = vmatpush3.bf16.msra.mxu0 %v3939_v20 }
  0xf2   :  { %3647 = vmatprep.subr.bf16.mxu0 %v3941_v23  ;;  %3640 = vmatpush3.bf16.msra.mxu1 %v3940_v26 }
  0xf3   :  { %3669 = vmatprep.subr.bf16.mxu1 %v3942_v29 }
  0xf4   :  { %2839 = vmatmul.mubr.bf16.vlgmr.msra.gmra.mrb[24].mxu0 %v732_v28 }
  0xf5   :  { %3648 = vmatpush3.bf16.msra.mxu0 %v3943_v32  ;;  %2879 = vmatmul.mubr.bf16.vlgmr.msra.gmra.mrb[24].mxu1 %v754_v34 }
  0xf6   :  { %3649 = vmatprep.subr.bf16.mxu0 %v3945_v36  ;;  %3670 = vmatpush3.bf16.msra.mxu1 %v3944_v38 }
  0xf7   :  { %2918 = vmatprep.mubr.bf16.mxu0 %v753_v39  ;;  %3671 = vmatprep.subr.bf16.mxu1 %v3946_v40 }
  0xf8   :  { %2958 = vmatprep.mubr.bf16.mxu1 %v757_v42 }
  0xf9   :  { %3650 = vmatpush3.bf16.msra.mxu0 %v3947_v41 }
  0xfa   :  { %3651 = vmatprep.subr.bf16.mxu0 %v3949_v43  ;;  %3672 = vmatpush3.bf16.msra.mxu1 %v3948_v44  ;;  %v3974_v44 = vld [vmem:[%s4138_s3] sm:$0xff]  }
  0xfb   :  { %3673 = vmatprep.subr.bf16.mxu1 %v3950_v45  ;;  %v4010_v45 = vmov 0.0  }
  0xfd   :  { %3652 = vmatpush3.bf16.msra.mxu0 %v3951_v46 }
  0xfe   :  { %3653 = vmatprep.subr.bf16.mxu0 %v3953_v47  ;;  %3674 = vmatpush3.bf16.msra.mxu1 %v3952_v48 }
  0xff   :  { %3675 = vmatprep.subr.bf16.mxu1 %v3954_v49 }
 0x101   :  { %3654 = vmatpush3.bf16.msra.mxu0 %v3955_v50 }
 0x102   :  { %3655 = vmatprep.subr.bf16.mxu0 %v3957_v51  ;;  %3676 = vmatpush3.bf16.msra.mxu1 %v3956_v52  ;;  %v3975_v51 = vld [vmem:[%s4138_s3 + $0x8] sm:$0xff]  }
 0x103   :  { %3677 = vmatprep.subr.bf16.mxu1 %v3958_v53 }
 0x105   :  { %3656 = vmatpush3.bf16.msra.mxu0 %v3959_v54 }
 0x106   :  { %3657 = vmatprep.subr.bf16.mxu0 %v3961_v55  ;;  %3678 = vmatpush3.bf16.msra.mxu1 %v3960_v56 }
 0x107   :  { %v3355_v60 = vpop.f32.mrb[0].mxu0  ;;  %3679 = vmatprep.subr.bf16.mxu1 %v3962_v57 }
 0x108   :  { %v3356_v62 = vpop.f32.mrb[1].mxu0  ;;  %v3377_v0 = vpop.f32.mrb[0].mxu1 }
 0x109   :  { %v3357_v1 = vadd.f32 %v3356_v62, %v3355_v60  ;;  %v3358_v2 = vpop.f32.mrb[2].mxu0  ;;  %v3378_v5 = vpop.f32.mrb[1].mxu1  ;;  %3658 = vmatpush3.bf16.msra.mxu0 %v3963_v59  ;;  %v3976_v59 = vld [vmem:[%s4138_s3 + $0x10] sm:$0xff]   ;;  %v3977_v60 = vld [vmem:[%s4138_s3 + $0x18] sm:$0xff]  }
 0x10a   :  { %v3359_v6 = vpop.f32.mrb[3].mxu0  ;;  %v3379_v9 = vadd.f32 %v3378_v5, %v3377_v0  ;;  %v3380_v10 = vpop.f32.mrb[2].mxu1  ;;  %3659 = vmatprep.subr.bf16.mxu0 %v3965_v61  ;;  %3680 = vmatpush3.bf16.msra.mxu1 %v3964_v63 }
 0x10b   :  { %v2361_v8 = vadd.f32 %v3357_v1, %v3076_v58  ;;  %v3381_v12 = vpop.f32.mrb[3].mxu1  ;;  %3681 = vmatprep.subr.bf16.mxu1 %v3966_v3 }
 0x10d   :  { %v2401_v14 = vadd.f32 %v3379_v9, %v2361_v8  ;;  %3660 = vmatpush3.bf16.msra.mxu0 %v3967_v4 }
 0x10e   :  { %3661 = vmatprep.subr.bf16.mxu0 %v3969_v11  ;;  %3682 = vmatpush3.bf16.msra.mxu1 %v3968_v7 }
 0x10f   :  { %3683 = vmatprep.subr.bf16.mxu1 %v3970_v13 }
 0x111   :  { %3662 = vmatpush3.bf16.msra.mxu0 %v3971_v15 }
 0x112   :  { %3684 = vmatpush3.bf16.msra.mxu1 %v3972_v17  ;;  %3696 = vmatprep.subr.bf16.mxu0 %v4010_v45 }
 0x114   :  { %2919 = vmatmul.mubr.bf16.vlgmr.msra.gmra.mrb[28].mxu0 %v739_v16 }
 0x115   :  { %2959 = vmatmul.mubr.bf16.vlgmr.msra.gmra.mrb[28].mxu1 %v755_v18  ;;  %3697 = vmatpush3.bf16.msra.mxu0 %v3974_v44 }
 0x116   :  { %3698 = vmatprep.subr.bf16.mxu0 %v4010_v45  ;;  %3704 = vmatprep.mubr.msk.bf16.mxu0 %vm4011_vm0, %v4010_v45 }
 0x119   :  { %3699 = vmatpush3.bf16.msra.mxu0 %v3975_v51 }
 0x11a   :  { %3700 = vmatprep.subr.bf16.mxu0 %v4010_v45 }
 0x11d   :  { %3701 = vmatpush3.bf16.msra.mxu0 %v3976_v59 }
 0x11e   :  { %3702 = vmatprep.subr.bf16.mxu0 %v4010_v45 }
 0x121   :  { %3703 = vmatpush3.bf16.msra.mxu0 %v3977_v60 }
 0x127   :  { %v3399_v19 = vpop.f32.mrb[4].mxu0 }
 0x128   :  { %v3400_v20 = vpop.f32.mrb[5].mxu0  ;;  %v3421_v21 = vpop.f32.mrb[4].mxu1 }
 0x129   :  { %v3401_v22 = vadd.f32 %v3400_v20, %v3399_v19  ;;  %v3402_v23 = vpop.f32.mrb[6].mxu0  ;;  %v3422_v25 = vpop.f32.mrb[5].mxu1 }
 0x12a   :  { %v3403_v26 = vpop.f32.mrb[7].mxu0  ;;  %v3423_v28 = vadd.f32 %v3422_v25, %v3421_v21  ;;  %v3424_v29 = vpop.f32.mrb[6].mxu1 }
 0x12b   :  { %v2441_v27 = vadd.f32 %v3401_v22, %v2401_v14  ;;  %v3425_v31 = vpop.f32.mrb[7].mxu1 }
 0x12d   :  { %v2481_v35 = vadd.f32 %v3423_v28, %v2441_v27 }
 0x147   :  { %v3443_v30 = vpop.f32.mrb[8].mxu0 }
 0x148   :  { %v3444_v32 = vpop.f32.mrb[9].mxu0  ;;  %v3465_v33 = vpop.f32.mrb[8].mxu1 }
 0x149   :  { %v3445_v34 = vadd.f32 %v3444_v32, %v3443_v30  ;;  %v3446_v36 = vpop.f32.mrb[10].mxu0  ;;  %v3466_v37 = vpop.f32.mrb[9].mxu1 }
 0x14a   :  { %v3447_v38 = vpop.f32.mrb[11].mxu0  ;;  %v3467_v40 = vadd.f32 %v3466_v37, %v3465_v33  ;;  %v3468_v41 = vpop.f32.mrb[10].mxu1 }
 0x14b   :  { %v2521_v39 = vadd.f32 %v3445_v34, %v2481_v35  ;;  %v3469_v42 = vpop.f32.mrb[11].mxu1 }
 0x14d   :  { %v2561_v43 = vadd.f32 %v3467_v40, %v2521_v39 }
 0x167   :  { %v3487_v46 = vpop.f32.mrb[12].mxu0 }
 0x168   :  { %v3488_v47 = vpop.f32.mrb[13].mxu0  ;;  %v3509_v48 = vpop.f32.mrb[12].mxu1 }
 0x169   :  { %v3489_v49 = vadd.f32 %v3488_v47, %v3487_v46  ;;  %v3490_v50 = vpop.f32.mrb[14].mxu0  ;;  %v3510_v52 = vpop.f32.mrb[13].mxu1 }
 0x16a   :  { %v3491_v53 = vpop.f32.mrb[15].mxu0  ;;  %v3511_v55 = vadd.f32 %v3510_v52, %v3509_v48  ;;  %v3512_v56 = vpop.f32.mrb[14].mxu1  ;;  %v3052_v48 = vand.u32 127, %v566_v24 }
 0x16b   :  { %v2601_v54 = vadd.f32 %v3489_v49, %v2561_v43  ;;  %v3513_v57 = vpop.f32.mrb[15].mxu1  ;;  %v3333_v49 = vld [vmem:[%s4139_s4] ss:$0 sm:$0xff] }
 0x16c   :  { %vm3053_vm2 = vcmp.lt.s32.totalorder %v3052_v48, 6  ;;  %vm3068_vm4 = vcmp.eq.s32.totalorder %v3052_v48, 6 }
 0x16d   :  { %v2641_v58 = vadd.f32 %v3511_v55, %v2601_v54 }
 0x187   :  { %v3531_v61 = vpop.f32.mrb[16].mxu0 }
 0x188   :  { %v3532_v62 = vpop.f32.mrb[17].mxu0  ;;  %v3553_v63 = vpop.f32.mrb[16].mxu1 }
 0x189   :  { %v3533_v0 = vadd.f32 %v3532_v62, %v3531_v61  ;;  %v3534_v1 = vpop.f32.mrb[18].mxu0  ;;  %v3554_v2 = vpop.f32.mrb[17].mxu1 }
 0x18a   :  { %v3535_v3 = vpop.f32.mrb[19].mxu0  ;;  %v3555_v5 = vadd.f32 %v3554_v2, %v3553_v63  ;;  %v3556_v6 = vpop.f32.mrb[18].mxu1 }
 0x18b   :  { %v2681_v4 = vadd.f32 %v3533_v0, %v2641_v58  ;;  %v3557_v7 = vpop.f32.mrb[19].mxu1 }
 0x18d   :  { %v2721_v8 = vadd.f32 %v3555_v5, %v2681_v4 }
 0x1a7   :  { %v3575_v9 = vpop.f32.mrb[20].mxu0 }
 0x1a8   :  { %v3576_v10 = vpop.f32.mrb[21].mxu0  ;;  %v3597_v11 = vpop.f32.mrb[20].mxu1 }
 0x1a9   :  { %v3577_v12 = vadd.f32 %v3576_v10, %v3575_v9  ;;  %v3578_v13 = vpop.f32.mrb[22].mxu0  ;;  %v3598_v14 = vpop.f32.mrb[21].mxu1 }
 0x1aa   :  { %v3579_v15 = vpop.f32.mrb[23].mxu0  ;;  %v3599_v17 = vadd.f32 %v3598_v14, %v3597_v11  ;;  %v3600_v18 = vpop.f32.mrb[22].mxu1 }
 0x1ab   :  { %v2761_v16 = vadd.f32 %v3577_v12, %v2721_v8  ;;  %v3601_v19 = vpop.f32.mrb[23].mxu1 }
 0x1ad   :  { %v2801_v20 = vadd.f32 %v3599_v17, %v2761_v16 }
 0x1c7   :  { %v3619_v21 = vpop.f32.mrb[24].mxu0 }
 0x1c8   :  { %v3620_v22 = vpop.f32.mrb[25].mxu0  ;;  %v3641_v23 = vpop.f32.mrb[24].mxu1 }
 0x1c9   :  { %v3621_v25 = vadd.f32 %v3620_v22, %v3619_v21  ;;  %v3622_v26 = vpop.f32.mrb[26].mxu0  ;;  %v3642_v27 = vpop.f32.mrb[25].mxu1 }
 0x1ca   :  { %v3623_v28 = vpop.f32.mrb[27].mxu0  ;;  %v3643_v31 = vadd.f32 %v3642_v27, %v3641_v23  ;;  %v3644_v35 = vpop.f32.mrb[26].mxu1 }
 0x1cb   :  { %v2841_v29 = vadd.f32 %v3621_v25, %v2801_v20  ;;  %v3645_v30 = vpop.f32.mrb[27].mxu1 }
 0x1cd   :  { %v2881_v32 = vadd.f32 %v3643_v31, %v2841_v29 }
 0x1e7   :  { %v3663_v33 = vpop.f32.mrb[28].mxu0 }
 0x1e8   :  { %v3664_v34 = vpop.f32.mrb[29].mxu0  ;;  %v3685_v36 = vpop.f32.mrb[28].mxu1 }
 0x1e9   :  { %v3665_v37 = vadd.f32 %v3664_v34, %v3663_v33  ;;  %v3666_v38 = vpop.f32.mrb[30].mxu0  ;;  %v3686_v39 = vpop.f32.mrb[29].mxu1 }
 0x1ea   :  { %v3667_v40 = vpop.f32.mrb[31].mxu0  ;;  %v3687_v42 = vadd.f32 %v3686_v39, %v3685_v36  ;;  %v3688_v43 = vpop.f32.mrb[30].mxu1 }
 0x1eb   :  { %v2921_v41 = vadd.f32 %v3665_v37, %v2881_v32  ;;  %v3689_v44 = vpop.f32.mrb[31].mxu1 }
 0x1ed   :  { %v2961_v45 = vadd.f32 %v3687_v42, %v2921_v41 }
 0x1ef   :  { %v2966_v46 = vmax.f32 %v2961_v45, 0.0 }
 0x1f1   :  { %v2967_v47 = vpack.c.bf16 %v2966_v46, %v2966_v46 }
 0x1f3   :  { %3705 = vmatmul.mubr.msk.bf16.vlgmr.msra.gmra.mrb[32].mxu0 %vm3007_vm1, %v2967_v47 }
 0x2c6   :  { %v3045_v50 = vpop.f32.mrb[32].mxu0 }
 0x2c7   :  { %v3046_v51 = vadd.f32 %v3333_v49, %v3045_v50  ;;  %v3706_v52 = vpop.f32.mrb[33].mxu0 }
 0x2c8   :  { %v3048_v53 = vpop.f32.mrb[34].mxu0 }
 0x2c9   :  { %v3707_v54 = vpop.f32.mrb[35].mxu0  ;;  %v3054_v55 = vsel %vm3053_vm2, %v3046_v51, -1e+30 }
 0x2ca   :  { %v3056_v56 = vsel %vm3055_vm3, %v3054_v55, -inf }
 0x2cb   :  { %3057 = vmax.xlane.f32.xlu0 %v3056_v56 }
 0x358   :  { %v3058_v57 = vpop.xlane.xlu0 %3057 }
 0x359   :  { %v3059_v58 = vsub.f32 %v3046_v51, %v3058_v57 }
 0x35b   :  { %v3060_v59 = vsel %vm3053_vm2, %v3059_v58, -1e+30 }
 0x35c   :  { %v3061_v60 = vmul.f32 1.442695, %v3060_v59 }
 0x35e   :  { %3978 = vpow2.f32 %v3061_v60 }
 0x368   :  { %v3979_v24 = vpop.eup %3978 }
 0x369   :  { %v3063_v61 = vsel %vm3055_vm3, %v3979_v24, 0.0 }
 0x36a   :  { %3064 = vadd.xlane.f32.xlu0 %v3063_v61 }
 0x3f7   :  { %v3065_v62 = vpop.xlane.xlu0 %3064 }
 0x3f8   :  { %3980 = vrcp.f32 %v3065_v62 }
 0x402   :  { %v3981_v63 = vpop.eup %3980 }
 0x403   :  { %v3067_v0 = vmul.f32 %v3981_v63, %v3979_v24 }
 0x405   :  { %v3069_v1 = vsel %vm3068_vm4, %v3046_v51, %v3067_v0 }
 0x406   :  { %3070 = vst [vmem:[%s4140_s5] sm:$0x3] %v3069_v1 }
 0x407   :  { %3075 = vsyncpa [#allocation3], 1 }

</bundles_post_ra>
